<compile_context>
chip_gen: v7x
topology: tpu7x:2x2x1
jax: 0.10.0
libtpu: 0.0.40
codegen_flags: <defaults>
</compile_context>

<pallas_src>
import jax
import jax.numpy as jnp
import numpy as np
from jax.experimental import pallas as pl
from jax.experimental.pallas import tpu as pltpu

EPS = 1e-5          # PyTorch BatchNorm2d default eps
LANE = 128          # TPU lane width


def _round_up(x, m):
    return ((x + m - 1) // m) * m


def _vmem_limit_bytes():
    try:
        kind = jax.devices()[0].device_kind.lower()
    except Exception:
        return None
    if "v5" in kind or "v6" in kind:
        return 96 * 1024 * 1024          # 128 MiB physical VMEM
    if "v7" in kind:
        return 48 * 1024 * 1024          # 64 MiB physical VMEM
    return None                          # unknown chip -> compiler default


def _cparams(n_grid_axes=1):
    return pltpu.CompilerParams(
        dimension_semantics=("parallel",) * n_grid_axes,
        vmem_limit_bytes=_vmem_limit_bytes(),
    )


# ---------------------------------------------------------------------------
# Kernels
# ---------------------------------------------------------------------------
def _make_conv1_kernel(ho, wo, stride, hq):
    """In-kernel 3x3 conv (stride via phase-split input) + BN partial stats."""
    def kernel(x_ref, w_ref, y_ref, st_ref):
        # x_ref: (stride*stride*hq, wq, Cin_p) bf16 phase planes of one image
        # w_ref: (9, Cin_p, Cp) bf16 (resident)   y_ref: (ho, wo, Cp) bf16
        # st_ref: (2, Cp) f32 -> row0 = sum, row1 = sum of squares
        cin_p = x_ref.shape[-1]
        cp = w_ref.shape[-1]
        acc = jnp.zeros((ho * wo, cp), jnp.float32)
        for kh in range(3):
            for kw in range(3):
                p = (kh % stride) * stride + (kw % stride)     # phase plane
                row0 = p * hq + kh // stride
                win = x_ref[pl.ds(row0, ho), pl.ds(kw // stride, wo), :]
                acc = acc + jnp.dot(win.reshape(ho * wo, cin_p),
                                    w_ref[kh * 3 + kw],
                                    preferred_element_type=jnp.float32)
        y_ref[...] = acc.reshape(ho, wo, cp).astype(y_ref.dtype)
        st_ref[pl.ds(0, 1), :] = jnp.sum(acc, axis=0, keepdims=True)
        st_ref[pl.ds(1, 1), :] = jnp.sum(acc * acc, axis=0, keepdims=True)
    return kernel


def _make_conv2_kernel(ho, wo):
    """Fused BN1+ReLU prologue -> 3x3 stride-1 conv -> BN2 partial stats."""
    def kernel(y1_ref, sc_ref, bi_ref, w_ref, y_ref, st_ref, zbuf):
        # y1_ref: (ho, wo, Cp) bf16   sc/bi: (1, Cp) f32   w_ref: (9, Cp, Cp) bf16
        # y_ref:  (ho, wo, Cp) f32    st_ref: (2, Cp) f32
        # zbuf:   (ho+2, wo+2, Cp) bf16 VMEM scratch (spatially padded conv2 input)
        cp = w_ref.shape[-1]
        sc = sc_ref[...].reshape(1, 1, cp)
        bi = bi_ref[...].reshape(1, 1, cp)
        a = jnp.maximum(y1_ref[...].astype(jnp.float32) * sc + bi, 0.0)
        # Build the zero-padded conv2 input in VMEM: pad pixels stay exactly 0.
        zbuf[...] = jnp.zeros((ho + 2, wo + 2, cp), jnp.bfloat16)
        zbuf[pl.ds(1, ho), pl.ds(1, wo), :] = a.astype(jnp.bfloat16)
        acc = jnp.zeros((ho * wo, cp), jnp.float32)
        for kh in range(3):
            for kw in range(3):
                win = zbuf[pl.ds(kh, ho), pl.ds(kw, wo), :]
                acc = acc + jnp.dot(win.reshape(ho * wo, cp),
                                    w_ref[kh * 3 + kw],
                                    preferred_element_type=jnp.float32)
        y_ref[...] = acc.reshape(ho, wo, cp)
        st_ref[pl.ds(0, 1), :] = jnp.sum(acc, axis=0, keepdims=True)
        st_ref[pl.ds(1, 1), :] = jnp.sum(acc * acc, axis=0, keepdims=True)
    return kernel


def _bn_proj_add_relu_kernel(y2_ref, xs_ref, wsc_ref, sc_ref, bi_ref, o_ref):
    # BN2 apply + fused 1x1 projection shortcut (MXU) + residual add + ReLU
    ho, wo, cp = y2_ref.shape
    cin_p = xs_ref.shape[-1]
    ident = jnp.dot(xs_ref[...].reshape(ho * wo, cin_p), wsc_ref[...],
                    preferred_element_type=jnp.float32).reshape(ho, wo, cp)
    sc = sc_ref[...].reshape(1, 1, cp)
    bi = bi_ref[...].reshape(1, 1, cp)
    o_ref[...] = jnp.maximum(y2_ref[...] * sc + bi + ident, 0.0)


def _bn_add_relu_kernel(y2_ref, xid_ref, sc_ref, bi_ref, o_ref):
    # BN2 apply + identity residual add (f32, no matmul, no bf16 cast) + ReLU
    ho, wo, cp = y2_ref.shape
    sc = sc_ref[...].reshape(1, 1, cp)
    bi = bi_ref[...].reshape(1, 1, cp)
    o_ref[...] = jnp.maximum(y2_ref[...] * sc + bi + xid_ref[...], 0.0)


# ---------------------------------------------------------------------------
# pallas_call wrappers
# ---------------------------------------------------------------------------
def _call_conv1(xph, w1, ho, wo, stride, hq):
    n, nrows, wq, cin_p = xph.shape
    cp = w1.shape[-1]
    flops = 2 * n * ho * wo * 9 * cin_p * cp
    bytes_acc = xph.size * 2 + w1.size * 2 + n * ho * wo * cp * 2 + n * 2 * cp * 4
    return pl.pallas_call(
        _make_conv1_kernel(ho, wo, stride, hq),
        grid=(n,),
        in_specs=[
            pl.BlockSpec((None, nrows, wq, cin_p), lambda b: (b, 0, 0, 0)),
            pl.BlockSpec((9, cin_p, cp), lambda b: (0, 0, 0)),        # resident
        ],
        out_specs=(
            pl.BlockSpec((None, ho, wo, cp), lambda b: (b, 0, 0, 0)),
            pl.BlockSpec((None, 2, cp), lambda b: (b, 0, 0)),
        ),
        out_shape=(
            jax.ShapeDtypeStruct((n, ho, wo, cp), jnp.bfloat16),      # y1 (bf16)
            jax.ShapeDtypeStruct((n, 2, cp), jnp.float32),            # stats1
        ),
        compiler_params=_cparams(1),
        cost_estimate=pl.CostEstimate(flops=flops, transcendentals=0,
                                      bytes_accessed=bytes_acc),
    )(xph, w1)


def _call_conv2(y1, scale1, bias1, w2, ho, wo):
    n = y1.shape[0]
    cp = w2.shape[-1]
    flops = 2 * n * ho * wo * 9 * cp * cp
    bytes_acc = y1.size * 2 + w2.size * 2 + n * ho * wo * cp * 4 + n * 2 * cp * 4
    return pl.pallas_call(
        _make_conv2_kernel(ho, wo),
        grid=(n,),
        in_specs=[
            pl.BlockSpec((None, ho, wo, cp), lambda b: (b, 0, 0, 0)),
            pl.BlockSpec((1, cp), lambda b: (0, 0)),                  # scale1
            pl.BlockSpec((1, cp), lambda b: (0, 0)),                  # bias1
            pl.BlockSpec((9, cp, cp), lambda b: (0, 0, 0)),           # resident
        ],
        out_specs=(
            pl.BlockSpec((None, ho, wo, cp), lambda b: (b, 0, 0, 0)),
            pl.BlockSpec((None, 2, cp), lambda b: (b, 0, 0)),
        ),
        out_shape=(
            jax.ShapeDtypeStruct((n, ho, wo, cp), jnp.float32),       # y2
            jax.ShapeDtypeStruct((n, 2, cp), jnp.float32),            # stats2
        ),
        scratch_shapes=[pltpu.VMEM((ho + 2, wo + 2, cp), jnp.bfloat16)],
        compiler_params=_cparams(1),
        cost_estimate=pl.CostEstimate(flops=flops, transcendentals=0,
                                      bytes_accessed=bytes_acc),
    )(y1, scale1, bias1, w2)


def _call_bn_proj_add_relu(y2, xs, wsc, scale2, bias2):
    n, ho, wo, cp = y2.shape
    cin_p = xs.shape[-1]
    flops = 2 * n * ho * wo * cin_p * cp + 3 * n * ho * wo * cp
    bytes_acc = y2.size * 4 + xs.size * 2 + wsc.size * 2 + n * ho * wo * cp * 4
    return pl.pallas_call(
        _bn_proj_add_relu_kernel,
        grid=(n,),
        in_specs=[
            pl.BlockSpec((None, ho, wo, cp), lambda b: (b, 0, 0, 0)),
            pl.BlockSpec((None, ho, wo, cin_p), lambda b: (b, 0, 0, 0)),
            pl.BlockSpec((cin_p, cp), lambda b: (0, 0)),              # resident
            pl.BlockSpec((1, cp), lambda b: (0, 0)),
            pl.BlockSpec((1, cp), lambda b: (0, 0)),
        ],
        out_specs=pl.BlockSpec((None, ho, wo, cp), lambda b: (b, 0, 0, 0)),
        out_shape=jax.ShapeDtypeStruct((n, ho, wo, cp), jnp.float32),
        compiler_params=_cparams(1),
        cost_estimate=pl.CostEstimate(flops=flops, transcendentals=0,
                                      bytes_accessed=bytes_acc),
    )(y2, xs, wsc, scale2, bias2)


def _call_bn_add_relu(y2, xid, scale2, bias2):
    n, ho, wo, cp = y2.shape
    return pl.pallas_call(
        _bn_add_relu_kernel,
        grid=(n,),
        in_specs=[
            pl.BlockSpec((None, ho, wo, cp), lambda b: (b, 0, 0, 0)),
            pl.BlockSpec((None, ho, wo, cp), lambda b: (b, 0, 0, 0)),
            pl.BlockSpec((1, cp), lambda b: (0, 0)),
            pl.BlockSpec((1, cp), lambda b: (0, 0)),
        ],
        out_specs=pl.BlockSpec((None, ho, wo, cp), lambda b: (b, 0, 0, 0)),
        out_shape=jax.ShapeDtypeStruct((n, ho, wo, cp), jnp.float32),
        compiler_params=_cparams(1),
        cost_estimate=pl.CostEstimate(flops=4 * n * ho * wo * cp, transcendentals=0,
                                      bytes_accessed=3 * n * ho * wo * cp * 4),
    )(y2, xid, scale2, bias2)


# ---------------------------------------------------------------------------
# JAX-side glue: phase split, BN fold, weight prep
# ---------------------------------------------------------------------------
def _phase_split(x_nhwc, cin_p, stride, hq, wq):
    """Zero-pad (spatial border=1 + channel pad) and split into stride*stride
    unit-stride phase planes so the conv1 kernel never needs strided loads.
    Same total bytes as the input (vs. ~9x for materialized im2col)."""
    n, h, w, c = x_nhwc.shape
    s = stride
    need_h = (s - 1) + s * hq
    need_w = (s - 1) + s * wq
    xp = jnp.pad(
        x_nhwc,
        ((0, 0),
         (1, max(1, need_h - (h + 1))),
         (1, max(1, need_w - (w + 1))),
         (0, cin_p - c)),
    ).astype(jnp.bfloat16)
    phases = [xp[:, a:a + s * hq:s, b:b + s * wq:s, :]
              for a in range(s) for b in range(s)]
    return jnp.concatenate(phases, axis=1)        # (N, s*s*hq, wq, cin_p)


def _fold_bn(stats, gamma_p, beta_p, m):
    # stats: (N, 2, Cp): row0 = per-image sum, row1 = per-image sum of squares.
    s = jnp.sum(stats[:, 0, :], axis=0)
    sq = jnp.sum(stats[:, 1, :], axis=0)
    mean = s / m
    var = jnp.maximum(sq / m - mean * mean, 0.0)   # biased var (PyTorch train fwd)
    inv = jax.lax.rsqrt(var + EPS)
    scale = gamma_p * inv
    bias = beta_p - mean * scale
    return scale.reshape(1, -1), bias.reshape(1, -1)


def prepare_params(params, in_ch, out_ch, stride):
    """One-time weight reshape / zero-pad into lane-dense bf16 tap slabs."""
    cp = _round_up(out_ch, LANE)
    cin_p = _round_up(in_ch, LANE)

    def slabs(w, ci, ci_p):
        # (O, I, 3, 3) -> (3, 3, I, O) -> (9, I, O) -> zero-pad -> bf16
        t = jnp.transpose(w, (2, 3, 1, 0)).reshape(9, ci, out_ch)
        return jnp.pad(t, ((0, 0), (0, ci_p - ci), (0, cp - out_ch))).astype(jnp.bfloat16)

    has_proj = params.get("wsc", None) is not None
    wsc = None
    if has_proj:
        w = params["wsc"].reshape(out_ch, in_ch).T            # (Cin, Cout)
        wsc = jnp.pad(w, ((0, cin_p - in_ch), (0, cp - out_ch))).astype(jnp.bfloat16)

    def padc(v):
        return jnp.pad(v.astype(jnp.float32), (0, cp - out_ch))

    return dict(stride=stride, in_ch=in_ch, out_ch=out_ch,
                Cp=cp, Cin_p=cin_p, has_proj=has_proj,
                w1=slabs(params["w1"], in_ch, cin_p),
                w2=slabs(params["w2"], out_ch, cp),
                wsc=wsc,
                g1=padc(params["g1"]), b1=padc(params["b1"]),
                g2=padc(params["g2"]), b2=padc(params["b2"]))


def resnet_block_forward(x_nchw, P):
    """x: (N, Cin, H, W) f32 -> (N, Cout, Ho, Wo) f32 (PyTorch training-mode BN)."""
    s, cin, cout = P["stride"], P["in_ch"], P["out_ch"]
    cin_p, cp = P["Cin_p"], P["Cp"]
    n, _, h, w = x_nchw.shape
    ho = (h + 2 - 3) // s + 1
    wo = (w + 2 - 3) // s + 1
    hq = ho + 2 // s
    wq = wo + 2 // s
    m = n * ho * wo

    x_nhwc = jnp.transpose(x_nchw, (0, 2, 3, 1)).astype(jnp.float32)

    # conv1 (3x3, stride, pad=1) + BN1 partial stats (two-pass exact BN)
    xph = _phase_split(x_nhwc, cin_p, s, hq, wq)
    y1, st1 = _call_conv1(xph, P["w1"], ho, wo, s, hq)
    scale1, bias1 = _fold_bn(st1, P["g1"], P["b1"], m)

    # BN1+ReLU fused into conv2 prologue; conv2 (3x3, stride 1, pad=1) + BN2 stats
    y2, st2 = _call_conv2(y1, scale1, bias1, P["w2"], ho, wo)
    scale2, bias2 = _fold_bn(st2, P["g2"], P["b2"], m)

    # BN2 apply + shortcut + residual + ReLU
    if P["has_proj"]:
        xs = x_nhwc[:, ::s, ::s, :]
        xs = jnp.pad(xs, ((0, 0), (0, 0), (0, 0), (0, cin_p - cin))).astype(jnp.bfloat16)
        out = _call_bn_proj_add_relu(y2, xs, P["wsc"], scale2, bias2)
    else:
        xid = x_nhwc[:, ::s, ::s, :]
        xid = jnp.pad(xid, ((0, 0), (0, 0), (0, 0), (0, cp - cin)))   # f32 identity
        out = _call_bn_add_relu(y2, xid, scale2, bias2)

    return jnp.transpose(out[..., :cout], (0, 3, 1, 2))


# ---------------------------------------------------------------------------
# Pure-JAX reference (correctness check only) and demo
# ---------------------------------------------------------------------------
def ref_forward(x, params, stride):
    def conv(y, wgt, s, pad):
        return jax.lax.conv_general_dilated(
            y, wgt, (s, s), ((pad, pad), (pad, pad)),
            dimension_numbers=("NCHW", "OIHW", "NCHW"))

    def bn(y, g, b):
        mean = jnp.mean(y, axis=(0, 2, 3), keepdims=True)
        var = jnp.mean(jnp.square(y - mean), axis=(0, 2, 3), keepdims=True)
        yn = (y - mean) * jax.lax.rsqrt(var + EPS)
        return yn * g.reshape(1, -1, 1, 1) + b.reshape(1, -1, 1, 1)

    out = jax.nn.relu(bn(conv(x, params["w1"], stride, 1), params["g1"], params["b1"]))
    out = bn(conv(out, params["w2"], 1, 1), params["g2"], params["b2"])
    identity = (conv(x, params["wsc"], stride, 0)
                if params.get("wsc", None) is not None else x)
    return jax.nn.relu(out + identity)


def init_params(key, in_ch, out_ch):
    k1, k2, k3, k4, k5 = jax.random.split(key, 5)
    params = {
        "w1": 0.1 * jax.random.normal(k1, (out_ch, in_ch, 3, 3), jnp.float32),
        "w2": 0.1 * jax.random.normal(k2, (out_ch, out_ch, 3, 3), jnp.float32),
        "g1": 1.0 + 0.1 * jax.random.normal(k4, (out_ch,), jnp.float32),
        "b1": 0.05 * jax.random.normal(k5, (out_ch,), jnp.float32),
        "g2": jnp.ones((out_ch,), jnp.float32),     # PyTorch default BN init
        "b2": jnp.zeros((out_ch,), jnp.float32),
    }
    params["wsc"] = (0.1 * jax.random.normal(k3, (out_ch, in_ch, 1, 1), jnp.float32)
                     if in_ch != out_ch else None)
    return params


if __name__ == "__main__":
    key = jax.random.PRNGKey(0)
    kx, kp = jax.random.split(key)

    N, in_ch, out_ch, H, W, stride = 2, 4, 8, 16, 16, 2
    x = jax.random.normal(kx, (N, in_ch, H, W), jnp.float32)
    params = init_params(kp, in_ch, out_ch)

    prepped = prepare_params(params, in_ch, out_ch, stride)   # one-time weight prep
    fwd = jax.jit(lambda xx: resnet_block_forward(xx, prepped))

    out = jax.block_until_ready(fwd(x))
    ref = jax.block_until_ready(ref_forward(x, params, stride))

    assert out.shape == ref.shape == (N, out_ch, H // stride, W // stride), out.shape
    # bf16 MXU operands (f32 accumulation / f32 BN math) -> slightly loose tolerance
    np.testing.assert_allclose(np.asarray(out), np.asarray(ref), rtol=2e-2, atol=2e-2)

    print("KERNEL_OK")
</pallas_src>

<mosaic_0001>
module attributes {stable_mosaic.version = 11 : i64} {
  func.func @kernel(%arg0: i32, %arg1: memref<1x36x9x128xbf16, #tpu.memory_space<vmem>>, %arg2: memref<9x128x128xbf16, #tpu.memory_space<vmem>>, %arg3: memref<1x8x8x128xbf16, #tpu.memory_space<vmem>>, %arg4: memref<1x2x128xf32, #tpu.memory_space<vmem>>) attributes {dimension_semantics = [#tpu.dimension_semantics<parallel>], iteration_bounds = array<i64: 2>, scalar_prefetch = 0 : i64, scratch_operands = 0 : i64, tpu.core_type = #tpu.core_type<tc>, window_params = [{transform_indices = @transform_0, window_bounds = array<i64: 1, 36, 9, 128>}, {pipeline_mode = #tpu.pipeline_mode<synchronous>, transform_indices = @transform_1, window_bounds = array<i64: 9, 128, 128>}, {transform_indices = @transform_2, window_bounds = array<i64: 1, 8, 8, 128>}, {transform_indices = @transform_3, window_bounds = array<i64: 1, 2, 128>}]} {
    %cst = arith.constant 0.000000e+00 : f32
    %0 = vector.broadcast %cst : f32 to vector<64x128xf32>
    %c0 = arith.constant 0 : index
    %c0_0 = arith.constant 0 : index
    %c0_1 = arith.constant 0 : index
    %c0_2 = arith.constant 0 : index
    %1 = vector.load %arg1[%c0, %c0_0, %c0_1, %c0_2] : memref<1x36x9x128xbf16, #tpu.memory_space<vmem>>, vector<1x8x8x128xbf16>
    %2 = vector.shape_cast %1 : vector<1x8x8x128xbf16> to vector<8x8x128xbf16>
    %3 = vector.shape_cast %2 : vector<8x8x128xbf16> to vector<64x128xbf16>
    %c0_3 = arith.constant 0 : index
    %c0_4 = arith.constant 0 : index
    %c0_5 = arith.constant 0 : index
    %4 = vector.load %arg2[%c0_3, %c0_4, %c0_5] : memref<9x128x128xbf16, #tpu.memory_space<vmem>>, vector<1x128x128xbf16>
    %5 = vector.shape_cast %4 : vector<1x128x128xbf16> to vector<128x128xbf16>
    %cst_6 = arith.constant dense<0.000000e+00> : vector<64x128xf32>
    %6 = tpu.matmul %3, %5, %cst_6 {dimension_numbers = #tpu.dot_dimension_numbers<[1], [0], [0], [1], [0, 0, 1, 1], [], []>} : vector<64x128xbf16>, vector<128x128xbf16>, vector<64x128xf32> -> vector<64x128xf32>
    %7 = arith.addf %0, %6 : vector<64x128xf32>
    %c0_7 = arith.constant 0 : index
    %c9 = arith.constant 9 : index
    %c0_8 = arith.constant 0 : index
    %c0_9 = arith.constant 0 : index
    %8 = vector.load %arg1[%c0_7, %c9, %c0_8, %c0_9] : memref<1x36x9x128xbf16, #tpu.memory_space<vmem>>, vector<1x8x8x128xbf16>
    %9 = vector.shape_cast %8 : vector<1x8x8x128xbf16> to vector<8x8x128xbf16>
    %10 = vector.shape_cast %9 : vector<8x8x128xbf16> to vector<64x128xbf16>
    %c1 = arith.constant 1 : index
    %c0_10 = arith.constant 0 : index
    %c0_11 = arith.constant 0 : index
    %11 = vector.load %arg2[%c1, %c0_10, %c0_11] : memref<9x128x128xbf16, #tpu.memory_space<vmem>>, vector<1x128x128xbf16>
    %12 = vector.shape_cast %11 : vector<1x128x128xbf16> to vector<128x128xbf16>
    %cst_12 = arith.constant dense<0.000000e+00> : vector<64x128xf32>
    %13 = tpu.matmul %10, %12, %cst_12 {dimension_numbers = #tpu.dot_dimension_numbers<[1], [0], [0], [1], [0, 0, 1, 1], [], []>} : vector<64x128xbf16>, vector<128x128xbf16>, vector<64x128xf32> -> vector<64x128xf32>
    %14 = arith.addf %7, %13 : vector<64x128xf32>
    %c0_13 = arith.constant 0 : index
    %c0_14 = arith.constant 0 : index
    %c1_15 = arith.constant 1 : index
    %c0_16 = arith.constant 0 : index
    %15 = vector.load %arg1[%c0_13, %c0_14, %c1_15, %c0_16] : memref<1x36x9x128xbf16, #tpu.memory_space<vmem>>, vector<1x8x8x128xbf16>
    %16 = vector.shape_cast %15 : vector<1x8x8x128xbf16> to vector<8x8x128xbf16>
    %17 = vector.shape_cast %16 : vector<8x8x128xbf16> to vector<64x128xbf16>
    %c2 = arith.constant 2 : index
    %c0_17 = arith.constant 0 : index
    %c0_18 = arith.constant 0 : index
    %18 = vector.load %arg2[%c2, %c0_17, %c0_18] : memref<9x128x128xbf16, #tpu.memory_space<vmem>>, vector<1x128x128xbf16>
    %19 = vector.shape_cast %18 : vector<1x128x128xbf16> to vector<128x128xbf16>
    %cst_19 = arith.constant dense<0.000000e+00> : vector<64x128xf32>
    %20 = tpu.matmul %17, %19, %cst_19 {dimension_numbers = #tpu.dot_dimension_numbers<[1], [0], [0], [1], [0, 0, 1, 1], [], []>} : vector<64x128xbf16>, vector<128x128xbf16>, vector<64x128xf32> -> vector<64x128xf32>
    %21 = arith.addf %14, %20 : vector<64x128xf32>
    %c0_20 = arith.constant 0 : index
    %c18 = arith.constant 18 : index
    %c0_21 = arith.constant 0 : index
    %c0_22 = arith.constant 0 : index
    %22 = vector.load %arg1[%c0_20, %c18, %c0_21, %c0_22] : memref<1x36x9x128xbf16, #tpu.memory_space<vmem>>, vector<1x8x8x128xbf16>
    %23 = vector.shape_cast %22 : vector<1x8x8x128xbf16> to vector<8x8x128xbf16>
    %24 = vector.shape_cast %23 : vector<8x8x128xbf16> to vector<64x128xbf16>
    %c3 = arith.constant 3 : index
    %c0_23 = arith.constant 0 : index
    %c0_24 = arith.constant 0 : index
    %25 = vector.load %arg2[%c3, %c0_23, %c0_24] : memref<9x128x128xbf16, #tpu.memory_space<vmem>>, vector<1x128x128xbf16>
    %26 = vector.shape_cast %25 : vector<1x128x128xbf16> to vector<128x128xbf16>
    %cst_25 = arith.constant dense<0.000000e+00> : vector<64x128xf32>
    %27 = tpu.matmul %24, %26, %cst_25 {dimension_numbers = #tpu.dot_dimension_numbers<[1], [0], [0], [1], [0, 0, 1, 1], [], []>} : vector<64x128xbf16>, vector<128x128xbf16>, vector<64x128xf32> -> vector<64x128xf32>
    %28 = arith.addf %21, %27 : vector<64x128xf32>
    %c0_26 = arith.constant 0 : index
    %c27 = arith.constant 27 : index
    %c0_27 = arith.constant 0 : index
    %c0_28 = arith.constant 0 : index
    %29 = vector.load %arg1[%c0_26, %c27, %c0_27, %c0_28] : memref<1x36x9x128xbf16, #tpu.memory_space<vmem>>, vector<1x8x8x128xbf16>
    %30 = vector.shape_cast %29 : vector<1x8x8x128xbf16> to vector<8x8x128xbf16>
    %31 = vector.shape_cast %30 : vector<8x8x128xbf16> to vector<64x128xbf16>
    %c4 = arith.constant 4 : index
    %c0_29 = arith.constant 0 : index
    %c0_30 = arith.constant 0 : index
    %32 = vector.load %arg2[%c4, %c0_29, %c0_30] : memref<9x128x128xbf16, #tpu.memory_space<vmem>>, vector<1x128x128xbf16>
    %33 = vector.shape_cast %32 : vector<1x128x128xbf16> to vector<128x128xbf16>
    %cst_31 = arith.constant dense<0.000000e+00> : vector<64x128xf32>
    %34 = tpu.matmul %31, %33, %cst_31 {dimension_numbers = #tpu.dot_dimension_numbers<[1], [0], [0], [1], [0, 0, 1, 1], [], []>} : vector<64x128xbf16>, vector<128x128xbf16>, vector<64x128xf32> -> vector<64x128xf32>
    %35 = arith.addf %28, %34 : vector<64x128xf32>
    %c0_32 = arith.constant 0 : index
    %c18_33 = arith.constant 18 : index
    %c1_34 = arith.constant 1 : index
    %c0_35 = arith.constant 0 : index
    %36 = vector.load %arg1[%c0_32, %c18_33, %c1_34, %c0_35] : memref<1x36x9x128xbf16, #tpu.memory_space<vmem>>, vector<1x8x8x128xbf16>
    %37 = vector.shape_cast %36 : vector<1x8x8x128xbf16> to vector<8x8x128xbf16>
    %38 = vector.shape_cast %37 : vector<8x8x128xbf16> to vector<64x128xbf16>
    %c5 = arith.constant 5 : index
    %c0_36 = arith.constant 0 : index
    %c0_37 = arith.constant 0 : index
    %39 = vector.load %arg2[%c5, %c0_36, %c0_37] : memref<9x128x128xbf16, #tpu.memory_space<vmem>>, vector<1x128x128xbf16>
    %40 = vector.shape_cast %39 : vector<1x128x128xbf16> to vector<128x128xbf16>
    %cst_38 = arith.constant dense<0.000000e+00> : vector<64x128xf32>
    %41 = tpu.matmul %38, %40, %cst_38 {dimension_numbers = #tpu.dot_dimension_numbers<[1], [0], [0], [1], [0, 0, 1, 1], [], []>} : vector<64x128xbf16>, vector<128x128xbf16>, vector<64x128xf32> -> vector<64x128xf32>
    %42 = arith.addf %35, %41 : vector<64x128xf32>
    %c0_39 = arith.constant 0 : index
    %c1_40 = arith.constant 1 : index
    %c0_41 = arith.constant 0 : index
    %c0_42 = arith.constant 0 : index
    %43 = vector.load %arg1[%c0_39, %c1_40, %c0_41, %c0_42] : memref<1x36x9x128xbf16, #tpu.memory_space<vmem>>, vector<1x8x8x128xbf16>
    %44 = vector.shape_cast %43 : vector<1x8x8x128xbf16> to vector<8x8x128xbf16>
    %45 = vector.shape_cast %44 : vector<8x8x128xbf16> to vector<64x128xbf16>
    %c6 = arith.constant 6 : index
    %c0_43 = arith.constant 0 : index
    %c0_44 = arith.constant 0 : index
    %46 = vector.load %arg2[%c6, %c0_43, %c0_44] : memref<9x128x128xbf16, #tpu.memory_space<vmem>>, vector<1x128x128xbf16>
    %47 = vector.shape_cast %46 : vector<1x128x128xbf16> to vector<128x128xbf16>
    %cst_45 = arith.constant dense<0.000000e+00> : vector<64x128xf32>
    %48 = tpu.matmul %45, %47, %cst_45 {dimension_numbers = #tpu.dot_dimension_numbers<[1], [0], [0], [1], [0, 0, 1, 1], [], []>} : vector<64x128xbf16>, vector<128x128xbf16>, vector<64x128xf32> -> vector<64x128xf32>
    %49 = arith.addf %42, %48 : vector<64x128xf32>
    %c0_46 = arith.constant 0 : index
    %c10 = arith.constant 10 : index
    %c0_47 = arith.constant 0 : index
    %c0_48 = arith.constant 0 : index
    %50 = vector.load %arg1[%c0_46, %c10, %c0_47, %c0_48] : memref<1x36x9x128xbf16, #tpu.memory_space<vmem>>, vector<1x8x8x128xbf16>
    %51 = vector.shape_cast %50 : vector<1x8x8x128xbf16> to vector<8x8x128xbf16>
    %52 = vector.shape_cast %51 : vector<8x8x128xbf16> to vector<64x128xbf16>
    %c7 = arith.constant 7 : index
    %c0_49 = arith.constant 0 : index
    %c0_50 = arith.constant 0 : index
    %53 = vector.load %arg2[%c7, %c0_49, %c0_50] : memref<9x128x128xbf16, #tpu.memory_space<vmem>>, vector<1x128x128xbf16>
    %54 = vector.shape_cast %53 : vector<1x128x128xbf16> to vector<128x128xbf16>
    %cst_51 = arith.constant dense<0.000000e+00> : vector<64x128xf32>
    %55 = tpu.matmul %52, %54, %cst_51 {dimension_numbers = #tpu.dot_dimension_numbers<[1], [0], [0], [1], [0, 0, 1, 1], [], []>} : vector<64x128xbf16>, vector<128x128xbf16>, vector<64x128xf32> -> vector<64x128xf32>
    %56 = arith.addf %49, %55 : vector<64x128xf32>
    %c0_52 = arith.constant 0 : index
    %c1_53 = arith.constant 1 : index
    %c1_54 = arith.constant 1 : index
    %c0_55 = arith.constant 0 : index
    %57 = vector.load %arg1[%c0_52, %c1_53, %c1_54, %c0_55] : memref<1x36x9x128xbf16, #tpu.memory_space<vmem>>, vector<1x8x8x128xbf16>
    %58 = vector.shape_cast %57 : vector<1x8x8x128xbf16> to vector<8x8x128xbf16>
    %59 = vector.shape_cast %58 : vector<8x8x128xbf16> to vector<64x128xbf16>
    %c8 = arith.constant 8 : index
    %c0_56 = arith.constant 0 : index
    %c0_57 = arith.constant 0 : index
    %60 = vector.load %arg2[%c8, %c0_56, %c0_57] : memref<9x128x128xbf16, #tpu.memory_space<vmem>>, vector<1x128x128xbf16>
    %61 = vector.shape_cast %60 : vector<1x128x128xbf16> to vector<128x128xbf16>
    %cst_58 = arith.constant dense<0.000000e+00> : vector<64x128xf32>
    %62 = tpu.matmul %59, %61, %cst_58 {dimension_numbers = #tpu.dot_dimension_numbers<[1], [0], [0], [1], [0, 0, 1, 1], [], []>} : vector<64x128xbf16>, vector<128x128xbf16>, vector<64x128xf32> -> vector<64x128xf32>
    %63 = arith.addf %56, %62 : vector<64x128xf32>
    %64 = vector.shape_cast %63 : vector<64x128xf32> to vector<8x8x128xf32>
    %65 = arith.truncf %64 : vector<8x8x128xf32> to vector<8x8x128xbf16>
    %c0_59 = arith.constant 0 : index
    %c0_60 = arith.constant 0 : index
    %c0_61 = arith.constant 0 : index
    %c0_62 = arith.constant 0 : index
    %66 = vector.load %arg3[%c0_59, %c0_60, %c0_61, %c0_62] : memref<1x8x8x128xbf16, #tpu.memory_space<vmem>>, vector<1x8x8x128xbf16>
    %67 = vector.shape_cast %66 : vector<1x8x8x128xbf16> to vector<8x8x128xbf16>
    %68 = vector.shape_cast %65 : vector<8x8x128xbf16> to vector<1x8x8x128xbf16>
    tpu.vector_store %arg3[%c0_59, %c0_60, %c0_61, %c0_62], %68 {strides = array<i32>} : memref<1x8x8x128xbf16, #tpu.memory_space<vmem>>, vector<1x8x8x128xbf16>,
    %cst_63 = arith.constant dense<0.000000e+00> : vector<128xf32>
    %69 = vector.multi_reduction <add>, %63, %cst_63 [0] : vector<64x128xf32> to vector<128xf32>
    %70 = vector.shape_cast %69 : vector<128xf32> to vector<1x128xf32>
    %c0_64 = arith.constant 0 : index
    %c0_65 = arith.constant 0 : index
    %c0_66 = arith.constant 0 : index
    %71 = vector.load %arg4[%c0_64, %c0_65, %c0_66] : memref<1x2x128xf32, #tpu.memory_space<vmem>>, vector<1x1x128xf32>
    %72 = vector.shape_cast %71 : vector<1x1x128xf32> to vector<1x128xf32>
    %73 = vector.shape_cast %70 : vector<1x128xf32> to vector<1x1x128xf32>
    tpu.vector_store %arg4[%c0_64, %c0_65, %c0_66], %73 {strides = array<i32>} : memref<1x2x128xf32, #tpu.memory_space<vmem>>, vector<1x1x128xf32>,
    %74 = arith.mulf %63, %63 : vector<64x128xf32>
    %cst_67 = arith.constant dense<0.000000e+00> : vector<128xf32>
    %75 = vector.multi_reduction <add>, %74, %cst_67 [0] : vector<64x128xf32> to vector<128xf32>
    %76 = vector.shape_cast %75 : vector<128xf32> to vector<1x128xf32>
    %c0_68 = arith.constant 0 : index
    %c1_69 = arith.constant 1 : index
    %c0_70 = arith.constant 0 : index
    %77 = vector.load %arg4[%c0_68, %c1_69, %c0_70] : memref<1x2x128xf32, #tpu.memory_space<vmem>>, vector<1x1x128xf32>
    %78 = vector.shape_cast %77 : vector<1x1x128xf32> to vector<1x128xf32>
    %79 = vector.shape_cast %76 : vector<1x128xf32> to vector<1x1x128xf32>
    tpu.vector_store %arg4[%c0_68, %c1_69, %c0_70], %79 {strides = array<i32>} : memref<1x2x128xf32, #tpu.memory_space<vmem>>, vector<1x1x128xf32>,
    return
  }
  func.func @transform_0(%arg0: i32) -> (i32, i32, i32, i32) {
    %c0_i32 = arith.constant 0 : i32
    %c0_i32_0 = arith.constant 0 : i32
    %c0_i32_1 = arith.constant 0 : i32
    %c0_i32_2 = arith.constant 0 : i32
    return %arg0, %c0_i32, %c0_i32_0, %c0_i32_1 : i32, i32, i32, i32
  }
  func.func @transform_1(%arg0: i32) -> (i32, i32, i32) {
    %c0_i32 = arith.constant 0 : i32
    %c0_i32_0 = arith.constant 0 : i32
    %c0_i32_1 = arith.constant 0 : i32
    %c0_i32_2 = arith.constant 0 : i32
    return %c0_i32, %c0_i32_0, %c0_i32_1 : i32, i32, i32
  }
  func.func @transform_2(%arg0: i32) -> (i32, i32, i32, i32) {
    %c0_i32 = arith.constant 0 : i32
    %c0_i32_0 = arith.constant 0 : i32
    %c0_i32_1 = arith.constant 0 : i32
    %c0_i32_2 = arith.constant 0 : i32
    return %arg0, %c0_i32, %c0_i32_0, %c0_i32_1 : i32, i32, i32, i32
  }
  func.func @transform_3(%arg0: i32) -> (i32, i32, i32) {
    %c0_i32 = arith.constant 0 : i32
    %c0_i32_0 = arith.constant 0 : i32
    %c0_i32_1 = arith.constant 0 : i32
    return %arg0, %c0_i32, %c0_i32_0 : i32, i32, i32
  }
}

module attributes {stable_mosaic.version = 11 : i64} {
  func.func @_bn_proj_add_relu_kernel(%arg0: i32, %arg1: memref<1x8x8x128xf32, #tpu.memory_space<vmem>>, %arg2: memref<1x8x8x128xbf16, #tpu.memory_space<vmem>>, %arg3: memref<128x128xbf16, #tpu.memory_space<vmem>>, %arg4: memref<1x128xf32, #tpu.memory_space<vmem>>, %arg5: memref<1x128xf32, #tpu.memory_space<vmem>>, %arg6: memref<1x8x8x128xf32, #tpu.memory_space<vmem>>) attributes {dimension_semantics = [#tpu.dimension_semantics<parallel>], iteration_bounds = array<i64: 2>, scalar_prefetch = 0 : i64, scratch_operands = 0 : i64, tpu.core_type = #tpu.core_type<tc>, window_params = [{transform_indices = @transform_0, window_bounds = array<i64: 1, 8, 8, 128>}, {transform_indices = @transform_1, window_bounds = array<i64: 1, 8, 8, 128>}, {pipeline_mode = #tpu.pipeline_mode<synchronous>, transform_indices = @transform_2, window_bounds = array<i64: 128, 128>}, {pipeline_mode = #tpu.pipeline_mode<synchronous>, transform_indices = @transform_3, window_bounds = array<i64: 1, 128>}, {pipeline_mode = #tpu.pipeline_mode<synchronous>, transform_indices = @transform_4, window_bounds = array<i64: 1, 128>}, {transform_indices = @transform_5, window_bounds = array<i64: 1, 8, 8, 128>}]} {
    %c0 = arith.constant 0 : index
    %c0_0 = arith.constant 0 : index
    %c0_1 = arith.constant 0 : index
    %c0_2 = arith.constant 0 : index
    %0 = vector.load %arg2[%c0, %c0_0, %c0_1, %c0_2] : memref<1x8x8x128xbf16, #tpu.memory_space<vmem>>, vector<1x8x8x128xbf16>
    %1 = vector.shape_cast %0 : vector<1x8x8x128xbf16> to vector<8x8x128xbf16>
    %2 = vector.shape_cast %1 : vector<8x8x128xbf16> to vector<64x128xbf16>
    %c0_3 = arith.constant 0 : index
    %c0_4 = arith.constant 0 : index
    %3 = vector.load %arg3[%c0_3, %c0_4] : memref<128x128xbf16, #tpu.memory_space<vmem>>, vector<128x128xbf16>
    %cst = arith.constant dense<0.000000e+00> : vector<64x128xf32>
    %4 = tpu.matmul %2, %3, %cst {dimension_numbers = #tpu.dot_dimension_numbers<[1], [0], [0], [1], [0, 0, 1, 1], [], []>} : vector<64x128xbf16>, vector<128x128xbf16>, vector<64x128xf32> -> vector<64x128xf32>
    %5 = vector.shape_cast %4 : vector<64x128xf32> to vector<8x8x128xf32>
    %c0_5 = arith.constant 0 : index
    %c0_6 = arith.constant 0 : index
    %6 = vector.load %arg4[%c0_5, %c0_6] : memref<1x128xf32, #tpu.memory_space<vmem>>, vector<1x128xf32>
    %7 = vector.shape_cast %6 : vector<1x128xf32> to vector<1x1x128xf32>
    %c0_7 = arith.constant 0 : index
    %c0_8 = arith.constant 0 : index
    %8 = vector.load %arg5[%c0_7, %c0_8] : memref<1x128xf32, #tpu.memory_space<vmem>>, vector<1x128xf32>
    %9 = vector.shape_cast %8 : vector<1x128xf32> to vector<1x1x128xf32>
    %c0_9 = arith.constant 0 : index
    %c0_10 = arith.constant 0 : index
    %c0_11 = arith.constant 0 : index
    %c0_12 = arith.constant 0 : index
    %10 = vector.load %arg1[%c0_9, %c0_10, %c0_11, %c0_12] : memref<1x8x8x128xf32, #tpu.memory_space<vmem>>, vector<1x8x8x128xf32>
    %11 = vector.shape_cast %10 : vector<1x8x8x128xf32> to vector<8x8x128xf32>
    %12 = vector.broadcast %7 : vector<1x1x128xf32> to vector<8x8x128xf32>
    %13 = arith.mulf %11, %12 : vector<8x8x128xf32>
    %14 = vector.broadcast %9 : vector<1x1x128xf32> to vector<8x8x128xf32>
    %15 = arith.addf %13, %14 : vector<8x8x128xf32>
    %16 = arith.addf %15, %5 : vector<8x8x128xf32>
    %cst_13 = arith.constant 0.000000e+00 : f32
    %17 = vector.broadcast %cst_13 : f32 to vector<8x8x128xf32>
    %18 = arith.maximumf %16, %17 : vector<8x8x128xf32>
    %c0_14 = arith.constant 0 : index
    %c0_15 = arith.constant 0 : index
    %c0_16 = arith.constant 0 : index
    %c0_17 = arith.constant 0 : index
    %19 = vector.load %arg6[%c0_14, %c0_15, %c0_16, %c0_17] : memref<1x8x8x128xf32, #tpu.memory_space<vmem>>, vector<1x8x8x128xf32>
    %20 = vector.shape_cast %19 : vector<1x8x8x128xf32> to vector<8x8x128xf32>
    %21 = vector.shape_cast %18 : vector<8x8x128xf32> to vector<1x8x8x128xf32>
    tpu.vector_store %arg6[%c0_14, %c0_15, %c0_16, %c0_17], %21 {strides = array<i32>} : memref<1x8x8x128xf32, #tpu.memory_space<vmem>>, vector<1x8x8x128xf32>,
    return
  }
  func.func @transform_0(%arg0: i32) -> (i32, i32, i32, i32) {
    %c0_i32 = arith.constant 0 : i32
    %c0_i32_0 = arith.constant 0 : i32
    %c0_i32_1 = arith.constant 0 : i32
    %c0_i32_2 = arith.constant 0 : i32
    return %arg0, %c0_i32, %c0_i32_0, %c0_i32_1 : i32, i32, i32, i32
  }
  func.func @transform_1(%arg0: i32) -> (i32, i32, i32, i32) {
    %c0_i32 = arith.constant 0 : i32
    %c0_i32_0 = arith.constant 0 : i32
    %c0_i32_1 = arith.constant 0 : i32
    %c0_i32_2 = arith.constant 0 : i32
    return %arg0, %c0_i32, %c0_i32_0, %c0_i32_1 : i32, i32, i32, i32
  }
  func.func @transform_2(%arg0: i32) -> (i32, i32) {
    %c0_i32 = arith.constant 0 : i32
    %c0_i32_0 = arith.constant 0 : i32
    %c0_i32_1 = arith.constant 0 : i32
    return %c0_i32, %c0_i32_0 : i32, i32
  }
  func.func @transform_3(%arg0: i32) -> (i32, i32) {
    %c0_i32 = arith.constant 0 : i32
    %c0_i32_0 = arith.constant 0 : i32
    %c0_i32_1 = arith.constant 0 : i32
    return %c0_i32, %c0_i32_0 : i32, i32
  }
  func.func @transform_4(%arg0: i32) -> (i32, i32) {
    %c0_i32 = arith.constant 0 : i32
    %c0_i32_0 = arith.constant 0 : i32
    %c0_i32_1 = arith.constant 0 : i32
    return %c0_i32, %c0_i32_0 : i32, i32
  }
  func.func @transform_5(%arg0: i32) -> (i32, i32, i32, i32) {
    %c0_i32 = arith.constant 0 : i32
    %c0_i32_0 = arith.constant 0 : i32
    %c0_i32_1 = arith.constant 0 : i32
    %c0_i32_2 = arith.constant 0 : i32
    return %arg0, %c0_i32, %c0_i32_0, %c0_i32_1 : i32, i32, i32, i32
  }
}

module attributes {stable_mosaic.version = 11 : i64} {
  func.func @kernel(%arg0: i32, %arg1: memref<1x8x8x128xbf16, #tpu.memory_space<vmem>>, %arg2: memref<1x128xf32, #tpu.memory_space<vmem>>, %arg3: memref<1x128xf32, #tpu.memory_space<vmem>>, %arg4: memref<9x128x128xbf16, #tpu.memory_space<vmem>>, %arg5: memref<1x8x8x128xf32, #tpu.memory_space<vmem>>, %arg6: memref<1x2x128xf32, #tpu.memory_space<vmem>>, %arg7: memref<10x10x128xbf16, #tpu.memory_space<vmem>>) attributes {dimension_semantics = [#tpu.dimension_semantics<parallel>], iteration_bounds = array<i64: 2>, scalar_prefetch = 0 : i64, scratch_operands = 1 : i64, tpu.core_type = #tpu.core_type<tc>, window_params = [{transform_indices = @transform_0, window_bounds = array<i64: 1, 8, 8, 128>}, {pipeline_mode = #tpu.pipeline_mode<synchronous>, transform_indices = @transform_1, window_bounds = array<i64: 1, 128>}, {pipeline_mode = #tpu.pipeline_mode<synchronous>, transform_indices = @transform_2, window_bounds = array<i64: 1, 128>}, {pipeline_mode = #tpu.pipeline_mode<synchronous>, transform_indices = @transform_3, window_bounds = array<i64: 9, 128, 128>}, {transform_indices = @transform_4, window_bounds = array<i64: 1, 8, 8, 128>}, {transform_indices = @transform_5, window_bounds = array<i64: 1, 2, 128>}]} {
    %c0 = arith.constant 0 : index
    %c0_0 = arith.constant 0 : index
    %0 = vector.load %arg2[%c0, %c0_0] : memref<1x128xf32, #tpu.memory_space<vmem>>, vector<1x128xf32>
    %1 = vector.shape_cast %0 : vector<1x128xf32> to vector<1x1x128xf32>
    %c0_1 = arith.constant 0 : index
    %c0_2 = arith.constant 0 : index
    %2 = vector.load %arg3[%c0_1, %c0_2] : memref<1x128xf32, #tpu.memory_space<vmem>>, vector<1x128xf32>
    %3 = vector.shape_cast %2 : vector<1x128xf32> to vector<1x1x128xf32>
    %c0_3 = arith.constant 0 : index
    %c0_4 = arith.constant 0 : index
    %c0_5 = arith.constant 0 : index
    %c0_6 = arith.constant 0 : index
    %4 = vector.load %arg1[%c0_3, %c0_4, %c0_5, %c0_6] : memref<1x8x8x128xbf16, #tpu.memory_space<vmem>>, vector<1x8x8x128xbf16>
    %5 = vector.shape_cast %4 : vector<1x8x8x128xbf16> to vector<8x8x128xbf16>
    %6 = arith.extf %5 : vector<8x8x128xbf16> to vector<8x8x128xf32>
    %7 = vector.broadcast %1 : vector<1x1x128xf32> to vector<8x8x128xf32>
    %8 = arith.mulf %6, %7 : vector<8x8x128xf32>
    %9 = vector.broadcast %3 : vector<1x1x128xf32> to vector<8x8x128xf32>
    %10 = arith.addf %8, %9 : vector<8x8x128xf32>
    %cst = arith.constant 0.000000e+00 : f32
    %11 = vector.broadcast %cst : f32 to vector<8x8x128xf32>
    %12 = arith.maximumf %10, %11 : vector<8x8x128xf32>
    %cst_7 = arith.constant 0.000000e+00 : bf16
    %13 = vector.broadcast %cst_7 : bf16 to vector<10x10x128xbf16>
    %c0_8 = arith.constant 0 : index
    %c0_9 = arith.constant 0 : index
    %c0_10 = arith.constant 0 : index
    %14 = vector.load %arg7[%c0_8, %c0_9, %c0_10] : memref<10x10x128xbf16, #tpu.memory_space<vmem>>, vector<10x10x128xbf16>
    tpu.vector_store %arg7[%c0_8, %c0_9, %c0_10], %13 {strides = array<i32>} : memref<10x10x128xbf16, #tpu.memory_space<vmem>>, vector<10x10x128xbf16>,
    %15 = arith.truncf %12 : vector<8x8x128xf32> to vector<8x8x128xbf16>
    %c1 = arith.constant 1 : index
    %c1_11 = arith.constant 1 : index
    %c0_12 = arith.constant 0 : index
    %16 = vector.load %arg7[%c1, %c1_11, %c0_12] : memref<10x10x128xbf16, #tpu.memory_space<vmem>>, vector<8x8x128xbf16>
    tpu.vector_store %arg7[%c1, %c1_11, %c0_12], %15 {strides = array<i32>} : memref<10x10x128xbf16, #tpu.memory_space<vmem>>, vector<8x8x128xbf16>,
    %cst_13 = arith.constant 0.000000e+00 : f32
    %17 = vector.broadcast %cst_13 : f32 to vector<64x128xf32>
    %c0_14 = arith.constant 0 : index
    %c0_15 = arith.constant 0 : index
    %c0_16 = arith.constant 0 : index
    %18 = vector.load %arg7[%c0_14, %c0_15, %c0_16] : memref<10x10x128xbf16, #tpu.memory_space<vmem>>, vector<8x8x128xbf16>
    %19 = vector.shape_cast %18 : vector<8x8x128xbf16> to vector<64x128xbf16>
    %c0_17 = arith.constant 0 : index
    %c0_18 = arith.constant 0 : index
    %c0_19 = arith.constant 0 : index
    %20 = vector.load %arg4[%c0_17, %c0_18, %c0_19] : memref<9x128x128xbf16, #tpu.memory_space<vmem>>, vector<1x128x128xbf16>
    %21 = vector.shape_cast %20 : vector<1x128x128xbf16> to vector<128x128xbf16>
    %cst_20 = arith.constant dense<0.000000e+00> : vector<64x128xf32>
    %22 = tpu.matmul %19, %21, %cst_20 {dimension_numbers = #tpu.dot_dimension_numbers<[1], [0], [0], [1], [0, 0, 1, 1], [], []>} : vector<64x128xbf16>, vector<128x128xbf16>, vector<64x128xf32> -> vector<64x128xf32>
    %23 = arith.addf %17, %22 : vector<64x128xf32>
    %c0_21 = arith.constant 0 : index
    %c1_22 = arith.constant 1 : index
    %c0_23 = arith.constant 0 : index
    %24 = vector.load %arg7[%c0_21, %c1_22, %c0_23] : memref<10x10x128xbf16, #tpu.memory_space<vmem>>, vector<8x8x128xbf16>
    %25 = vector.shape_cast %24 : vector<8x8x128xbf16> to vector<64x128xbf16>
    %c1_24 = arith.constant 1 : index
    %c0_25 = arith.constant 0 : index
    %c0_26 = arith.constant 0 : index
    %26 = vector.load %arg4[%c1_24, %c0_25, %c0_26] : memref<9x128x128xbf16, #tpu.memory_space<vmem>>, vector<1x128x128xbf16>
    %27 = vector.shape_cast %26 : vector<1x128x128xbf16> to vector<128x128xbf16>
    %cst_27 = arith.constant dense<0.000000e+00> : vector<64x128xf32>
    %28 = tpu.matmul %25, %27, %cst_27 {dimension_numbers = #tpu.dot_dimension_numbers<[1], [0], [0], [1], [0, 0, 1, 1], [], []>} : vector<64x128xbf16>, vector<128x128xbf16>, vector<64x128xf32> -> vector<64x128xf32>
    %29 = arith.addf %23, %28 : vector<64x128xf32>
    %c0_28 = arith.constant 0 : index
    %c2 = arith.constant 2 : index
    %c0_29 = arith.constant 0 : index
    %30 = vector.load %arg7[%c0_28, %c2, %c0_29] : memref<10x10x128xbf16, #tpu.memory_space<vmem>>, vector<8x8x128xbf16>
    %31 = vector.shape_cast %30 : vector<8x8x128xbf16> to vector<64x128xbf16>
    %c2_30 = arith.constant 2 : index
    %c0_31 = arith.constant 0 : index
    %c0_32 = arith.constant 0 : index
    %32 = vector.load %arg4[%c2_30, %c0_31, %c0_32] : memref<9x128x128xbf16, #tpu.memory_space<vmem>>, vector<1x128x128xbf16>
    %33 = vector.shape_cast %32 : vector<1x128x128xbf16> to vector<128x128xbf16>
    %cst_33 = arith.constant dense<0.000000e+00> : vector<64x128xf32>
    %34 = tpu.matmul %31, %33, %cst_33 {dimension_numbers = #tpu.dot_dimension_numbers<[1], [0], [0], [1], [0, 0, 1, 1], [], []>} : vector<64x128xbf16>, vector<128x128xbf16>, vector<64x128xf32> -> vector<64x128xf32>
    %35 = arith.addf %29, %34 : vector<64x128xf32>
    %c1_34 = arith.constant 1 : index
    %c0_35 = arith.constant 0 : index
    %c0_36 = arith.constant 0 : index
    %36 = vector.load %arg7[%c1_34, %c0_35, %c0_36] : memref<10x10x128xbf16, #tpu.memory_space<vmem>>, vector<8x8x128xbf16>
    %37 = vector.shape_cast %36 : vector<8x8x128xbf16> to vector<64x128xbf16>
    %c3 = arith.constant 3 : index
    %c0_37 = arith.constant 0 : index
    %c0_38 = arith.constant 0 : index
    %38 = vector.load %arg4[%c3, %c0_37, %c0_38] : memref<9x128x128xbf16, #tpu.memory_space<vmem>>, vector<1x128x128xbf16>
    %39 = vector.shape_cast %38 : vector<1x128x128xbf16> to vector<128x128xbf16>
    %cst_39 = arith.constant dense<0.000000e+00> : vector<64x128xf32>
    %40 = tpu.matmul %37, %39, %cst_39 {dimension_numbers = #tpu.dot_dimension_numbers<[1], [0], [0], [1], [0, 0, 1, 1], [], []>} : vector<64x128xbf16>, vector<128x128xbf16>, vector<64x128xf32> -> vector<64x128xf32>
    %41 = arith.addf %35, %40 : vector<64x128xf32>
    %c1_40 = arith.constant 1 : index
    %c1_41 = arith.constant 1 : index
    %c0_42 = arith.constant 0 : index
    %42 = vector.load %arg7[%c1_40, %c1_41, %c0_42] : memref<10x10x128xbf16, #tpu.memory_space<vmem>>, vector<8x8x128xbf16>
    %43 = vector.shape_cast %42 : vector<8x8x128xbf16> to vector<64x128xbf16>
    %c4 = arith.constant 4 : index
    %c0_43 = arith.constant 0 : index
    %c0_44 = arith.constant 0 : index
    %44 = vector.load %arg4[%c4, %c0_43, %c0_44] : memref<9x128x128xbf16, #tpu.memory_space<vmem>>, vector<1x128x128xbf16>
    %45 = vector.shape_cast %44 : vector<1x128x128xbf16> to vector<128x128xbf16>
    %cst_45 = arith.constant dense<0.000000e+00> : vector<64x128xf32>
    %46 = tpu.matmul %43, %45, %cst_45 {dimension_numbers = #tpu.dot_dimension_numbers<[1], [0], [0], [1], [0, 0, 1, 1], [], []>} : vector<64x128xbf16>, vector<128x128xbf16>, vector<64x128xf32> -> vector<64x128xf32>
    %47 = arith.addf %41, %46 : vector<64x128xf32>
    %c1_46 = arith.constant 1 : index
    %c2_47 = arith.constant 2 : index
    %c0_48 = arith.constant 0 : index
    %48 = vector.load %arg7[%c1_46, %c2_47, %c0_48] : memref<10x10x128xbf16, #tpu.memory_space<vmem>>, vector<8x8x128xbf16>
    %49 = vector.shape_cast %48 : vector<8x8x128xbf16> to vector<64x128xbf16>
    %c5 = arith.constant 5 : index
    %c0_49 = arith.constant 0 : index
    %c0_50 = arith.constant 0 : index
    %50 = vector.load %arg4[%c5, %c0_49, %c0_50] : memref<9x128x128xbf16, #tpu.memory_space<vmem>>, vector<1x128x128xbf16>
    %51 = vector.shape_cast %50 : vector<1x128x128xbf16> to vector<128x128xbf16>
    %cst_51 = arith.constant dense<0.000000e+00> : vector<64x128xf32>
    %52 = tpu.matmul %49, %51, %cst_51 {dimension_numbers = #tpu.dot_dimension_numbers<[1], [0], [0], [1], [0, 0, 1, 1], [], []>} : vector<64x128xbf16>, vector<128x128xbf16>, vector<64x128xf32> -> vector<64x128xf32>
    %53 = arith.addf %47, %52 : vector<64x128xf32>
    %c2_52 = arith.constant 2 : index
    %c0_53 = arith.constant 0 : index
    %c0_54 = arith.constant 0 : index
    %54 = vector.load %arg7[%c2_52, %c0_53, %c0_54] : memref<10x10x128xbf16, #tpu.memory_space<vmem>>, vector<8x8x128xbf16>
    %55 = vector.shape_cast %54 : vector<8x8x128xbf16> to vector<64x128xbf16>
    %c6 = arith.constant 6 : index
    %c0_55 = arith.constant 0 : index
    %c0_56 = arith.constant 0 : index
    %56 = vector.load %arg4[%c6, %c0_55, %c0_56] : memref<9x128x128xbf16, #tpu.memory_space<vmem>>, vector<1x128x128xbf16>
    %57 = vector.shape_cast %56 : vector<1x128x128xbf16> to vector<128x128xbf16>
    %cst_57 = arith.constant dense<0.000000e+00> : vector<64x128xf32>
    %58 = tpu.matmul %55, %57, %cst_57 {dimension_numbers = #tpu.dot_dimension_numbers<[1], [0], [0], [1], [0, 0, 1, 1], [], []>} : vector<64x128xbf16>, vector<128x128xbf16>, vector<64x128xf32> -> vector<64x128xf32>
    %59 = arith.addf %53, %58 : vector<64x128xf32>
    %c2_58 = arith.constant 2 : index
    %c1_59 = arith.constant 1 : index
    %c0_60 = arith.constant 0 : index
    %60 = vector.load %arg7[%c2_58, %c1_59, %c0_60] : memref<10x10x128xbf16, #tpu.memory_space<vmem>>, vector<8x8x128xbf16>
    %61 = vector.shape_cast %60 : vector<8x8x128xbf16> to vector<64x128xbf16>
    %c7 = arith.constant 7 : index
    %c0_61 = arith.constant 0 : index
    %c0_62 = arith.constant 0 : index
    %62 = vector.load %arg4[%c7, %c0_61, %c0_62] : memref<9x128x128xbf16, #tpu.memory_space<vmem>>, vector<1x128x128xbf16>
    %63 = vector.shape_cast %62 : vector<1x128x128xbf16> to vector<128x128xbf16>
    %cst_63 = arith.constant dense<0.000000e+00> : vector<64x128xf32>
    %64 = tpu.matmul %61, %63, %cst_63 {dimension_numbers = #tpu.dot_dimension_numbers<[1], [0], [0], [1], [0, 0, 1, 1], [], []>} : vector<64x128xbf16>, vector<128x128xbf16>, vector<64x128xf32> -> vector<64x128xf32>
    %65 = arith.addf %59, %64 : vector<64x128xf32>
    %c2_64 = arith.constant 2 : index
    %c2_65 = arith.constant 2 : index
    %c0_66 = arith.constant 0 : index
    %66 = vector.load %arg7[%c2_64, %c2_65, %c0_66] : memref<10x10x128xbf16, #tpu.memory_space<vmem>>, vector<8x8x128xbf16>
    %67 = vector.shape_cast %66 : vector<8x8x128xbf16> to vector<64x128xbf16>
    %c8 = arith.constant 8 : index
    %c0_67 = arith.constant 0 : index
    %c0_68 = arith.constant 0 : index
    %68 = vector.load %arg4[%c8, %c0_67, %c0_68] : memref<9x128x128xbf16, #tpu.memory_space<vmem>>, vector<1x128x128xbf16>
    %69 = vector.shape_cast %68 : vector<1x128x128xbf16> to vector<128x128xbf16>
    %cst_69 = arith.constant dense<0.000000e+00> : vector<64x128xf32>
    %70 = tpu.matmul %67, %69, %cst_69 {dimension_numbers = #tpu.dot_dimension_numbers<[1], [0], [0], [1], [0, 0, 1, 1], [], []>} : vector<64x128xbf16>, vector<128x128xbf16>, vector<64x128xf32> -> vector<64x128xf32>
    %71 = arith.addf %65, %70 : vector<64x128xf32>
    %72 = vector.shape_cast %71 : vector<64x128xf32> to vector<8x8x128xf32>
    %c0_70 = arith.constant 0 : index
    %c0_71 = arith.constant 0 : index
    %c0_72 = arith.constant 0 : index
    %c0_73 = arith.constant 0 : index
    %73 = vector.load %arg5[%c0_70, %c0_71, %c0_72, %c0_73] : memref<1x8x8x128xf32, #tpu.memory_space<vmem>>, vector<1x8x8x128xf32>
    %74 = vector.shape_cast %73 : vector<1x8x8x128xf32> to vector<8x8x128xf32>
    %75 = vector.shape_cast %72 : vector<8x8x128xf32> to vector<1x8x8x128xf32>
    tpu.vector_store %arg5[%c0_70, %c0_71, %c0_72, %c0_73], %75 {strides = array<i32>} : memref<1x8x8x128xf32, #tpu.memory_space<vmem>>, vector<1x8x8x128xf32>,
    %cst_74 = arith.constant dense<0.000000e+00> : vector<128xf32>
    %76 = vector.multi_reduction <add>, %71, %cst_74 [0] : vector<64x128xf32> to vector<128xf32>
    %77 = vector.shape_cast %76 : vector<128xf32> to vector<1x128xf32>
    %c0_75 = arith.constant 0 : index
    %c0_76 = arith.constant 0 : index
    %c0_77 = arith.constant 0 : index
    %78 = vector.load %arg6[%c0_75, %c0_76, %c0_77] : memref<1x2x128xf32, #tpu.memory_space<vmem>>, vector<1x1x128xf32>
    %79 = vector.shape_cast %78 : vector<1x1x128xf32> to vector<1x128xf32>
    %80 = vector.shape_cast %77 : vector<1x128xf32> to vector<1x1x128xf32>
    tpu.vector_store %arg6[%c0_75, %c0_76, %c0_77], %80 {strides = array<i32>} : memref<1x2x128xf32, #tpu.memory_space<vmem>>, vector<1x1x128xf32>,
    %81 = arith.mulf %71, %71 : vector<64x128xf32>
    %cst_78 = arith.constant dense<0.000000e+00> : vector<128xf32>
    %82 = vector.multi_reduction <add>, %81, %cst_78 [0] : vector<64x128xf32> to vector<128xf32>
    %83 = vector.shape_cast %82 : vector<128xf32> to vector<1x128xf32>
    %c0_79 = arith.constant 0 : index
    %c1_80 = arith.constant 1 : index
    %c0_81 = arith.constant 0 : index
    %84 = vector.load %arg6[%c0_79, %c1_80, %c0_81] : memref<1x2x128xf32, #tpu.memory_space<vmem>>, vector<1x1x128xf32>
    %85 = vector.shape_cast %84 : vector<1x1x128xf32> to vector<1x128xf32>
    %86 = vector.shape_cast %83 : vector<1x128xf32> to vector<1x1x128xf32>
    tpu.vector_store %arg6[%c0_79, %c1_80, %c0_81], %86 {strides = array<i32>} : memref<1x2x128xf32, #tpu.memory_space<vmem>>, vector<1x1x128xf32>,
    return
  }
  func.func @transform_0(%arg0: i32) -> (i32, i32, i32, i32) {
    %c0_i32 = arith.constant 0 : i32
    %c0_i32_0 = arith.constant 0 : i32
    %c0_i32_1 = arith.constant 0 : i32
    %c0_i32_2 = arith.constant 0 : i32
    return %arg0, %c0_i32, %c0_i32_0, %c0_i32_1 : i32, i32, i32, i32
  }
  func.func @transform_1(%arg0: i32) -> (i32, i32) {
    %c0_i32 = arith.constant 0 : i32
    %c0_i32_0 = arith.constant 0 : i32
    %c0_i32_1 = arith.constant 0 : i32
    return %c0_i32, %c0_i32_0 : i32, i32
  }
  func.func @transform_2(%arg0: i32) -> (i32, i32) {
    %c0_i32 = arith.constant 0 : i32
    %c0_i32_0 = arith.constant 0 : i32
    %c0_i32_1 = arith.constant 0 : i32
    return %c0_i32, %c0_i32_0 : i32, i32
  }
  func.func @transform_3(%arg0: i32) -> (i32, i32, i32) {
    %c0_i32 = arith.constant 0 : i32
    %c0_i32_0 = arith.constant 0 : i32
    %c0_i32_1 = arith.constant 0 : i32
    %c0_i32_2 = arith.constant 0 : i32
    return %c0_i32, %c0_i32_0, %c0_i32_1 : i32, i32, i32
  }
  func.func @transform_4(%arg0: i32) -> (i32, i32, i32, i32) {
    %c0_i32 = arith.constant 0 : i32
    %c0_i32_0 = arith.constant 0 : i32
    %c0_i32_1 = arith.constant 0 : i32
    %c0_i32_2 = arith.constant 0 : i32
    return %arg0, %c0_i32, %c0_i32_0, %c0_i32_1 : i32, i32, i32, i32
  }
  func.func @transform_5(%arg0: i32) -> (i32, i32, i32) {
    %c0_i32 = arith.constant 0 : i32
    %c0_i32_0 = arith.constant 0 : i32
    %c0_i32_1 = arith.constant 0 : i32
    return %arg0, %c0_i32, %c0_i32_0 : i32, i32, i32
  }
}

</mosaic_0001>

<bundles_post_ra>
// kernel: _lambda_.5
= control target key start
LH: loop header
LB: loop body
LE: loop exit
PB: predicated region body
PF: predicated region fallthrough
CT: control target
= control target key end

     0   :  { %s676_s18 = smov 0   ;;  %s740_s0 = inlined_call_operand.vmem [shape: f32[2,8,8,128], index: 0, kind: input, shape index: {}]   ;;  %s741_s1 = inlined_call_operand.vmem [shape: bf16[2,8,8,128], index: 1, kind: input, shape index: {}]   ;;  %s742_s2 = inlined_call_operand.vmem [shape: bf16[128,128], index: 2, kind: input, shape index: {}]   ;;  %s743_s3 = inlined_call_operand.vmem [shape: f32[1,128], index: 3, kind: input, shape index: {}]   ;;  %s744_s4 = inlined_call_operand.vmem [shape: f32[1,128], index: 4, kind: input, shape index: {}]   ;;  %s745_s5 = inlined_call_operand.vmem [shape: f32[2,8,8,128], index: 5, kind: output, shape index: {}]  }
   0x1 LB: > { %s536_s19 = sadd.s32 4294967295, %s644_s18   ;;  %p540_p0 = scmp.ge.s32.totalorder %s644_s18, 1  ;;  %s644_s18 = sphi %s676_s18, %s15_s18  }
   0x2   : > { %p197_p1 = scmp.lt.s32.totalorder %s644_s18, 3 }
   0x4   : > { %p198_p2 = pnand %p540_p0, %p197_p1 }
   0x5   : > { %v626_v0 = vld [vmem:[%s742_s2] sm:$0xff] (!%p198_p2)   ;;  %p230_p3 = scmp.lt.s32.totalorder (!%p198_p2), %s536_s19, 1  ;;  %v627_v1 = vld [vmem:[%s742_s2 + $0x8] sm:$0xff] (!%p198_p2)   ;;  %v628_v2 = vld [vmem:[%s742_s2 + $0x10] sm:$0xff] (!%p198_p2)  }
   0x6   : > { %201 = sbr.rel (%p198_p2) target bundleno = 258 (0x102), region = 40  ;;  %578 = vmatprep.subr.bf16.mxu0 (!%p198_p2), %v626_v0  ;;  %602 = vmatprep.subr.bf16.mxu1 (!%p198_p2), %v626_v0  ;;  %v629_v3 = vld [vmem:[%s742_s2 + $0x18] sm:$0xff] (!%p198_p2)   ;;  %v630_v6 = vld [vmem:[%s742_s2 + $0x20] sm:$0xff] (!%p198_p2)   ;;  %v631_v7 = vld [vmem:[%s742_s2 + $0x28] sm:$0xff] (!%p198_p2)  }
   0x7   : > { %579 = vmatpush3.bf16.msra.mxu0 (!%p198_p2), %v626_v0  ;;  %610 = vmatpush3.bf16.msra.mxu1 (!%p198_p2), %v626_v0  ;;  %v632_v8 = vld [vmem:[%s742_s2 + $0x30] sm:$0xff] (!%p198_p2)   ;;  %v633_v9 = vld [vmem:[%s742_s2 + $0x38] sm:$0xff] (!%p198_p2)   ;;  %v559_v12 = vld [vmem:[%s743_s3] ss:$0 sm:$0xff] (!%p198_p2) }
   0x8   : > { %580 = vmatprep.subr.bf16.mxu0 (!%p198_p2), %v627_v1  ;;  %603 = vmatprep.subr.bf16.mxu1 (!%p198_p2), %v627_v1  ;;  %v560_v23 = vld [vmem:[%s744_s4] ss:$0 sm:$0xff] (!%p198_p2) }
   0xb   : > { %581 = vmatpush3.bf16.msra.mxu0 (!%p198_p2), %v627_v1  ;;  %611 = vmatpush3.bf16.msra.mxu1 (!%p198_p2), %v627_v1 }
   0xc   : > { %582 = vmatprep.subr.bf16.mxu0 (!%p198_p2), %v628_v2  ;;  %604 = vmatprep.subr.bf16.mxu1 (!%p198_p2), %v628_v2 }
   0xd   : > { %s747_s19 = smov (!%p230_p3, %s536_s19), 1 }
   0xe   : > { %s564_s26 = sshll.u32 %s747_s19, 5  ;;  %s563_s15 = sshll.u32 %s747_s19, 6 }
   0xf   : > { %s699_s29 = scalar_lea.vmem %s741_s1, %s564_s26  ;;  %583 = vmatpush3.bf16.msra.mxu0 %v628_v2  ;;  %612 = vmatpush3.bf16.msra.mxu1 %v628_v2  ;;  %s234_s20 = scalar_lea.vmem %s740_s0, %s563_s15 }
  0x10   : > { %v634_v4 = vld [vmem:[%s699_s29] sm:$0xff]   ;;  %v635_v5 = vld [vmem:[%s699_s29 + $0x10] sm:$0xff]   ;;  %584 = vmatprep.subr.bf16.mxu0 %v629_v3  ;;  %605 = vmatprep.subr.bf16.mxu1 %v629_v3  ;;  %v636_v10 = vld [vmem:[%s699_s29 + $0x8] sm:$0xff]   ;;  %s244_s27 = scalar_lea.vmem %s745_s5, %s563_s15 }
  0x11   : > { %594 = vmatprep.mubr.bf16.mxu0 %v634_v4  ;;  %598 = vmatprep.mubr.bf16.mxu1 %v635_v5  ;;  %v637_v11 = vld [vmem:[%s699_s29 + $0x18] sm:$0xff]   ;;  %v411_v13 = vld [vmem:[%s234_s20 + $0x10] sm:$0xff]  ;;  %v409_v15 = vld [vmem:[%s234_s20] sm:$0xff] }
  0x12   : > { %v415_v14 = vld [vmem:[%s234_s20 + $0x30] sm:$0xff]  ;;  %v413_v16 = vld [vmem:[%s234_s20 + $0x20] sm:$0xff]  ;;  %v412_v17 = vld [vmem:[%s234_s20 + $0x18] sm:$0xff]  ;;  %v425_v19 = vmul.f32 %v559_v12, %v411_v13  ;;  %v423_v24 = vmul.f32 %v559_v12, %v409_v15 }
  0x13   : > { %585 = vmatpush3.bf16.msra.mxu0 %v629_v3  ;;  %613 = vmatpush3.bf16.msra.mxu1 %v629_v3  ;;  %v416_v18 = vld [vmem:[%s234_s20 + $0x38] sm:$0xff]  ;;  %v429_v20 = vmul.f32 %v559_v12, %v415_v14  ;;  %v410_v21 = vld [vmem:[%s234_s20 + $0x8] sm:$0xff]  ;;  %v427_v25 = vmul.f32 %v559_v12, %v413_v16  ;;  %v426_v26 = vmul.f32 %v559_v12, %v412_v17 }
  0x14   : > { %586 = vmatprep.subr.bf16.mxu0 %v630_v6  ;;  %606 = vmatprep.subr.bf16.mxu1 %v630_v6  ;;  %v414_v22 = vld [vmem:[%s234_s20 + $0x28] sm:$0xff]  ;;  %v430_v27 = vmul.f32 %v559_v12, %v416_v18  ;;  %v424_v28 = vmul.f32 %v559_v12, %v410_v21  ;;  %v439_v30 = vadd.f32 %v560_v23, %v425_v19 }
  0x15   : > { %v428_v29 = vmul.f32 %v559_v12, %v414_v22  ;;  %v443_v31 = vadd.f32 %v560_v23, %v429_v20  ;;  %v437_v32 = vadd.f32 %v560_v23, %v423_v24  ;;  %v441_v33 = vadd.f32 %v560_v23, %v427_v25 }
  0x16   : > { %v440_v34 = vadd.f32 %v560_v23, %v426_v26  ;;  %v444_v35 = vadd.f32 %v560_v23, %v430_v27  ;;  %v438_v38 = vadd.f32 %v560_v23, %v424_v28 }
  0x17   : > { %587 = vmatpush3.bf16.msra.mxu0 %v630_v6  ;;  %614 = vmatpush3.bf16.msra.mxu1 %v630_v6  ;;  %v442_v39 = vadd.f32 %v560_v23, %v428_v29 }
  0x18   : > { %588 = vmatprep.subr.bf16.mxu0 %v631_v7  ;;  %607 = vmatprep.subr.bf16.mxu1 %v631_v7 }
  0x1b   : > { %589 = vmatpush3.bf16.msra.mxu0 %v631_v7  ;;  %615 = vmatpush3.bf16.msra.mxu1 %v631_v7 }
  0x1c   : > { %590 = vmatprep.subr.bf16.mxu0 %v632_v8  ;;  %608 = vmatprep.subr.bf16.mxu1 %v632_v8 }
  0x1f   : > { %591 = vmatpush3.bf16.msra.mxu0 %v632_v8  ;;  %616 = vmatpush3.bf16.msra.mxu1 %v632_v8 }
  0x20   : > { %592 = vmatprep.subr.bf16.mxu0 %v633_v9  ;;  %609 = vmatprep.subr.bf16.mxu1 %v633_v9 }
  0x23   : > { %593 = vmatpush3.bf16.msra.mxu0 %v633_v9  ;;  %617 = vmatpush3.bf16.msra.mxu1 %v633_v9 }
  0x26   : > { %595 = vmatmul.mubr.bf16.vlgmr.msra.gmra.mrb[0].mxu0 %v636_v10  ;;  %599 = vmatmul.mubr.bf16.vlgmr.msra.gmra.mrb[0].mxu1 %v637_v11 }
  0xf9   : > { %v596_v36 = vpop.f32.mrb[0].mxu0  ;;  %v600_v37 = vpop.f32.mrb[0].mxu1 }
  0xfa   : > { %v447_v40 = vadd.f32 %v596_v36, %v439_v30  ;;  %v451_v41 = vadd.f32 %v600_v37, %v443_v31  ;;  %v376_v42 = vpop.f32.mrb[1].mxu0  ;;  %v392_v43 = vpop.f32.mrb[1].mxu1 }
  0xfb   : > { %v445_v44 = vadd.f32 %v437_v32, %v376_v42  ;;  %v449_v45 = vadd.f32 %v441_v33, %v392_v43  ;;  %v597_v46 = vpop.f32.mrb[2].mxu0  ;;  %v601_v47 = vpop.f32.mrb[2].mxu1 }
  0xfc   : > { %v455_v48 = vmax.f32 %v447_v40, 0.0  ;;  %v459_v49 = vmax.f32 %v451_v41, 0.0  ;;  %v448_v50 = vadd.f32 %v597_v46, %v440_v34  ;;  %v452_v51 = vadd.f32 %v601_v47, %v444_v35  ;;  %v379_v52 = vpop.f32.mrb[3].mxu0  ;;  %v395_v53 = vpop.f32.mrb[3].mxu1 }
  0xfd   : > { %v453_v54 = vmax.f32 %v445_v44, 0.0  ;;  %v457_v55 = vmax.f32 %v449_v45, 0.0  ;;  %v446_v56 = vadd.f32 %v438_v38, %v379_v52  ;;  %v450_v57 = vadd.f32 %v442_v39, %v395_v53 }
  0xfe   : > { %463 = vst [vmem:[%s244_s27 + $0x10] sm:$0xff] %v455_v48  ;;  %467 = vst [vmem:[%s244_s27 + $0x30] sm:$0xff] %v459_v49  ;;  %v456_v58 = vmax.f32 %v448_v50, 0.0  ;;  %v460_v59 = vmax.f32 %v452_v51, 0.0 }
  0xff   : > { %461 = vst [vmem:[%s244_s27] sm:$0xff] %v453_v54  ;;  %465 = vst [vmem:[%s244_s27 + $0x20] sm:$0xff] %v457_v55  ;;  %v454_v60 = vmax.f32 %v446_v56, 0.0  ;;  %v458_v61 = vmax.f32 %v450_v57, 0.0 }
 0x100   : > { %464 = vst [vmem:[%s244_s27 + $0x18] sm:$0xff] %v456_v58  ;;  %468 = vst [vmem:[%s244_s27 + $0x38] sm:$0xff] %v460_v59 }
 0x101   : > { %462 = vst [vmem:[%s244_s27 + $0x8] sm:$0xff] %v454_v60  ;;  %466 = vst [vmem:[%s244_s27 + $0x28] sm:$0xff] %v458_v61 }
 0x102 PF: > { %s15_s18 = sadd.s32 1, %s644_s18  }
 0x103   : > { %p12_p4 = scmp.ge.s32.totalorder %s15_s18, 4  }
 0x105   :  { %14 = sbr.rel (!%p12_p4) target bundleno = 1 (0x1), region = 73 }

// kernel: _lambda_.3
= control target key start
LH: loop header
LB: loop body
LE: loop exit
PB: predicated region body
PF: predicated region fallthrough
CT: control target
= control target key end

     0   :  { %s3058_s12 = smov 0   ;;  %s3427_s0 = inlined_call_operand.vmem [shape: bf16[2,36,9,128], index: 0, kind: input, shape index: {}]   ;;  %s3428_s1 = inlined_call_operand.vmem [shape: bf16[9,128,128], index: 1, kind: input, shape index: {}]   ;;  %s3429_s2 = inlined_call_operand.vmem [shape: bf16[2,8,8,128], index: 2, kind: output, shape index: {0}]   ;;  %s3430_s3 = inlined_call_operand.vmem [shape: f32[2,2,128], index: 3, kind: output, shape index: {1}]  }
   0x1 LB: > { %s2178_s13 = sadd.s32 4294967295, %s3036_s12   ;;  %p2182_p0 = scmp.ge.s32.totalorder %s3036_s12, 1  ;;  %s3036_s12 = sphi %s3058_s12, %s14_s12  }
   0x2   : > { %p140_p1 = scmp.lt.s32.totalorder %s3036_s12, 3 }
   0x4   : > { %p141_p2 = pnand %p2182_p0, %p140_p1 }
   0x5   : > { %v2934_v0 = vld [vmem:[%s3428_s1 + $0x40] sm:$0xff] (!%p141_p2)   ;;  %p168_p3 = scmp.lt.s32.totalorder (!%p141_p2), %s2178_s13, 1  ;;  %v2936_v2 = vld [vmem:[%s3428_s1 + $0x48] sm:$0xff] (!%p141_p2)   ;;  %v2938_v4 = vld [vmem:[%s3428_s1 + $0x50] sm:$0xff] (!%p141_p2)   ;;  %vm523_vm0 = vsmask.f32 (!%p141_p2), 3328 }
   0x6   : > { %144 = sbr.rel (%p141_p2) target bundleno = 413 (0x19d), region = 28  ;;  %v2935_v1 = vld [vmem:[%s3428_s1 + $0x100] sm:$0xff] (!%p141_p2)   ;;  %2629 = vmatprep.subr.bf16.mxu1 (!%p141_p2), %v2934_v0  ;;  %v2937_v3 = vld [vmem:[%s3428_s1 + $0x108] sm:$0xff] (!%p141_p2)   ;;  %v2939_v5 = vld [vmem:[%s3428_s1 + $0x110] sm:$0xff] (!%p141_p2)   ;;  %vm524_vm1 = vsmask.f32 (!%p141_p2), 7440 }
   0x7   : > { %2725 = vmatprep.subr.bf16.mxu0 (!%p141_p2), %v2935_v1  ;;  %2630 = vmatpush3.bf16.msra.mxu1 (!%p141_p2), %v2934_v0  ;;  %v2940_v6 = vld [vmem:[%s3428_s1 + $0x58] sm:$0xff] (!%p141_p2)   ;;  %v2942_v8 = vld [vmem:[%s3428_s1 + $0x60] sm:$0xff] (!%p141_p2)   ;;  %v2944_v10 = vld [vmem:[%s3428_s1 + $0x68] sm:$0xff] (!%p141_p2)  }
   0x8   : > { %2726 = vmatpush3.bf16.msra.mxu0 (!%p141_p2), %v2935_v1  ;;  %2631 = vmatprep.subr.bf16.mxu1 (!%p141_p2), %v2936_v2  ;;  %v2941_v7 = vld [vmem:[%s3428_s1 + $0x118] sm:$0xff] (!%p141_p2)   ;;  %v2943_v9 = vld [vmem:[%s3428_s1 + $0x120] sm:$0xff] (!%p141_p2)   ;;  %v2945_v12 = vld [vmem:[%s3428_s1 + $0x128] sm:$0xff] (!%p141_p2)  }
   0x9   : > { %2727 = vmatprep.subr.bf16.mxu0 (!%p141_p2), %v2937_v3  ;;  %v2946_v14 = vld [vmem:[%s3428_s1 + $0x70] sm:$0xff] (!%p141_p2)   ;;  %v2948_v16 = vld [vmem:[%s3428_s1 + $0x78] sm:$0xff] (!%p141_p2)   ;;  %v2951_v18 = vld [vmem:[%s3428_s1] sm:$0xff] (!%p141_p2)  }
   0xa   : > { %v2947_v15 = vld [vmem:[%s3428_s1 + $0x130] sm:$0xff] (!%p141_p2)   ;;  %v2949_v17 = vld [vmem:[%s3428_s1 + $0x138] sm:$0xff] (!%p141_p2)   ;;  %v2953_v19 = vld [vmem:[%s3428_s1 + $0x140] sm:$0xff] (!%p141_p2)  }
   0xb   : > { %2632 = vmatpush3.bf16.msra.mxu1 (!%p141_p2), %v2936_v2  ;;  %v2956_v22 = vld [vmem:[%s3428_s1 + $0x8] sm:$0xff] (!%p141_p2)   ;;  %v2958_v26 = vld [vmem:[%s3428_s1 + $0x10] sm:$0xff] (!%p141_p2)   ;;  %v2960_v28 = vld [vmem:[%s3428_s1 + $0x18] sm:$0xff] (!%p141_p2)  }
   0xc   : > { %2728 = vmatpush3.bf16.msra.mxu0 (!%p141_p2), %v2937_v3  ;;  %2633 = vmatprep.subr.bf16.mxu1 (!%p141_p2), %v2938_v4  ;;  %v2957_v23 = vld [vmem:[%s3428_s1 + $0x148] sm:$0xff] (!%p141_p2)   ;;  %v2959_v27 = vld [vmem:[%s3428_s1 + $0x150] sm:$0xff] (!%p141_p2)   ;;  %v2961_v31 = vld [vmem:[%s3428_s1 + $0x158] sm:$0xff] (!%p141_p2)  }
   0xd   : > { %s3434_s13 = smov (!%p168_p3, %s2178_s13), 1  ;;  %2729 = vmatprep.subr.bf16.mxu0 %v2939_v5  ;;  %v2962_v38 = vld [vmem:[%s3428_s1 + $0x20] sm:$0xff]   ;;  %v2964_v47 = vld [vmem:[%s3428_s1 + $0x28] sm:$0xff]   ;;  %vm3173_vm2 = vmor %vm523_vm0, %vm524_vm1 }
   0xe   : > { %s2925_s30 = smul.u32 288, %s3434_s13  ;;  %v2963_v43 = vld [vmem:[%s3428_s1 + $0x160] sm:$0xff]   ;;  %v2965_v50 = vld [vmem:[%s3428_s1 + $0x168] sm:$0xff]   ;;  %v2967_v2 = vld [vmem:[%s3428_s1 + $0x30] sm:$0xff]   ;;  %s2497_s16 = sshll.u32 %s3434_s13, 5 }
   0xf   : > { %2634 = vmatpush3.bf16.msra.mxu1 %v2938_v4  ;;  %s177_s19 = scalar_lea.vmem %s3429_s2, %s2497_s16  ;;  %s2186_s20 = sshll.u32 %s3434_s13, 1 }
  0x10   : > { %2730 = vmatpush3.bf16.msra.mxu0 %v2939_v5  ;;  %2635 = vmatprep.subr.bf16.mxu1 %v2940_v6  ;;  %s3102_s10 = scalar_lea.vmem %s3427_s0, %s2925_s30  ;;  %s181_s23 = scalar_lea.vmem %s3430_s3, %s2186_s20 }
  0x11   : > { %2731 = vmatprep.subr.bf16.mxu0 %v2941_v7  ;;  %v2950_v11 = vld [vmem:[%s3102_s10 + $0x48] ss:$8 sps:$4 sm:$0xff]   ;;  %v2952_v13 = vld [vmem:[%s3102_s10 + $0xd8] ss:$8 sps:$4 sm:$0xff]   ;;  %v2336_v34 = vld [vmem:[%s3102_s10 + $0x94] sm:$0x1] }
  0x12   : > { %2645 = vmatprep.mubr.bf16.mxu1 %v2950_v11  ;;  %2741 = vmatprep.mubr.bf16.mxu0 %v2952_v13  ;;  %v2954_v20 = vld [vmem:[%s3102_s10 + $0x58] ss:$8 sps:$4 sm:$0xff]   ;;  %v2955_v21 = vld [vmem:[%s3102_s10 + $0xe8] ss:$8 sps:$4 sm:$0xff]   ;;  %v2338_v39 = vld [vmem:[%s3102_s10 + $0x9c] sm:$0x1] }
  0x13   : > { %2636 = vmatpush3.bf16.msra.mxu1 %v2940_v6  ;;  %v2966_v24 = vld [vmem:[%s3102_s10 + $0x68] ss:$8 sps:$4 sm:$0xff]   ;;  %v2968_v25 = vld [vmem:[%s3102_s10 + $0xf8] ss:$8 sps:$4 sm:$0xff]   ;;  %v1160_v40 = vshll.u32 %v2336_v34, 16  ;;  %v1174_v46 = vshll.u32 %v2338_v39, 16 }
  0x14   : > { %2732 = vmatpush3.bf16.msra.mxu0 %v2941_v7  ;;  %2637 = vmatprep.subr.bf16.mxu1 %v2942_v8  ;;  %v2970_v29 = vld [vmem:[%s3102_s10 + $0x78] ss:$8 sps:$4 sm:$0xff]   ;;  %v2971_v30 = vld [vmem:[%s3102_s10 + $0x108] ss:$8 sps:$4 sm:$0xff]   ;;  %v2340_v57 = vld [vmem:[%s3102_s10 + $0xa4] sm:$0x1] }
  0x15   : > { %2733 = vmatprep.subr.bf16.mxu0 %v2943_v9  ;;  %v2974_v32 = vld [vmem:[%s3102_s10] ss:$8 sps:$4 sm:$0xff]   ;;  %v2335_v33 = vld [vmem:[%s3102_s10 + $0x90] sm:$0xf]  ;;  %v2337_v35 = vld [vmem:[%s3102_s10 + $0x98] sm:$0xf] }
  0x16   : > { %v1151_v36 = vshrl.u32 %v2335_v33, 16  ;;  %v1154_v37 = vshll.u32 %v2335_v33, 16  ;;  %v1165_v41 = vshrl.u32 %v2337_v35, 16  ;;  %v1168_v42 = vshll.u32 %v2337_v35, 16  ;;  %v2339_v56 = vld [vmem:[%s3102_s10 + $0xa0] sm:$0xf] }
  0x17   : > { %2638 = vmatpush3.bf16.msra.mxu1 %v2942_v8  ;;  %v1162_v52 = vrot.slane %v1160_v40, 5  ;;  %v1176_v55 = vrot.slane %v1174_v46, 5  ;;  %v2341_v59 = vld [vmem:[%s3102_s10 + $0xa8] sm:$0xf]  ;;  %v2342_v60 = vld [vmem:[%s3102_s10 + $0xac] sm:$0x1] }
  0x18   : > { %2734 = vmatpush3.bf16.msra.mxu0 %v2943_v9  ;;  %2639 = vmatprep.subr.bf16.mxu1 %v2944_v10  ;;  %v1153_v44 = vrot.slane %v1151_v36, 4  ;;  %v1156_v45 = vrot.slane %v1154_v37, 5  ;;  %v1167_v48 = vrot.slane %v1165_v41, 4  ;;  %v1170_v49 = vrot.slane %v1168_v42, 5  ;;  %v2969_v6 = vld [vmem:[%s3428_s1 + $0x170] sm:$0xff]  }
  0x19   : > { %2735 = vmatprep.subr.bf16.mxu0 %v2945_v12  ;;  %v1179_v61 = vshrl.u32 %v2339_v56, 16  ;;  %v1182_v63 = vshll.u32 %v2339_v56, 16  ;;  %v1188_v0 = vshll.u32 %v2340_v57, 16  ;;  %v1193_v1 = vshrl.u32 %v2341_v59, 16  ;;  %v2988_v37 = vld [vmem:[%s3102_s10 + $0x20] ss:$8 sps:$4 sm:$0xff]  }
  0x1a   : > { %v1157_v51 = vor.u32 %v1156_v45, %v1153_v44  ;;  %v1171_v54 = vor.u32 %v1170_v49, %v1167_v48  ;;  %v1196_v5 = vshll.u32 %v2341_v59, 16  ;;  %v2991_v48 = vld [vmem:[%s3102_s10 + $0x30] ss:$8 sps:$4 sm:$0xff]   ;;  %v2347_v49 = vld [vmem:[%s3102_s10 + $0xc0] sm:$0xf] }
  0x1b   : > { %2640 = vmatpush3.bf16.msra.mxu1 %v2944_v10  ;;  %v1181_v4 = vrot.slane %v1179_v61, 4  ;;  %v1184_v8 = vrot.slane %v1182_v63, 5  ;;  %v1195_v9 = vrot.slane %v1193_v1, 4  ;;  %v1202_v10 = vshll.u32 %v2342_v60, 16  ;;  %v2982_v59 = vld [vmem:[%s3428_s1 + $0x98] sm:$0xff]  }
  0x1c   : > { %2736 = vmatpush3.bf16.msra.mxu0 %v2945_v12  ;;  %2641 = vmatprep.subr.bf16.mxu1 %v2946_v14  ;;  %v1158_v58 = vrot.slane %v1157_v51, 4  ;;  %v1172_v62 = vrot.slane %v1171_v54, 4  ;;  %v1190_v12 = vrot.slane %v1188_v0, 5  ;;  %v1198_v13 = vrot.slane %v1196_v5, 5  ;;  %v2349_v51 = vld [vmem:[%s3102_s10 + $0xc8] sm:$0xf] }
  0x1d   : > { %2737 = vmatprep.subr.bf16.mxu0 %v2947_v15  ;;  %v1235_v56 = vshrl.u32 %v2347_v49, 16  ;;  %v1238_v57 = vshll.u32 %v2347_v49, 16  ;;  %v1249_v61 = vshrl.u32 %v2349_v51, 16 }
  0x1e   : > { %v1163_v3 = vsel %vm3173_vm2, %v1158_v58, %v1162_v52  ;;  %v1177_v7 = vsel %vm3173_vm2, %v1172_v62, %v1176_v55  ;;  %v2981_v52 = vld [vmem:[%s3428_s1 + $0x190] sm:$0xff]   ;;  %v2350_v55 = vld [vmem:[%s3102_s10 + $0xcc] sm:$0x1]  ;;  %v1252_v62 = vshll.u32 %v2349_v51, 16 }
  0x1f   : > { %2642 = vmatpush3.bf16.msra.mxu1 %v2946_v14  ;;  %v2367_v11 = vcombine.low %v1163_v3, %v1177_v7  ;;  %v2972_v14 = vld [vmem:[%s3428_s1 + $0x38] sm:$0xff]   ;;  %v1258_v63 = vshll.u32 %v2350_v55, 16  ;;  %v1237_v1 = vrot.slane %v1235_v56, 4 }
  0x20   : > { %2738 = vmatpush3.bf16.msra.mxu0 %v2947_v15  ;;  %2643 = vmatprep.subr.bf16.mxu1 %v2948_v16  ;;  %v1185_v15 = vor.u32 %v1184_v8, %v1181_v4  ;;  %v2983_v4 = vld [vmem:[%s3428_s1 + $0x198] sm:$0xff]   ;;  %v1254_v7 = vrot.slane %v1252_v62, 5 }
  0x21   : > { %2739 = vmatprep.subr.bf16.mxu0 %v2949_v17  ;;  %v1260_v8 = vrot.slane %v1258_v63, 5 }
  0x23   : > { %2644 = vmatpush3.bf16.msra.mxu1 %v2948_v16  ;;  %v1199_v16 = vor.u32 %v1198_v13, %v1195_v9  ;;  %v2984_v13 = vld [vmem:[%s3428_s1 + $0xa0] sm:$0xff]  }
  0x24   : > { %2740 = vmatpush3.bf16.msra.mxu0 %v2949_v17  ;;  %2653 = vmatprep.subr.bf16.mxu1 %v2951_v18  ;;  %v1186_v17 = vrot.slane %v1185_v15, 4 }
  0x25   : > { %2749 = vmatprep.subr.bf16.mxu0 %v2953_v19 }
  0x26   : > { %2646 = vmatmul.mubr.bf16.vlgmr.msra.gmra.mrb[0].mxu1 %v2954_v20  ;;  %v1200_v20 = vrot.slane %v1199_v16, 4  ;;  %v509_v16 = vld [vmem:[%s3102_s10 + $0x8] sm:$0xf] }
  0x27   : > { %2654 = vmatpush3.bf16.msra.mxu1 %v2951_v18  ;;  %2742 = vmatmul.mubr.bf16.vlgmr.msra.gmra.mrb[0].mxu0 %v2955_v21  ;;  %v1204_v18 = vrot.slane %v1202_v10, 5  ;;  %v2975_v21 = vld [vmem:[%s3428_s1 + $0x80] sm:$0xff]  }
  0x28   : > { %2750 = vmatpush3.bf16.msra.mxu0 %v2953_v19  ;;  %2655 = vmatprep.subr.bf16.mxu1 %v2956_v22  ;;  %v2973_v19 = vld [vmem:[%s3428_s1 + $0x178] sm:$0xff]  }
  0x29   : > { %2751 = vmatprep.subr.bf16.mxu0 %v2957_v23  ;;  %2649 = vmatprep.mubr.bf16.mxu1 %v2966_v24  ;;  %v2976_v24 = vld [vmem:[%s3428_s1 + $0x180] sm:$0xff]  }
  0x2a   : > { %2745 = vmatprep.mubr.bf16.mxu0 %v2968_v25  ;;  %v2977_v25 = vld [vmem:[%s3102_s10 + $0x10] ss:$8 sps:$4 sm:$0xff]  }
  0x2b   : > { %2656 = vmatpush3.bf16.msra.mxu1 %v2956_v22  ;;  %v1191_v22 = vsel %vm3173_vm2, %v1186_v17, %v1190_v12  ;;  %v508_v12 = vld [vmem:[%s3102_s10 + $0x4] sm:$0x1]  ;;  %v510_v17 = vld [vmem:[%s3102_s10 + $0xc] sm:$0x1] }
  0x2c   : > { %2752 = vmatpush3.bf16.msra.mxu0 %v2957_v23  ;;  %2657 = vmatprep.subr.bf16.mxu1 %v2958_v26  ;;  %v1205_v23 = vsel %vm3173_vm2, %v1200_v20, %v1204_v18 }
  0x2d   : > { %2753 = vmatprep.subr.bf16.mxu0 %v2959_v27 }
  0x2e   : > { %2650 = vmatmul.mubr.bf16.gmra.mrb[4].mxu1 %v2970_v29  ;;  %v2979_v29 = vld [vmem:[%s3428_s1 + $0x188] sm:$0xff]  }
  0x2f   : > { %2658 = vmatpush3.bf16.msra.mxu1 %v2958_v26  ;;  %2746 = vmatmul.mubr.bf16.gmra.mrb[4].mxu0 %v2971_v30  ;;  %v2978_v26 = vld [vmem:[%s3428_s1 + $0x88] sm:$0xff]   ;;  %v2344_v30 = vld [vmem:[%s3102_s10 + $0xb4] sm:$0x1] }
  0x30   : > { %2754 = vmatpush3.bf16.msra.mxu0 %v2959_v27  ;;  %2659 = vmatprep.subr.bf16.mxu1 %v2960_v28  ;;  %v2343_v27 = vld [vmem:[%s3102_s10 + $0xb0] sm:$0xf]  ;;  %v1216_v35 = vshll.u32 %v2344_v30, 16 }
  0x31   : > { %2755 = vmatprep.subr.bf16.mxu0 %v2961_v31  ;;  %2669 = vmatprep.mubr.bf16.mxu1 %v2974_v32  ;;  %v2346_v32 = vld [vmem:[%s3102_s10 + $0xbc] sm:$0x1]  ;;  %v1207_v33 = vshrl.u32 %v2343_v27, 16  ;;  %v1210_v34 = vshll.u32 %v2343_v27, 16  ;;  %v550_v27 = vshll.u32 %v510_v17, 16 }
  0x32   : > { %2765 = vmatprep.mubr.bf16.mxu0 %v2367_v11  ;;  %v1230_v39 = vshll.u32 %v2346_v32, 16  ;;  %v1218_v44 = vrot.slane %v1216_v35, 5  ;;  %v507_v11 = vld [vmem:[%s3102_s10] sm:$0xf]  ;;  %v2986_v32 = vld [vmem:[%s3428_s1 + $0xa8] sm:$0xff]  }
  0x33   : > { %2660 = vmatpush3.bf16.msra.mxu1 %v2960_v28  ;;  %v2368_v28 = vcombine.low %v1191_v22, %v1205_v23  ;;  %v1209_v40 = vrot.slane %v1207_v33, 4  ;;  %v1212_v41 = vrot.slane %v1210_v34, 5  ;;  %v527_v18 = vshrl.u32 %v507_v11, 16  ;;  %v518_v17 = vld [vmem:[%s3102_s10 + $0x2c] sm:$0x1] }
  0x34   : > { %2756 = vmatpush3.bf16.msra.mxu0 %v2961_v31  ;;  %2661 = vmatprep.subr.bf16.mxu1 %v2962_v38  ;;  %v2345_v31 = vld [vmem:[%s3102_s10 + $0xb8] sm:$0xf]  ;;  %v1232_v46 = vrot.slane %v1230_v39, 5  ;;  %v541_v22 = vshrl.u32 %v509_v16, 16  ;;  %v544_v23 = vshll.u32 %v509_v16, 16 }
  0x35   : > { %2757 = vmatprep.subr.bf16.mxu0 %v2963_v43  ;;  %v1221_v36 = vshrl.u32 %v2345_v31, 16  ;;  %v517_v16 = vld [vmem:[%s3102_s10 + $0x28] sm:$0xf] }
  0x36   : > { %v543_v30 = vrot.slane %v541_v22, 4  ;;  %v597_v22 = vshrl.u32 %v517_v16, 16 }
  0x37   : > { %2662 = vmatpush3.bf16.msra.mxu1 %v2962_v38  ;;  %v1224_v38 = vshll.u32 %v2345_v31, 16  ;;  %v1223_v42 = vrot.slane %v1221_v36, 4  ;;  %v546_v31 = vrot.slane %v544_v23, 5  ;;  %v552_v36 = vrot.slane %v550_v27, 5 }
  0x38   : > { %2758 = vmatpush3.bf16.msra.mxu0 %v2963_v43  ;;  %2663 = vmatprep.subr.bf16.mxu1 %v2964_v47  ;;  %v2980_v43 = vld [vmem:[%s3428_s1 + $0x90] sm:$0xff]   ;;  %v600_v23 = vshll.u32 %v517_v16, 16  ;;  %v2452_v16 = vld [vmem:[%s3102_s10 + $0xc] sm:$0x1] }
  0x39   : > { %2759 = vmatprep.subr.bf16.mxu0 %v2965_v50  ;;  %v1226_v45 = vrot.slane %v1224_v38, 5  ;;  %v2987_v38 = vld [vmem:[%s3428_s1 + $0x1a8] sm:$0xff]  }
  0x3b   : > { %2664 = vmatpush3.bf16.msra.mxu1 %v2964_v47  ;;  %v1213_v47 = vor.u32 %v1212_v41, %v1209_v40  ;;  %v1227_v54 = vor.u32 %v1226_v45, %v1223_v42  ;;  %v547_v40 = vor.u32 %v546_v31, %v543_v30  ;;  %v511_v41 = vld [vmem:[%s3102_s10 + $0x10] sm:$0xf]  ;;  %v602_v31 = vrot.slane %v600_v23, 5 }
  0x3c   : > { %2760 = vmatpush3.bf16.msra.mxu0 %v2965_v50  ;;  %2665 = vmatprep.subr.bf16.mxu1 %v2967_v2  ;;  %v2348_v50 = vld [vmem:[%s3102_s10 + $0xc4] sm:$0x1]  ;;  %v555_v45 = vshrl.u32 %v511_v41, 16  ;;  %v519_v30 = vld [vmem:[%s3102_s10 + $0x30] sm:$0xf] }
  0x3d   : > { %2761 = vmatprep.subr.bf16.mxu0 %v2969_v6  ;;  %v1244_v58 = vshll.u32 %v2348_v50, 16  ;;  %v1214_v60 = vrot.slane %v1213_v47, 4  ;;  %v1228_v0 = vrot.slane %v1227_v54, 4  ;;  %v514_v47 = vld [vmem:[%s3102_s10 + $0x1c] sm:$0x1] }
  0x3f   : > { %2666 = vmatpush3.bf16.msra.mxu1 %v2967_v2  ;;  %v1240_v2 = vrot.slane %v1238_v57, 5  ;;  %v1246_v3 = vrot.slane %v1244_v58, 5  ;;  %v1219_v5 = vsel %vm3173_vm2, %v1214_v60, %v1218_v44  ;;  %v1233_v9 = vsel %vm3173_vm2, %v1228_v0, %v1232_v46  ;;  %v513_v44 = vld [vmem:[%s3102_s10 + $0x18] sm:$0xf]  ;;  %v2990_v60 = vld [vmem:[%s3428_s1 + $0x1b0] sm:$0xff]  }
  0x40   : > { %2762 = vmatpush3.bf16.msra.mxu0 %v2969_v6  ;;  %2667 = vmatprep.subr.bf16.mxu1 %v2972_v14  ;;  %v1251_v6 = vrot.slane %v1249_v61, 4  ;;  %v548_v46 = vrot.slane %v547_v40, 4  ;;  %v569_v50 = vshrl.u32 %v513_v44, 16  ;;  %v572_v54 = vshll.u32 %v513_v44, 16 }
  0x41   : > { %2763 = vmatprep.subr.bf16.mxu0 %v2973_v19  ;;  %v1241_v10 = vor.u32 %v1240_v2, %v1237_v1  ;;  %v578_v58 = vshll.u32 %v514_v47, 16 }
  0x42   : > { %v1255_v15 = vor.u32 %v1254_v7, %v1251_v6  ;;  %v553_v55 = vsel %vm3173_vm2, %v548_v46, %v552_v36  ;;  %v571_v57 = vrot.slane %v569_v50, 4  ;;  %v574_v63 = vrot.slane %v572_v54, 5  ;;  %v2993_v6 = vld [vmem:[%s3428_s1 + $0x1b8] sm:$0xff]   ;;  %v2994_v7 = vld [vmem:[%s3428_s1 + $0xc0] sm:$0xff]  }
  0x43   : > { %2668 = vmatpush3.bf16.msra.mxu1 %v2972_v14  ;;  %v2369_v14 = vcombine.low %v1219_v5, %v1233_v9  ;;  %v1242_v20 = vrot.slane %v1241_v10, 4  ;;  %v2996_v10 = vld [vmem:[%s3428_s1 + $0x1c0] sm:$0xff]   ;;  %v3002_v50 = vld [vmem:[%s3428_s1 + $0xd8] sm:$0xff]  }
  0x44   : > { %2764 = vmatpush3.bf16.msra.mxu0 %v2973_v19  ;;  %2677 = vmatprep.subr.bf16.mxu1 %v2975_v21  ;;  %v530_v19 = vshll.u32 %v507_v11, 16  ;;  %v575_v1 = vor.u32 %v574_v63, %v571_v57  ;;  %v2997_v11 = vld [vmem:[%s3102_s10 + $0x18] ss:$8 sps:$4 sm:$0xff]  }
  0x45   : > { %2773 = vmatprep.subr.bf16.mxu0 %v2976_v24 }
  0x46   : > { %2670 = vmatmul.mubr.bf16.vlgmr.msra.gmra.mrb[0].mxu1 %v2977_v25  ;;  %v529_v25 = vrot.slane %v527_v18, 4  ;;  %v576_v5 = vrot.slane %v575_v1, 4  ;;  %v2999_v18 = vld [vmem:[%s3428_s1 + $0x1c8] sm:$0xff]   ;;  %v3004_v1 = vld [vmem:[%s3428_s1 + $0xe0] sm:$0xff]  }
  0x47   : > { %2678 = vmatpush3.bf16.msra.mxu1 %v2975_v21  ;;  %2766 = vmatmul.mubr.bf16.vlgmr.msra.gmra.mrb[0].mxu0 %v2368_v28  ;;  %v536_v21 = vshll.u32 %v508_v12, 16  ;;  %v2985_v28 = vld [vmem:[%s3428_s1 + $0x1a0] sm:$0xff]  }
  0x48   : > { %2774 = vmatpush3.bf16.msra.mxu0 %v2976_v24  ;;  %2679 = vmatprep.subr.bf16.mxu1 %v2978_v26  ;;  %v1256_v24 = vrot.slane %v1255_v15, 4  ;;  %v515_v12 = vld [vmem:[%s3102_s10 + $0x20] sm:$0xf]  ;;  %v516_v15 = vld [vmem:[%s3102_s10 + $0x24] sm:$0x1] }
  0x49   : > { %2775 = vmatprep.subr.bf16.mxu0 %v2979_v29  ;;  %2673 = vmatprep.mubr.bf16.mxu1 %v2988_v37  ;;  %v538_v35 = vrot.slane %v536_v21, 5  ;;  %v2995_v37 = vld [vmem:[%s3102_s10 + $0x8] ss:$8 sps:$4 sm:$0xff]   ;;  %v592_v21 = vshll.u32 %v516_v15, 16 }
  0x4a   : > { %2769 = vmatprep.mubr.bf16.mxu0 %v2369_v14  ;;  %v1261_v33 = vsel %vm3173_vm2, %v1256_v24, %v1260_v8  ;;  %v2998_v14 = vld [vmem:[%s3428_s1 + $0xc8] sm:$0xff]   ;;  %v606_v24 = vshll.u32 %v518_v17, 16  ;;  %v2453_v17 = vld [vmem:[%s3102_s10 + $0x10] sm:$0xf] }
  0x4b   : > { %2680 = vmatpush3.bf16.msra.mxu1 %v2978_v26  ;;  %v532_v26 = vrot.slane %v530_v19, 5  ;;  %v583_v19 = vshrl.u32 %v515_v12, 16  ;;  %v2451_v15 = vld [vmem:[%s3102_s10 + $0x8] sm:$0xf]  ;;  %v1792_v23 = vshll.u32 %v2453_v17, 16 }
  0x4c   : > { %2776 = vmatpush3.bf16.msra.mxu0 %v2979_v29  ;;  %2681 = vmatprep.subr.bf16.mxu1 %v2980_v43  ;;  %v1247_v29 = vsel %vm3173_vm2, %v1242_v20, %v1246_v3  ;;  %v580_v3 = vrot.slane %v578_v58, 5  ;;  %v586_v20 = vshll.u32 %v515_v12, 16  ;;  %v3010_v58 = vld [vmem:[%s3102_s10 + $0x38] ss:$8 sps:$4 sm:$0xff]  }
  0x4d   : > { %2777 = vmatprep.subr.bf16.mxu0 %v2981_v52  ;;  %v533_v34 = vor.u32 %v532_v26, %v529_v25  ;;  %v2370_v39 = vcombine.low %v1247_v29, %v1261_v33  ;;  %v3008_v25 = vld [vmem:[%s3102_s10 + $0x28] ss:$8 sps:$4 sm:$0xff]   ;;  %v585_v26 = vrot.slane %v583_v19, 4  ;;  %v599_v29 = vrot.slane %v597_v22, 4  ;;  %v520_v33 = vld [vmem:[%s3102_s10 + $0x34] sm:$0x1] }
  0x4e   : > { %2674 = vmatmul.mubr.bf16.gmra.mrb[4].mxu1 %v2991_v48  ;;  %v558_v48 = vshll.u32 %v511_v41, 16  ;;  %v581_v9 = vsel %vm3173_vm2, %v576_v5, %v580_v3  ;;  %v588_v27 = vrot.slane %v586_v20, 5  ;;  %v620_v40 = vshll.u32 %v520_v33, 16  ;;  %v3001_v41 = vld [vmem:[%s3428_s1 + $0x1d0] sm:$0xff]   ;;  %v3005_v5 = vld [vmem:[%s3428_s1 + $0x1e0] sm:$0xff]   ;;  %v3012_v12 = vld [vmem:[%s3428_s1 + $0xf8] sm:$0xff]  }
  0x4f   : > { %2682 = vmatpush3.bf16.msra.mxu1 %v2980_v43  ;;  %v534_v42 = vrot.slane %v533_v34, 4  ;;  %v512_v43 = vld [vmem:[%s3102_s10 + $0x14] sm:$0x1]  ;;  %2770 = vmatmul.mubr.bf16.gmra.mrb[4].mxu0 %v2370_v39  ;;  %v521_v34 = vld [vmem:[%s3102_s10 + $0x38] sm:$0xf]  ;;  %v614_v39 = vshll.u32 %v519_v30, 16 }
  0x50   : > { %2778 = vmatpush3.bf16.msra.mxu0 %v2981_v52  ;;  %2683 = vmatprep.subr.bf16.mxu1 %v2982_v59  ;;  %v564_v49 = vshll.u32 %v512_v43, 16  ;;  %v557_v52 = vrot.slane %v555_v45, 4  ;;  %v560_v56 = vrot.slane %v558_v48, 5  ;;  %v589_v36 = vor.u32 %v588_v27, %v585_v26  ;;  %v2462_v33 = vld [vmem:[%s3102_s10 + $0x34] sm:$0x1] }
  0x51   : > { %2779 = vmatprep.subr.bf16.mxu0 %v2983_v4  ;;  %v539_v51 = vsel %vm3173_vm2, %v534_v42, %v538_v35  ;;  %2789 = vmatprep.mubr.bf16.mxu0 %v2995_v37  ;;  %v3000_v35 = vld [vmem:[%s3428_s1 + $0xd0] sm:$0xff]   ;;  %v522_v37 = vld [vmem:[%s3102_s10 + $0x3c] sm:$0x1]  ;;  %v603_v42 = vor.u32 %v602_v31, %v599_v29  ;;  %v625_v43 = vshrl.u32 %v521_v34, 16  ;;  %v628_v44 = vshll.u32 %v521_v34, 16 }
  0x52   : > { %v2251_v61 = vcombine.low %v539_v51, %v553_v55  ;;  %v566_v62 = vrot.slane %v564_v49, 5  ;;  %v561_v0 = vor.u32 %v560_v56, %v557_v52  ;;  %v634_v45 = vshll.u32 %v522_v37, 16  ;;  %v2461_v29 = vld [vmem:[%s3102_s10 + $0x30] sm:$0xf]  ;;  %v3017_v34 = vld [vmem:[%s3102_s10 + $0x60] ss:$8 sps:$4 sm:$0xff]  }
  0x53   : > { %2684 = vmatpush3.bf16.msra.mxu1 %v2982_v59  ;;  %v2989_v59 = vld [vmem:[%s3428_s1 + $0xb0] sm:$0xff]   ;;  %v590_v46 = vrot.slane %v589_v36, 4  ;;  %v616_v48 = vrot.slane %v614_v39, 5  ;;  %v622_v49 = vrot.slane %v620_v40, 5  ;;  %v604_v51 = vrot.slane %v603_v42, 4  ;;  %v3019_v39 = vld [vmem:[%s3428_s1 + $0x208] sm:$0xff]  }
  0x54   : > { %2780 = vmatpush3.bf16.msra.mxu0 %v2983_v4  ;;  %2685 = vmatprep.subr.bf16.mxu1 %v2984_v13  ;;  %v562_v2 = vrot.slane %v561_v0, 4  ;;  %v2992_v4 = vld [vmem:[%s3428_s1 + $0xb8] sm:$0xff]   ;;  %v627_v52 = vrot.slane %v625_v43, 4  ;;  %v630_v54 = vrot.slane %v628_v44, 5  ;;  %v636_v55 = vrot.slane %v634_v45, 5 }
  0x55   : > { %2781 = vmatprep.subr.bf16.mxu0 %v2985_v28  ;;  %2693 = vmatprep.mubr.bf16.mxu1 %v2251_v61  ;;  %v3003_v61 = vld [vmem:[%s3428_s1 + $0x1d8] sm:$0xff]   ;;  %v1775_v19 = vshrl.u32 %v2451_v15, 16  ;;  %v1778_v20 = vshll.u32 %v2451_v15, 16  ;;  %v1789_v22 = vshrl.u32 %v2453_v17, 16  ;;  %v1848_v42 = vshll.u32 %v2461_v29, 16  ;;  %v3026_v15 = vld [vmem:[%s3428_s1 + $0x220] sm:$0xff]  }
  0x56   : > { %v567_v8 = vsel %vm3173_vm2, %v562_v2, %v566_v62  ;;  %v1854_v43 = vshll.u32 %v2462_v33, 16  ;;  %v3020_v44 = vld [vmem:[%s3102_s10 + $0xb0] ss:$8 sps:$4 sm:$0xff]  }
  0x57   : > { %2686 = vmatpush3.bf16.msra.mxu1 %v2984_v13  ;;  %v2252_v13 = vcombine.low %v567_v8, %v581_v9  ;;  %v3006_v8 = vld [vmem:[%s3428_s1 + $0xe8] sm:$0xff]   ;;  %v1777_v26 = vrot.slane %v1775_v19, 4  ;;  %v1780_v27 = vrot.slane %v1778_v20, 5  ;;  %v1791_v31 = vrot.slane %v1789_v22, 4 }
  0x58   : > { %2782 = vmatpush3.bf16.msra.mxu0 %v2985_v28  ;;  %2687 = vmatprep.subr.bf16.mxu1 %v2986_v32  ;;  %v594_v28 = vrot.slane %v592_v21, 5  ;;  %v3007_v9 = vld [vmem:[%s3428_s1 + $0x1e8] sm:$0xff]   ;;  %v1784_v21 = vshll.u32 %v2452_v16, 16 }
  0x59   : > { %2783 = vmatprep.subr.bf16.mxu0 %v2987_v38  ;;  %v3027_v20 = vld [vmem:[%s3428_s1 + $0x228] sm:$0xff]  }
  0x5a   : > { %v595_v56 = vsel %vm3173_vm2, %v590_v46, %v594_v28  ;;  %v2460_v28 = vld [vmem:[%s3102_s10 + $0x2c] sm:$0x1]  ;;  %v1786_v45 = vrot.slane %v1784_v21, 5  ;;  %v2464_v21 = vld [vmem:[%s3102_s10 + $0x3c] sm:$0x1] }
  0x5b   : > { %2688 = vmatpush3.bf16.msra.mxu1 %v2986_v32  ;;  %v608_v32 = vrot.slane %v606_v24, 5 }
  0x5c   : > { %2784 = vmatpush3.bf16.msra.mxu0 %v2987_v38  ;;  %2689 = vmatprep.subr.bf16.mxu1 %v2989_v59  ;;  %v611_v38 = vshrl.u32 %v519_v30, 16  ;;  %v3016_v30 = vld [vmem:[%s3102_s10 + $0xa0] ss:$8 sps:$4 sm:$0xff]  }
  0x5d   : > { %2785 = vmatprep.subr.bf16.mxu0 %v2990_v60 }
  0x5e   : > { %v613_v47 = vrot.slane %v611_v38, 4  ;;  %v1840_v38 = vshll.u32 %v2460_v28, 16 }
  0x5f   : > { %2690 = vmatpush3.bf16.msra.mxu1 %v2989_v59  ;;  %v609_v59 = vsel %vm3173_vm2, %v604_v51, %v608_v32  ;;  %v1794_v32 = vrot.slane %v1792_v23, 5 }
  0x60   : > { %2786 = vmatpush3.bf16.msra.mxu0 %v2990_v60  ;;  %2691 = vmatprep.subr.bf16.mxu1 %v2992_v4  ;;  %v617_v57 = vor.u32 %v616_v48, %v613_v47  ;;  %v631_v60 = vor.u32 %v630_v54, %v627_v52  ;;  %v2253_v62 = vcombine.low %v595_v56, %v609_v59  ;;  %v1850_v54 = vrot.slane %v1848_v42, 5 }
  0x61   : > { %2787 = vmatprep.subr.bf16.mxu0 %v2993_v6  ;;  %v1795_v40 = vor.u32 %v1794_v32, %v1791_v31  ;;  %v1842_v56 = vrot.slane %v1840_v38, 5  ;;  %v1856_v59 = vrot.slane %v1854_v43, 5  ;;  %v2456_v31 = vld [vmem:[%s3102_s10 + $0x1c] sm:$0x1]  ;;  %v2458_v32 = vld [vmem:[%s3102_s10 + $0x24] sm:$0x1] }
  0x62   : > { %v618_v63 = vrot.slane %v617_v57, 4  ;;  %v632_v0 = vrot.slane %v631_v60, 4  ;;  %v3024_v57 = vld [vmem:[%s3428_s1 + $0x210] sm:$0xff]  }
  0x63   : > { %2692 = vmatpush3.bf16.msra.mxu1 %v2992_v4  ;;  %v3015_v4 = vld [vmem:[%s3102_s10 + $0x50] ss:$8 sps:$4 sm:$0xff]   ;;  %v1796_v51 = vrot.slane %v1795_v40, 4 }
  0x64   : > { %2788 = vmatpush3.bf16.msra.mxu0 %v2993_v6  ;;  %2701 = vmatprep.subr.bf16.mxu1 %v2994_v7  ;;  %v623_v2 = vsel %vm3173_vm2, %v618_v63, %v622_v49  ;;  %v637_v3 = vsel %vm3173_vm2, %v632_v0, %v636_v55  ;;  %v3021_v49 = vld [vmem:[%s3102_s10 + $0x70] ss:$8 sps:$4 sm:$0xff]  }
  0x65   : > { %2797 = vmatprep.subr.bf16.mxu0 %v2996_v10  ;;  %v2254_v6 = vcombine.low %v623_v2, %v637_v3  ;;  %v3025_v3 = vld [vmem:[%s3428_s1 + $0x218] sm:$0xff]  }
  0x66   : > { %2694 = vmatmul.mubr.bf16.vlgmr.msra.gmra.mrb[0].mxu1 %v2252_v13  ;;  %v3013_v13 = vld [vmem:[%s3428_s1 + $0x1f8] sm:$0xff]  }
  0x67   : > { %2702 = vmatpush3.bf16.msra.mxu1 %v2994_v7  ;;  %2790 = vmatmul.mubr.bf16.vlgmr.msra.gmra.mrb[0].mxu0 %v2997_v11  ;;  %v3014_v7 = vld [vmem:[%s3102_s10 + $0x90] ss:$8 sps:$4 sm:$0xff]  }
  0x68   : > { %2798 = vmatpush3.bf16.msra.mxu0 %v2996_v10  ;;  %2703 = vmatprep.subr.bf16.mxu1 %v2998_v14  ;;  %v3009_v10 = vld [vmem:[%s3428_s1 + $0xf0] sm:$0xff]  }
  0x69   : > { %2799 = vmatprep.subr.bf16.mxu0 %v2999_v18  ;;  %2793 = vmatprep.mubr.bf16.mxu0 %v3008_v25  ;;  %v3011_v11 = vld [vmem:[%s3428_s1 + $0x1f0] sm:$0xff]   ;;  %v2459_v25 = vld [vmem:[%s3102_s10 + $0x28] sm:$0xf] }
  0x6a   : > { %2697 = vmatprep.mubr.bf16.mxu1 %v2253_v62  ;;  %v1831_v36 = vshrl.u32 %v2459_v25, 16  ;;  %v1834_v37 = vshll.u32 %v2459_v25, 16 }
  0x6b   : > { %2704 = vmatpush3.bf16.msra.mxu1 %v2998_v14  ;;  %v3018_v14 = vld [vmem:[%s3428_s1 + $0x200] sm:$0xff]  }
  0x6c   : > { %2800 = vmatpush3.bf16.msra.mxu0 %v2999_v18  ;;  %2705 = vmatprep.subr.bf16.mxu1 %v3000_v35  ;;  %v2454_v18 = vld [vmem:[%s3102_s10 + $0x14] sm:$0x1]  ;;  %v1833_v47 = vrot.slane %v1831_v36, 4  ;;  %v1836_v48 = vrot.slane %v1834_v37, 5 }
  0x6d   : > { %2801 = vmatprep.subr.bf16.mxu0 %v3001_v41  ;;  %v1798_v24 = vshll.u32 %v2454_v18, 16  ;;  %v3028_v37 = vld [vmem:[%s3428_s1 + $0x230] sm:$0xff]  }
  0x6e   : > { %2698 = vmatmul.mubr.bf16.gmra.mrb[4].mxu1 %v2254_v6  ;;  %v1837_v55 = vor.u32 %v1836_v48, %v1833_v47  ;;  %v2465_v6 = vld [vmem:[%s3102_s10 + $0x40] sm:$0xf] }
  0x6f   : > { %2706 = vmatpush3.bf16.msra.mxu1 %v3000_v35  ;;  %2794 = vmatmul.mubr.bf16.gmra.mrb[4].mxu0 %v3010_v58  ;;  %v1781_v35 = vor.u32 %v1780_v27, %v1777_v26  ;;  %v1800_v46 = vrot.slane %v1798_v24, 5 }
  0x70   : > { %2802 = vmatpush3.bf16.msra.mxu0 %v3001_v41  ;;  %2707 = vmatprep.subr.bf16.mxu1 %v3002_v50  ;;  %v1845_v41 = vshrl.u32 %v2461_v29, 16  ;;  %v1838_v60 = vrot.slane %v1837_v55, 4 }
  0x71   : > { %2803 = vmatprep.subr.bf16.mxu0 %v3003_v61  ;;  %2813 = vmatprep.mubr.bf16.mxu0 %v3015_v4  ;;  %v1801_v63 = vsel %vm3173_vm2, %v1796_v51, %v1800_v46  ;;  %v3029_v46 = vld [vmem:[%s3428_s1 + $0x238] sm:$0xff]  }
  0x72   : > { %2717 = vmatprep.mubr.bf16.mxu1 %v3014_v7  ;;  %v1847_v52 = vrot.slane %v1845_v41, 4  ;;  %v1843_v2 = vsel %vm3173_vm2, %v1838_v60, %v1842_v56  ;;  %v1826_v41 = vshll.u32 %v2458_v32, 16 }
  0x73   : > { %2708 = vmatpush3.bf16.msra.mxu1 %v3002_v50  ;;  %v1782_v50 = vrot.slane %v1781_v35, 4 }
  0x74   : > { %2804 = vmatpush3.bf16.msra.mxu0 %v3003_v61  ;;  %2709 = vmatprep.subr.bf16.mxu1 %v3004_v1  ;;  %v1851_v58 = vor.u32 %v1850_v54, %v1847_v52  ;;  %v3022_v61 = vld [vmem:[%s3102_s10 + $0xc0] ss:$8 sps:$4 sm:$0xff]  }
  0x75   : > { %2805 = vmatprep.subr.bf16.mxu0 %v3005_v5  ;;  %v1787_v62 = vsel %vm3173_vm2, %v1782_v50, %v1786_v45  ;;  %v1828_v50 = vrot.slane %v1826_v41, 5 }
  0x76   : > { %v1852_v0 = vrot.slane %v1851_v58, 4  ;;  %v2483_v7 = vcombine.low %v1787_v62, %v1801_v63 }
  0x77   : > { %2710 = vmatpush3.bf16.msra.mxu1 %v3004_v1  ;;  %v3023_v1 = vld [vmem:[%s3102_s10 + $0x80] ss:$8 sps:$4 sm:$0xff]  }
  0x78   : > { %2806 = vmatpush3.bf16.msra.mxu0 %v3005_v5  ;;  %2711 = vmatprep.subr.bf16.mxu1 %v3006_v8  ;;  %v1857_v4 = vsel %vm3173_vm2, %v1852_v0, %v1856_v59  ;;  %v2463_v5 = vld [vmem:[%s3102_s10 + $0x38] sm:$0xf] }
  0x79   : > { %2807 = vmatprep.subr.bf16.mxu0 %v3007_v9 }
  0x7b   : > { %2712 = vmatpush3.bf16.msra.mxu1 %v3006_v8  ;;  %v2455_v8 = vld [vmem:[%s3102_s10 + $0x18] sm:$0xf] }
  0x7c   : > { %2808 = vmatpush3.bf16.msra.mxu0 %v3007_v9  ;;  %2713 = vmatprep.subr.bf16.mxu1 %v3009_v10  ;;  %v2457_v9 = vld [vmem:[%s3102_s10 + $0x20] sm:$0xf]  ;;  %v1803_v16 = vshrl.u32 %v2455_v8, 16  ;;  %v1806_v17 = vshll.u32 %v2455_v8, 16 }
  0x7d   : > { %2809 = vmatprep.subr.bf16.mxu0 %v3011_v11  ;;  %v1817_v18 = vshrl.u32 %v2457_v9, 16  ;;  %v1820_v19 = vshll.u32 %v2457_v9, 16 }
  0x7e   : > { %v1805_v26 = vrot.slane %v1803_v16, 4  ;;  %v1808_v27 = vrot.slane %v1806_v17, 5 }
  0x7f   : > { %2714 = vmatpush3.bf16.msra.mxu1 %v3009_v10  ;;  %v2485_v10 = vcombine.low %v1843_v2, %v1857_v4  ;;  %v1819_v28 = vrot.slane %v1817_v18, 4  ;;  %v1822_v29 = vrot.slane %v1820_v19, 5 }
  0x80   : > { %2810 = vmatpush3.bf16.msra.mxu0 %v3011_v11  ;;  %2715 = vmatprep.subr.bf16.mxu1 %v3012_v12  ;;  %v1859_v11 = vshrl.u32 %v2463_v5, 16  ;;  %v1809_v38 = vor.u32 %v1808_v27, %v1805_v26 }
  0x81   : > { %2811 = vmatprep.subr.bf16.mxu0 %v3013_v13  ;;  %v1823_v40 = vor.u32 %v1822_v29, %v1819_v28 }
  0x82   : > { %v1861_v22 = vrot.slane %v1859_v11, 4  ;;  %v1810_v47 = vrot.slane %v1809_v38, 4 }
  0x83   : > { %2716 = vmatpush3.bf16.msra.mxu1 %v3012_v12  ;;  %v1862_v12 = vshll.u32 %v2463_v5, 16 }
  0x84   : > { %2812 = vmatpush3.bf16.msra.mxu0 %v3013_v13  ;;  %2845 = vmatprep.subr.bf16.mxu1 %v3018_v14  ;;  %v1873_v13 = vshrl.u32 %v2465_v6, 16 }
  0x85   : > { %2821 = vmatprep.subr.bf16.mxu0 %v3018_v14  ;;  %v1864_v23 = vrot.slane %v1862_v12, 5 }
  0x86   : > { %2718 = vmatmul.mubr.bf16.vlgmr.msra.gmra.mrb[0].mxu1 %v3016_v30  ;;  %v1875_v24 = vrot.slane %v1873_v13, 4  ;;  %v2466_v30 = vld [vmem:[%s3102_s10 + $0x44] sm:$0x1] }
  0x87   : > { %2814 = vmatmul.mubr.bf16.vlgmr.msra.gmra.mrb[0].mxu0 %v3017_v34  ;;  %2853 = vmatpush3.bf16.msra.mxu1 %v3018_v14  ;;  %v1865_v33 = vor.u32 %v1864_v23, %v1861_v22  ;;  %v1868_v34 = vshll.u32 %v2464_v21, 16  ;;  %v1882_v36 = vshll.u32 %v2466_v30, 16 }
  0x88   : > { %2822 = vmatpush3.bf16.msra.mxu0 %v3018_v14  ;;  %2846 = vmatprep.subr.bf16.mxu1 %v3019_v39  ;;  %v1876_v14 = vshll.u32 %v2465_v6, 16 }
  0x89   : > { %2823 = vmatprep.subr.bf16.mxu0 %v3019_v39  ;;  %2721 = vmatprep.mubr.bf16.mxu1 %v3020_v44  ;;  %v1866_v42 = vrot.slane %v1865_v33, 4  ;;  %v1870_v43 = vrot.slane %v1868_v34, 5  ;;  %v1884_v45 = vrot.slane %v1882_v36, 5 }
  0x8a   : > { %2817 = vmatprep.mubr.bf16.mxu0 %v3021_v49  ;;  %v1878_v25 = vrot.slane %v1876_v14, 5  ;;  %v1824_v49 = vrot.slane %v1823_v40, 4 }
  0x8b   : > { %2854 = vmatpush3.bf16.msra.mxu1 %v3019_v39  ;;  %v1871_v51 = vsel %vm3173_vm2, %v1866_v42, %v1870_v43 }
  0x8c   : > { %2824 = vmatpush3.bf16.msra.mxu0 %v3019_v39  ;;  %2847 = vmatprep.subr.bf16.mxu1 %v3024_v57  ;;  %v1879_v35 = vor.u32 %v1878_v25, %v1875_v24  ;;  %v1812_v39 = vshll.u32 %v2456_v31, 16  ;;  %v1829_v55 = vsel %vm3173_vm2, %v1824_v49, %v1828_v50 }
  0x8d   : > { %2825 = vmatprep.subr.bf16.mxu0 %v3024_v57 }
  0x8e   : > { %2722 = vmatmul.mubr.bf16.gmra.mrb[4].mxu1 %v3022_v61  ;;  %v1880_v44 = vrot.slane %v1879_v35, 4  ;;  %v1814_v48 = vrot.slane %v1812_v39, 5 }
  0x8f   : > { %2818 = vmatmul.mubr.bf16.gmra.mrb[4].mxu0 %v3023_v1  ;;  %2855 = vmatpush3.bf16.msra.mxu1 %v3024_v57 }
  0x90   : > { %2826 = vmatpush3.bf16.msra.mxu0 %v3024_v57  ;;  %2848 = vmatprep.subr.bf16.mxu1 %v3025_v3  ;;  %v1885_v52 = vsel %vm3173_vm2, %v1880_v44, %v1884_v45  ;;  %v1815_v54 = vsel %vm3173_vm2, %v1810_v47, %v1814_v48 }
  0x91   : > { %2827 = vmatprep.subr.bf16.mxu0 %v3025_v3  ;;  %2837 = vmatprep.mubr.bf16.mxu0 %v2483_v7  ;;  %v2486_v56 = vcombine.low %v1871_v51, %v1885_v52  ;;  %v2484_v57 = vcombine.low %v1815_v54, %v1829_v55 }
  0x92   : > { %2841 = vmatprep.mubr.bf16.mxu1 %v2485_v10 }
  0x93   : > { %2856 = vmatpush3.bf16.msra.mxu1 %v3025_v3 }
  0x94   : > { %2828 = vmatpush3.bf16.msra.mxu0 %v3025_v3  ;;  %2849 = vmatprep.subr.bf16.mxu1 %v3026_v15 }
  0x95   : > { %2829 = vmatprep.subr.bf16.mxu0 %v3026_v15 }
  0x97   : > { %2857 = vmatpush3.bf16.msra.mxu1 %v3026_v15 }
  0x98   : > { %2830 = vmatpush3.bf16.msra.mxu0 %v3026_v15  ;;  %2850 = vmatprep.subr.bf16.mxu1 %v3027_v20 }
  0x99   : > { %2831 = vmatprep.subr.bf16.mxu0 %v3027_v20 }
  0x9b   : > { %2858 = vmatpush3.bf16.msra.mxu1 %v3027_v20 }
  0x9c   : > { %2832 = vmatpush3.bf16.msra.mxu0 %v3027_v20  ;;  %2851 = vmatprep.subr.bf16.mxu1 %v3028_v37 }
  0x9d   : > { %2833 = vmatprep.subr.bf16.mxu0 %v3028_v37 }
  0x9f   : > { %2859 = vmatpush3.bf16.msra.mxu1 %v3028_v37 }
  0xa0   : > { %2834 = vmatpush3.bf16.msra.mxu0 %v3028_v37  ;;  %2852 = vmatprep.subr.bf16.mxu1 %v3029_v46 }
  0xa1   : > { %2835 = vmatprep.subr.bf16.mxu0 %v3029_v46 }
  0xa3   : > { %2860 = vmatpush3.bf16.msra.mxu1 %v3029_v46 }
  0xa4   : > { %2836 = vmatpush3.bf16.msra.mxu0 %v3029_v46 }
  0xa6   : > { %2842 = vmatmul.mubr.bf16.vlgmr.msra.gmra.mrb[8].mxu1 %v2486_v56 }
  0xa7   : > { %2838 = vmatmul.mubr.bf16.vlgmr.msra.gmra.mrb[0].mxu0 %v2484_v57 }
 0x159   : > { %v2719_v58 = vpop.f32.mrb[0].mxu1 }
 0x15a   : > { %v924_v59 = vpop.f32.mrb[1].mxu1 }
 0x15b   : > { %v2720_v60 = vpop.f32.mrb[2].mxu1 }
 0x15c   : > { %v927_v61 = vpop.f32.mrb[3].mxu1 }
 0x161   : > { %v2723_v62 = vpop.f32.mrb[4].mxu1 }
 0x162   : > { %v2819_v63 = vpop.f32.mrb[4].mxu0  ;;  %v940_v0 = vpop.f32.mrb[5].mxu1 }
 0x163   : > { %v2865_v1 = vadd.f32 %v2819_v63, %v2723_v62  ;;  %v1735_v2 = vpop.f32.mrb[5].mxu0  ;;  %v2724_v3 = vpop.f32.mrb[6].mxu1 }
 0x164   : > { %v2867_v53 = vadd.f32 %v1735_v2, %v940_v0  ;;  %v2820_v4 = vpop.f32.mrb[6].mxu0  ;;  %v943_v5 = vpop.f32.mrb[7].mxu1 }
 0x165   : > { %v2869_v6 = vadd.f32 %v2820_v4, %v2724_v3  ;;  %v1738_v7 = vpop.f32.mrb[7].mxu0 }
 0x166   : > { %v2871_v8 = vadd.f32 %v1738_v7, %v943_v5 }
 0x179   : > { %v2843_v9 = vpop.f32.mrb[8].mxu1 }
 0x17a   : > { %v2839_v10 = vpop.f32.mrb[0].mxu0  ;;  %v2866_v11 = vadd.f32 %v2865_v1, %v2843_v9  ;;  %v2017_v12 = vpop.f32.mrb[9].mxu1 }
 0x17b   : > { %v2861_v13 = vadd.f32 %v2839_v10, %v2719_v58  ;;  %v2001_v14 = vpop.f32.mrb[1].mxu0  ;;  %v2868_v15 = vadd.f32 %v2867_v53, %v2017_v12  ;;  %v2844_v16 = vpop.f32.mrb[10].mxu1 }
 0x17c   : > { %v2862_v17 = vadd.f32 %v2001_v14, %v924_v59  ;;  %v2840_v18 = vpop.f32.mrb[2].mxu0  ;;  %v2870_v19 = vadd.f32 %v2869_v6, %v2844_v16  ;;  %v2020_v20 = vpop.f32.mrb[11].mxu1  ;;  %v2076_v44 = vmul.f32 %v2866_v11, %v2866_v11 }
 0x17d   : > { %v2863_v21 = vadd.f32 %v2840_v18, %v2720_v60  ;;  %v2004_v22 = vpop.f32.mrb[3].mxu0  ;;  %v2872_v23 = vadd.f32 %v2871_v8, %v2020_v20  ;;  %v2072_v32 = vmul.f32 %v2861_v13, %v2861_v13  ;;  %v2074_v38 = vmul.f32 %v2868_v15, %v2868_v15 }
 0x17e   : > { %v2516_v24 = vpack.c.bf16 %v2870_v19, %v2866_v11  ;;  %v2864_v25 = vadd.f32 %v2004_v22, %v927_v61  ;;  %v2070_v28 = vmul.f32 %v2862_v17, %v2862_v17  ;;  %v2077_v47 = vmul.f32 %v2870_v19, %v2870_v19 }
 0x17f   : > { %v2506_v26 = vpack.c.bf16 %v2863_v21, %v2861_v13  ;;  %v2511_v27 = vpack.c.bf16 %v2872_v23, %v2868_v15  ;;  %v2073_v35 = vmul.f32 %v2863_v21, %v2863_v21  ;;  %v2075_v42 = vmul.f32 %v2872_v23, %v2872_v23 }
 0x180   : > { %2520 = vst [vmem:[%s177_s19 + $0x18] sm:$0xff] %v2516_v24   ;;  %v2501_v29 = vpack.c.bf16 %v2864_v25, %v2862_v17  ;;  %v2056_v30 = vadd.f32 %v2864_v25, %v2862_v17  ;;  %v2071_v31 = vmul.f32 %v2864_v25, %v2864_v25 }
 0x181   : > { %2518 = vst [vmem:[%s177_s19 + $0x8] sm:$0xff] %v2506_v26   ;;  %2519 = vst [vmem:[%s177_s19 + $0x10] sm:$0xff] %v2511_v27  }
 0x182   : > { %2502 = vst [vmem:[%s177_s19] sm:$0xff] %v2501_v29   ;;  %v2057_v33 = vadd.f32 %v2861_v13, %v2056_v30  ;;  %v2078_v34 = vadd.f32 %v2071_v31, %v2070_v28 }
 0x184   : > { %v2079_v36 = vadd.f32 %v2078_v34, %v2072_v32  ;;  %v2058_v37 = vadd.f32 %v2863_v21, %v2057_v33 }
 0x186   : > { %v2059_v39 = vadd.f32 %v2868_v15, %v2058_v37  ;;  %v2080_v40 = vadd.f32 %v2079_v36, %v2073_v35 }
 0x188   : > { %v2060_v41 = vadd.f32 %v2872_v23, %v2059_v39  ;;  %v2081_v43 = vadd.f32 %v2080_v40, %v2074_v38 }
 0x18a   : > { %v2061_v45 = vadd.f32 %v2866_v11, %v2060_v41  ;;  %v2082_v46 = vadd.f32 %v2081_v43, %v2075_v42 }
 0x18c   : > { %v2062_v48 = vadd.f32 %v2870_v19, %v2061_v45  ;;  %v2083_v49 = vadd.f32 %v2082_v46, %v2076_v44 }
 0x18e   : > { %v2063_v50 = vrot.slane %v2062_v48, 4  ;;  %v2084_v51 = vadd.f32 %v2083_v49, %v2077_v47 }
 0x190   : > { %v2064_v52 = vadd.f32 %v2063_v50, %v2062_v48  ;;  %v2085_v54 = vrot.slane %v2084_v51, 4 }
 0x192   : > { %v2065_v55 = vrot.slane %v2064_v52, 2  ;;  %v2086_v56 = vadd.f32 %v2085_v54, %v2084_v51 }
 0x194   : > { %v2066_v57 = vadd.f32 %v2065_v55, %v2064_v52  ;;  %v2087_v58 = vrot.slane %v2086_v56, 2 }
 0x196   : > { %v2067_v59 = vrot.slane %v2066_v57, 1  ;;  %v2088_v60 = vadd.f32 %v2087_v58, %v2086_v56 }
 0x198   : > { %v2068_v61 = vadd.f32 %v2067_v59, %v2066_v57  ;;  %v2089_v62 = vrot.slane %v2088_v60, 1 }
 0x19a   : > { %2069 = vst [vmem:[%s181_s23] sm:$0x1] %v2068_v61  ;;  %v2090_v63 = vadd.f32 %v2089_v62, %v2088_v60 }
 0x19c   : > { %2091 = vst [vmem:[%s181_s23 + $0x1] sm:$0x1] %v2090_v63 }
 0x19d PF: > { %s14_s12 = sadd.s32 1, %s3036_s12  }
 0x19e   : > { %p11_p4 = scmp.ge.s32.totalorder %s14_s12, 4  }
 0x1a0   :  { %13 = sbr.rel (!%p11_p4) target bundleno = 1 (0x1), region = 83 }

// kernel: _lambda_.4
= control target key start
LH: loop header
LB: loop body
LE: loop exit
PB: predicated region body
PF: predicated region fallthrough
CT: control target
= control target key end

     0   :  { %s3423_s18 = smov 0   ;;  %s4065_s0 = inlined_call_operand.vmem [shape: bf16[2,8,8,128], index: 0, kind: input, shape index: {}]   ;;  %s4066_s1 = inlined_call_operand.vmem [shape: f32[1,128], index: 1, kind: input, shape index: {}]   ;;  %s4067_s2 = inlined_call_operand.vmem [shape: f32[1,128], index: 2, kind: input, shape index: {}]   ;;  %s4068_s3 = inlined_call_operand.vmem [shape: bf16[9,128,128], index: 3, kind: input, shape index: {}]   ;;  %s4069_s4 = inlined_call_operand.vmem [shape: f32[2,8,8,128], index: 4, kind: output, shape index: {0}]   ;;  %s4070_s5 = inlined_call_operand.vmem [shape: f32[2,2,128], index: 5, kind: output, shape index: {1}]  }
   0x1 LB: > { %s2576_s19 = sadd.s32 4294967295, %s3390_s18   ;;  %p2580_p0 = scmp.ge.s32.totalorder %s3390_s18, 1  ;;  %s3390_s18 = sphi %s3423_s18, %s16_s18  }
   0x2   : > { %p190_p1 = scmp.lt.s32.totalorder %s3390_s18, 3 }
   0x4   : > { %p191_p2 = pnand %p2580_p0, %p190_p1 }
   0x5   : > { %v3300_v0 = vld [vmem:[%s4068_s3 + $0x40] sm:$0xff] (!%p191_p2)   ;;  %v3302_v2 = vld [vmem:[%s4068_s3 + $0x48] sm:$0xff] (!%p191_p2)   ;;  %p3442_p3 = scmp.lt.s32.totalorder (!%p191_p2), %s2576_s19, 1  ;;  %v3392_v3 = vmov (!%p191_p2), 0   ;;  %v3304_v5 = vld [vmem:[%s4068_s3 + $0x50] sm:$0xff] (!%p191_p2)   ;;  %vm424_vm0 = vcmask (!%p191_p2), 1043456  }
   0x6   : > { %194 = sbr.rel (%p191_p2) target bundleno = 453 (0x1c5), region = 36  ;;  %v3301_v1 = vld [vmem:[%s4068_s3 + $0x100] sm:$0xff] (!%p191_p2)   ;;  %2995 = vmatprep.subr.bf16.mxu1 (!%p191_p2), %v3300_v0  ;;  %291 = vst [vmem:[#allocation2] sm:$0xf] (!%p191_p2), %v3392_v3  ;;  %292 = vst [vmem:[#allocation2 + $0x4] sm:$0x1] (!%p191_p2), %v3392_v3 }
   0x7   : > { %293 = vst [vmem:[#allocation2 + $0x8] sm:$0xf] (!%p191_p2), %v3392_v3  ;;  %294 = vst [vmem:[#allocation2 + $0xc] sm:$0x1] (!%p191_p2), %v3392_v3  ;;  %3091 = vmatprep.subr.bf16.mxu0 (!%p191_p2), %v3301_v1  ;;  %2996 = vmatpush3.bf16.msra.mxu1 (!%p191_p2), %v3300_v0  ;;  %v3303_v4 = vld [vmem:[%s4068_s3 + $0x108] sm:$0xff] (!%p191_p2)   ;;  %v3305_v6 = vld [vmem:[%s4068_s3 + $0x110] sm:$0xff] (!%p191_p2)  }
   0x8   : > { %295 = vst [vmem:[#allocation2 + $0x10] sm:$0xf] (!%p191_p2), %v3392_v3  ;;  %296 = vst [vmem:[#allocation2 + $0x14] sm:$0x1] (!%p191_p2), %v3392_v3  ;;  %3092 = vmatpush3.bf16.msra.mxu0 (!%p191_p2), %v3301_v1  ;;  %2997 = vmatprep.subr.bf16.mxu1 (!%p191_p2), %v3302_v2  ;;  %v3306_v7 = vld [vmem:[%s4068_s3 + $0x58] sm:$0xff] (!%p191_p2)   ;;  %v3308_v9 = vld [vmem:[%s4068_s3 + $0x60] sm:$0xff] (!%p191_p2)  }
   0x9   : > { %297 = vst [vmem:[#allocation2 + $0x18] sm:$0xf] (!%p191_p2), %v3392_v3  ;;  %298 = vst [vmem:[#allocation2 + $0x1c] sm:$0x1] (!%p191_p2), %v3392_v3  ;;  %3093 = vmatprep.subr.bf16.mxu0 (!%p191_p2), %v3303_v4  ;;  %v3307_v8 = vld [vmem:[%s4068_s3 + $0x118] sm:$0xff] (!%p191_p2)   ;;  %v3309_v10 = vld [vmem:[%s4068_s3 + $0x120] sm:$0xff] (!%p191_p2)  }
   0xa   : > { %299 = vst [vmem:[#allocation2 + $0x20] sm:$0xf] (!%p191_p2), %v3392_v3  ;;  %300 = vst [vmem:[#allocation2 + $0x24] sm:$0x1] (!%p191_p2), %v3392_v3  ;;  %v3310_v11 = vld [vmem:[%s4068_s3 + $0x68] sm:$0xff] (!%p191_p2)   ;;  %v3312_v20 = vld [vmem:[%s4068_s3 + $0x70] sm:$0xff] (!%p191_p2)  }
   0xb   : > { %301 = vst [vmem:[#allocation2 + $0x28] sm:$0xf] (!%p191_p2), %v3392_v3  ;;  %302 = vst [vmem:[#allocation2 + $0x2c] sm:$0x1] (!%p191_p2), %v3392_v3  ;;  %2998 = vmatpush3.bf16.msra.mxu1 (!%p191_p2), %v3302_v2  ;;  %v3485_v12 = vld [vmem:[%s4066_s1] ss:$0 sm:$0xff] (!%p191_p2) }
   0xc   : > { %303 = vst [vmem:[#allocation2 + $0x30] sm:$0xf] (!%p191_p2), %v3392_v3  ;;  %304 = vst [vmem:[#allocation2 + $0x34] sm:$0x1] (!%p191_p2), %v3392_v3  ;;  %3094 = vmatpush3.bf16.msra.mxu0 (!%p191_p2), %v3303_v4  ;;  %2999 = vmatprep.subr.bf16.mxu1 (!%p191_p2), %v3304_v5  ;;  %v3311_v14 = vld [vmem:[%s4068_s3 + $0x128] sm:$0xff] (!%p191_p2)   ;;  %v3313_v23 = vld [vmem:[%s4068_s3 + $0x130] sm:$0xff] (!%p191_p2)  }
   0xd   : > { %305 = vst [vmem:[#allocation2 + $0x38] sm:$0xf] %v3392_v3  ;;  %306 = vst [vmem:[#allocation2 + $0x3c] sm:$0x1] %v3392_v3  ;;  %s4081_s19 = smov (!%p3442_p3, %s2576_s19), 1  ;;  %3095 = vmatprep.subr.bf16.mxu0 %v3305_v6  ;;  %v3314_v28 = vld [vmem:[%s4068_s3 + $0x78] sm:$0xff]  }
   0xe   : > { %307 = vst [vmem:[#allocation2 + $0x40] sm:$0xf] %v3392_v3  ;;  %308 = vst [vmem:[#allocation2 + $0x44] sm:$0x1] %v3392_v3  ;;  %s2858_s12 = sshll.u32 %s4081_s19, 5  ;;  %vm430_vm1 = vcmask 1040384  }
   0xf   : > { %309 = vst [vmem:[#allocation2 + $0x48] sm:$0xf] %v3392_v3  ;;  %310 = vst [vmem:[#allocation2 + $0x4c] sm:$0x1] %v3392_v3  ;;  %3000 = vmatpush3.bf16.msra.mxu1 %v3304_v5  ;;  %s3477_s21 = scalar_lea.vmem %s4065_s0, %s2858_s12  ;;  %v3494_v17 = vld [vmem:[%s4067_s2] ss:$0 sm:$0xff] }
  0x10   : > { %3096 = vmatpush3.bf16.msra.mxu0 %v3305_v6  ;;  %3001 = vmatprep.subr.bf16.mxu1 %v3306_v7  ;;  %v2869_v13 = vld [vmem:[%s3477_s21] sm:$0xff]   ;;  %v2884_v27 = vld [vmem:[%s3477_s21 + $0x8] sm:$0xff]   ;;  %vm425_vm2 = vsmask.f32 7938  ;;  %vm431_vm3 = vsmask.f32 256 }
  0x11   : > { %3097 = vmatprep.subr.bf16.mxu0 %v3307_v8  ;;  %v2870_v15 = vunpack.c.l.bf16 %v2869_v13  ;;  %v2871_v16 = vunpack.c.h.bf16 %v2869_v13  ;;  %v3496_v18 = vld [vmem:[#allocation2] sm:$0xf]  ;;  %v2874_v30 = vunpack.c.l.bf16 %v2884_v27  ;;  %v2875_v31 = vunpack.c.h.bf16 %v2884_v27  ;;  %v3315_v34 = vld [vmem:[%s4068_s3 + $0x138] sm:$0xff]   ;;  %v3521_v39 = vld [vmem:[#allocation2 + $0x4] sm:$0x1]  ;;  %s2859_s10 = sshll.u32 %s4081_s19, 6 }
  0x12   : > { %v514_v21 = vshrl.u32 %v3496_v18, 16  ;;  %v517_v25 = vshll.u32 %v3496_v18, 16  ;;  %v3526_v40 = vld [vmem:[%s4068_s3] sm:$0xff]   ;;  %v427_v46 = vld [vmem:[#allocation2 + $0x8] sm:$0xf]  ;;  %vm3537_vm6 = vmand %vm424_vm0, %vm425_vm2  ;;  %v523_v61 = vshll.u32 %v3521_v39, 16  ;;  %s231_s13 = scalar_lea.vmem %s4069_s4, %s2859_s10 }
  0x13   : > { %3002 = vmatpush3.bf16.msra.mxu1 %v3306_v7  ;;  %v261_v19 = vmul.f32 %v2870_v15, %v3485_v12  ;;  %v262_v22 = vmul.f32 %v2871_v16, %v3485_v12  ;;  %v263_v37 = vmul.f32 %v2874_v30, %v3485_v12  ;;  %v264_v38 = vmul.f32 %v2875_v31, %v3485_v12  ;;  %v3531_v44 = vld [vmem:[%s4068_s3 + $0x140] sm:$0xff]   ;;  %v433_v47 = vld [vmem:[#allocation2 + $0xc] sm:$0x1]  ;;  %v436_v53 = vld [vmem:[#allocation2 + $0x10] sm:$0xf]  ;;  %s2585_s14 = sshll.u32 %s4081_s19, 1 }
  0x14   : > { %3098 = vmatpush3.bf16.msra.mxu0 %v3307_v8  ;;  %3003 = vmatprep.subr.bf16.mxu1 %v3308_v9  ;;  %v3514_v32 = vrot.slane %v514_v21, 4  ;;  %v519_v36 = vrot.slane %v517_v25, 5  ;;  %vm510_vm4 = vsmask.f32 3328  ;;  %vm511_vm5 = vsmask.f32 7440  ;;  %vm3543_vm7 = vmand %vm430_vm1, %vm431_vm3  ;;  %s235_s17 = scalar_lea.vmem %s4070_s5, %s2585_s14 }
  0x15   : > { %3099 = vmatprep.subr.bf16.mxu0 %v3309_v10  ;;  %v275_v24 = vadd.f32 %v3494_v17, %v261_v19  ;;  %v276_v26 = vadd.f32 %v3494_v17, %v262_v22  ;;  %v277_v45 = vadd.f32 %v3494_v17, %v263_v37  ;;  %v278_v50 = vadd.f32 %v3494_v17, %v264_v38  ;;  %v439_v54 = vld [vmem:[#allocation2 + $0x14] sm:$0x1]  ;;  %v448_v16 = vld [vmem:[#allocation2 + $0x20] sm:$0xf]  ;;  %v451_v19 = vld [vmem:[#allocation2 + $0x24] sm:$0x1] }
  0x16   : > { %v520_v63 = vor.u32 %v519_v36, %v3514_v32  ;;  %vm3566_vm8 = vmor %vm510_vm4, %vm511_vm5  ;;  %v937_v32 = vrot.slane %v3521_v39, 5  ;;  %vm932_vm9 = vcmask 1042432   ;;  %vm933_vm10 = vcmask 1046532   ;;  %v3340_v39 = vld [vmem:[%s4068_s3 + $0x98] sm:$0xff]   ;;  %v3380_v27 = vld [vmem:[%s4068_s3 + $0x220] sm:$0xff]  }
  0x17   : > { %3004 = vmatpush3.bf16.msra.mxu1 %v3308_v9  ;;  %v283_v29 = vmax.f32 %v275_v24, 0.0  ;;  %v284_v33 = vmax.f32 %v276_v26, 0.0  ;;  %v285_v55 = vmax.f32 %v277_v45, 0.0  ;;  %v286_v58 = vmax.f32 %v278_v50, 0.0  ;;  %v442_v9 = vld [vmem:[#allocation2 + $0x18] sm:$0xf]  ;;  %vm3785_vm11 = vmor %vm932_vm9, %vm933_vm10 }
  0x18   : > { %3100 = vmatpush3.bf16.msra.mxu0 %v3309_v10  ;;  %3005 = vmatprep.subr.bf16.mxu1 %v3310_v11  ;;  %v445_v10 = vld [vmem:[#allocation2 + $0x1c] sm:$0x1]  ;;  %v3562_v24 = vrot.slane %v523_v61, 5 }
  0x19   : > { %3101 = vmatprep.subr.bf16.mxu0 %v3311_v14  ;;  %v2860_v35 = vpack.c.bf16 %v283_v29, %v283_v29  ;;  %v2861_v41 = vpack.c.bf16 %v284_v33, %v284_v33  ;;  %v2862_v62 = vpack.c.bf16 %v285_v55, %v285_v55  ;;  %v2863_v2 = vpack.c.bf16 %v286_v58, %v286_v58 }
  0x1b   : > { %3006 = vmatpush3.bf16.msra.mxu1 %v3310_v11  ;;  %v344_v42 = vshrl.u32 %v2860_v35, 16  ;;  %v347_v43 = vshll.u32 %v2860_v35, 16  ;;  %v352_v48 = vshrl.u32 %v2861_v41, 16  ;;  %v355_v49 = vshll.u32 %v2861_v41, 16  ;;  %v3580_v35 = vld [vmem:[%s3477_s21 + $0x18] sm:$0xff]  }
  0x1c   : > { %3102 = vmatpush3.bf16.msra.mxu0 %v3311_v14  ;;  %3007 = vmatprep.subr.bf16.mxu1 %v3312_v20  ;;  %v360_v5 = vshrl.u32 %v2862_v62, 16  ;;  %v363_v6 = vshll.u32 %v2862_v62, 16  ;;  %v368_v11 = vshrl.u32 %v2863_v2, 16  ;;  %v371_v13 = vshll.u32 %v2863_v2, 16 }
  0x1d   : > { %3103 = vmatprep.subr.bf16.mxu0 %v3313_v23  ;;  %v346_v51 = vrot.slane %v344_v42, 7  ;;  %v354_v57 = vrot.slane %v352_v48, 7  ;;  %v2882_v58 = vunpack.c.l.bf16 %v3580_v35 }
  0x1e   : > { %v362_v14 = vrot.slane %v360_v5, 7  ;;  %v370_v15 = vrot.slane %v368_v11, 7 }
  0x1f   : > { %3008 = vmatpush3.bf16.msra.mxu1 %v3312_v20  ;;  %v349_v59 = vor.u32 %v347_v43, %v346_v51  ;;  %v350_v60 = vrot.slane %v346_v51, 4  ;;  %v357_v0 = vor.u32 %v355_v49, %v354_v57  ;;  %v358_v1 = vrot.slane %v354_v57, 4  ;;  %v2885_v20 = vld [vmem:[%s3477_s21 + $0x10] sm:$0xff]  }
  0x20   : > { %3104 = vmatpush3.bf16.msra.mxu0 %v3313_v23  ;;  %3009 = vmatprep.subr.bf16.mxu1 %v3314_v28  ;;  %v365_v21 = vor.u32 %v363_v6, %v362_v14  ;;  %v366_v22 = vrot.slane %v362_v14, 4  ;;  %v3560_v23 = vrot.slane %v520_v63, 4  ;;  %v373_v25 = vor.u32 %v371_v13, %v370_v15 }
  0x21   : > { %3105 = vmatprep.subr.bf16.mxu0 %v3315_v34  ;;  %v428_v3 = vsel %vm3537_vm6, %v349_v59, %v427_v46  ;;  %v434_v4 = vsel %vm3543_vm7, %v350_v60, %v433_v47  ;;  %v437_v7 = vsel %vm3537_vm6, %v357_v0, %v436_v53  ;;  %v440_v8 = vsel %vm3543_vm7, %v358_v1, %v439_v54 }
  0x22   : > { %429 = vst [vmem:[#allocation2 + $0x8] sm:$0xf] %v428_v3  ;;  %435 = vst [vmem:[#allocation2 + $0xc] sm:$0x1] %v434_v4  ;;  %v374_v26 = vrot.slane %v370_v15, 4  ;;  %v446_v29 = vsel %vm3543_vm7, %v366_v22, %v445_v10  ;;  %v2878_v30 = vunpack.c.l.bf16 %v2885_v20  ;;  %v2879_v31 = vunpack.c.h.bf16 %v2885_v20 }
  0x23   : > { %3010 = vmatpush3.bf16.msra.mxu1 %v3314_v28  ;;  %438 = vst [vmem:[#allocation2 + $0x10] sm:$0xf] %v437_v7  ;;  %441 = vst [vmem:[#allocation2 + $0x14] sm:$0x1] %v440_v8  ;;  %v443_v28 = vsel %vm3537_vm6, %v365_v21, %v442_v9  ;;  %v449_v33 = vsel %vm3537_vm6, %v373_v25, %v448_v16  ;;  %v526_v41 = vsel %vm3566_vm8, %v3560_v23, %v3562_v24 }
  0x24   : > { %3106 = vmatpush3.bf16.msra.mxu0 %v3315_v34  ;;  %3019 = vmatprep.subr.bf16.mxu1 %v3526_v40  ;;  %444 = vst [vmem:[#allocation2 + $0x18] sm:$0xf] %v443_v28  ;;  %447 = vst [vmem:[#allocation2 + $0x1c] sm:$0x1] %v446_v29  ;;  %v452_v34 = vsel %vm3543_vm7, %v374_v26, %v451_v19  ;;  %v265_v51 = vmul.f32 %v2878_v30, %v3485_v12  ;;  %v2883_v4 = vunpack.c.h.bf16 %v3580_v35 }
  0x25   : > { %3115 = vmatprep.subr.bf16.mxu0 %v3531_v44  ;;  %450 = vst [vmem:[#allocation2 + $0x20] sm:$0xf] %v449_v33  ;;  %453 = vst [vmem:[#allocation2 + $0x24] sm:$0x1] %v452_v34  ;;  %v266_v53 = vmul.f32 %v2879_v31, %v3485_v12 }
  0x29   : > { %v3582_v36 = vld [vmem:[#allocation2 + $0x8] sm:$0xf]  ;;  %v3584_v37 = vld [vmem:[#allocation2 + $0xc] sm:$0x1] }
  0x2a   : > { %v1291_v38 = vld [vmem:[#allocation2 + $0x8] sm:$0xf]  ;;  %v528_v42 = vshrl.u32 %v3582_v36, 16  ;;  %v531_v43 = vshll.u32 %v3582_v36, 16  ;;  %v537_v45 = vshll.u32 %v3584_v37, 16 }
  0x2b   : > { %v3593_v46 = vld [vmem:[#allocation2 + $0xc] sm:$0x1]  ;;  %v1293_v47 = vld [vmem:[#allocation2 + $0x10] sm:$0xf]  ;;  %v3595_v48 = vld [vmem:[#allocation2 + $0x14] sm:$0x1] }
  0x2c   : > { %v1308_v49 = vshrl.u32 %v1291_v38, 16  ;;  %v1311_v50 = vshll.u32 %v1291_v38, 16  ;;  %v530_v54 = vrot.slane %v528_v42, 4  ;;  %v533_v55 = vrot.slane %v531_v43, 5  ;;  %v3601_v63 = vld [vmem:[#allocation2 + $0x10] sm:$0xf] }
  0x2d   : > { %v1317_v57 = vshll.u32 %v3593_v46, 16  ;;  %v1322_v61 = vshrl.u32 %v1293_v47, 16  ;;  %v1325_v62 = vshll.u32 %v1293_v47, 16  ;;  %v539_v1 = vrot.slane %v537_v45, 5  ;;  %v3604_v3 = vld [vmem:[#allocation2 + $0x14] sm:$0x1] }
  0x2e   : > { %v1310_v59 = vrot.slane %v1308_v49, 4  ;;  %v1313_v60 = vrot.slane %v1311_v50, 5  ;;  %v534_v0 = vor.u32 %v533_v55, %v530_v54  ;;  %v1331_v2 = vshll.u32 %v3595_v48, 16  ;;  %v3607_v9 = vld [vmem:[#allocation2 + $0x18] sm:$0xf] }
  0x2f   : > { %v1319_v6 = vrot.slane %v1317_v57, 5  ;;  %v1324_v7 = vrot.slane %v1322_v61, 4  ;;  %v1327_v8 = vrot.slane %v1325_v62, 5  ;;  %v542_v13 = vshrl.u32 %v3601_v63, 16  ;;  %v3611_v19 = vld [vmem:[#allocation2 + $0x1c] sm:$0x1] }
  0x30   : > { %v1314_v5 = vor.u32 %v1313_v60, %v1310_v59  ;;  %v535_v10 = vrot.slane %v534_v0, 4  ;;  %v1333_v11 = vrot.slane %v1331_v2, 5  ;;  %v545_v14 = vshll.u32 %v3601_v63, 16  ;;  %v1295_v26 = vld [vmem:[#allocation2 + $0x18] sm:$0xf] }
  0x31   : > { %v1328_v16 = vor.u32 %v1327_v8, %v1324_v7  ;;  %v551_v20 = vshll.u32 %v3604_v3, 16  ;;  %v556_v21 = vshrl.u32 %v3607_v9, 16  ;;  %v544_v23 = vrot.slane %v542_v13, 4  ;;  %v3620_v33 = vld [vmem:[#allocation2 + $0x1c] sm:$0x1] }
  0x32   : > { %v1315_v15 = vrot.slane %v1314_v5, 4  ;;  %v540_v22 = vsel %vm3566_vm8, %v535_v10, %v539_v1  ;;  %v547_v24 = vrot.slane %v545_v14, 5  ;;  %v559_v25 = vshll.u32 %v3607_v9, 16  ;;  %v1297_v43 = vld [vmem:[#allocation2 + $0x20] sm:$0xf] }
  0x33   : > { %v2612_v28 = vcombine.low %v526_v41, %v540_v22  ;;  %v1329_v30 = vrot.slane %v1328_v16, 4  ;;  %v553_v31 = vrot.slane %v551_v20, 5  ;;  %v558_v35 = vrot.slane %v556_v21, 4  ;;  %v3625_v47 = vld [vmem:[#allocation2 + $0x24] sm:$0x1]  ;;  %v3318_v21 = vld [vmem:[%s4068_s3 + $0x8] sm:$0xff]  }
  0x34   : > { %v1320_v29 = vsel %vm3566_vm8, %v1315_v15, %v1319_v6  ;;  %v548_v34 = vor.u32 %v547_v24, %v544_v23  ;;  %v561_v38 = vrot.slane %v559_v25, 5  ;;  %v565_v42 = vshll.u32 %v3611_v19, 16  ;;  %v3642_v23 = vld [vmem:[#allocation2 + $0x20] sm:$0xf] }
  0x35   : > { %3011 = vmatprep.mubr.bf16.mxu1 %v2612_v28  ;;  %v1334_v45 = vsel %vm3566_vm8, %v1329_v30, %v1333_v11  ;;  %v1336_v41 = vshrl.u32 %v1295_v26, 16  ;;  %v279_v49 = vadd.f32 %v3494_v17, %v265_v51  ;;  %v280_v50 = vadd.f32 %v3494_v17, %v266_v53 }
  0x36   : > { %v2716_v54 = vcombine.low %v1320_v29, %v1334_v45  ;;  %v549_v55 = vrot.slane %v548_v34, 4  ;;  %v562_v57 = vor.u32 %v561_v38, %v558_v35  ;;  %v567_v59 = vrot.slane %v565_v42, 5 }
  0x37   : > { %v1338_v60 = vrot.slane %v1336_v41, 4  ;;  %v1339_v61 = vshll.u32 %v1295_v26, 16  ;;  %v1345_v62 = vshll.u32 %v3620_v33, 16  ;;  %v1350_v0 = vshrl.u32 %v1297_v43, 16 }
  0x38   : > { %3107 = vmatprep.mubr.bf16.mxu0 %v2716_v54  ;;  %v554_v1 = vsel %vm3566_vm8, %v549_v55, %v553_v31  ;;  %v563_v2 = vrot.slane %v562_v57, 4  ;;  %v1353_v5 = vshll.u32 %v1297_v43, 16  ;;  %v1359_v6 = vshll.u32 %v3625_v47, 16  ;;  %v3648_v31 = vld [vmem:[#allocation2 + $0x24] sm:$0x1]  ;;  %v3320_v43 = vld [vmem:[%s4068_s3 + $0x10] sm:$0xff]  }
  0x39   : > { %v941_v51 = vrot.slane %v3584_v37, 5  ;;  %v1341_v53 = vrot.slane %v1339_v61, 5  ;;  %v1352_v7 = vrot.slane %v1350_v0, 4  ;;  %v267_v8 = vmul.f32 %v2882_v58, %v3485_v12  ;;  %v457_v54 = vld [vmem:[#allocation2 + $0x2c] sm:$0x1] }
  0x3a   : > { %v1599_v10 = vrot.slane %v3593_v46, 5  ;;  %v568_v11 = vsel %vm3566_vm8, %v563_v2, %v567_v59  ;;  %v1355_v13 = vrot.slane %v1353_v5, 5  ;;  %v268_v14 = vmul.f32 %v2883_v4, %v3485_v12  ;;  %v463_v0 = vld [vmem:[#allocation2 + $0x34] sm:$0x1] }
  0x3b   : > { %v2613_v15 = vcombine.low %v554_v1, %v568_v11  ;;  %v1342_v16 = vor.u32 %v1341_v53, %v1338_v60  ;;  %v1347_v20 = vrot.slane %v1345_v62, 5  ;;  %v287_v22 = vmax.f32 %v279_v49, 0.0  ;;  %v3319_v60 = vld [vmem:[%s4068_s3 + $0x148] sm:$0xff]   ;;  %v460_v62 = vld [vmem:[#allocation2 + $0x30] sm:$0xf]  ;;  %v3322_v11 = vld [vmem:[%s4068_s3 + $0x18] sm:$0xff]  }
  0x3c   : > { %v1603_v58 = vrot.slane %v3595_v48, 5  ;;  %v1356_v24 = vor.u32 %v1355_v13, %v1352_v7  ;;  %v1361_v25 = vrot.slane %v1359_v6, 5  ;;  %v288_v26 = vmax.f32 %v280_v50, 0.0  ;;  %v454_v50 = vld [vmem:[#allocation2 + $0x28] sm:$0xf] }
  0x3d   : > { %3012 = vmatmul.mubr.bf16.vlgmr.msra.gmra.mrb[0].mxu1 %v2613_v15  ;;  %v945_v28 = vrot.slane %v3604_v3, 5  ;;  %v1343_v29 = vrot.slane %v1342_v16, 4  ;;  %v2864_v12 = vpack.c.bf16 %v287_v22, %v287_v22  ;;  %v281_v4 = vadd.f32 %v3494_v17, %v267_v8  ;;  %v3321_v8 = vld [vmem:[%s4068_s3 + $0x150] sm:$0xff]  }
  0x3e   : > { %3020 = vmatpush3.bf16.msra.mxu1 %v3526_v40  ;;  %v1357_v30 = vrot.slane %v1356_v24, 4  ;;  %v570_v34 = vshrl.u32 %v3642_v23, 16  ;;  %v573_v35 = vshll.u32 %v3642_v23, 16  ;;  %v2865_v38 = vpack.c.bf16 %v288_v26, %v288_v26 }
  0x3f   : > { %v1348_v42 = vsel %vm3566_vm8, %v1343_v29, %v1347_v20  ;;  %3021 = vmatprep.subr.bf16.mxu1 %v3318_v21  ;;  %v376_v45 = vshrl.u32 %v2864_v12, 16  ;;  %v379_v41 = vshll.u32 %v2864_v12, 16  ;;  %v289_v49 = vmax.f32 %v281_v4, 0.0 }
  0x40   : > { %v1362_v40 = vsel %vm3566_vm8, %v1357_v30, %v1361_v25  ;;  %v384_v55 = vshrl.u32 %v2865_v38, 16  ;;  %v387_v57 = vshll.u32 %v2865_v38, 16  ;;  %v282_v2 = vadd.f32 %v3494_v17, %v268_v14  ;;  %v3324_v25 = vld [vmem:[%s4068_s3 + $0x20] sm:$0xff]  }
  0x41   : > { %v2717_v59 = vcombine.low %v1348_v42, %v1362_v40  ;;  %v378_v61 = vrot.slane %v376_v45, 7  ;;  %v2866_v1 = vpack.c.bf16 %v289_v49, %v289_v49  ;;  %v572_v5 = vrot.slane %v570_v34, 4  ;;  %v469_v34 = vld [vmem:[#allocation2 + $0x3c] sm:$0x1] }
  0x42   : > { %3022 = vmatpush3.bf16.msra.mxu1 %v3318_v21  ;;  %v575_v6 = vrot.slane %v573_v35, 5  ;;  %v579_v53 = vshll.u32 %v3648_v31, 16  ;;  %v386_v7 = vrot.slane %v384_v55, 7  ;;  %v466_v21 = vld [vmem:[#allocation2 + $0x38] sm:$0xf]  ;;  %v290_v22 = vmax.f32 %v282_v2, 0.0 }
  0x43   : > { %3108 = vmatmul.mubr.bf16.vlgmr.msra.gmra.mrb[0].mxu0 %v2717_v59  ;;  %3023 = vmatprep.subr.bf16.mxu1 %v3320_v43  ;;  %v381_v13 = vor.u32 %v379_v41, %v378_v61  ;;  %v382_v15 = vrot.slane %v378_v61, 4  ;;  %v392_v16 = vshrl.u32 %v2866_v1, 16  ;;  %v395_v17 = vshll.u32 %v2866_v1, 16  ;;  %v3323_v42 = vld [vmem:[%s4068_s3 + $0x158] sm:$0xff]   ;;  %v3687_v41 = vld [vmem:[#allocation2 + $0x8] sm:$0xe] }
  0x44   : > { %3116 = vmatpush3.bf16.msra.mxu0 %v3531_v44  ;;  %v389_v14 = vor.u32 %v387_v57, %v386_v7  ;;  %v390_v20 = vrot.slane %v386_v7, 4  ;;  %v949_v24 = vrot.slane %v3611_v19, 5  ;;  %v576_v44 = vor.u32 %v575_v6, %v572_v5  ;;  %v3326_v55 = vld [vmem:[%s4068_s3 + $0x28] sm:$0xff]   ;;  %v3325_v1 = vld [vmem:[%s4068_s3 + $0x160] sm:$0xff]  }
  0x45   : > { %3117 = vmatprep.subr.bf16.mxu0 %v3319_v60  ;;  %v455_v26 = vsel %vm3537_vm6, %v381_v13, %v454_v50  ;;  %v458_v29 = vsel %vm3543_vm7, %v382_v15, %v457_v54  ;;  %v394_v12 = vrot.slane %v392_v16, 7  ;;  %v2867_v35 = vpack.c.bf16 %v290_v22, %v290_v22 }
  0x46   : > { %3024 = vmatpush3.bf16.msra.mxu1 %v3320_v43  ;;  %456 = vst [vmem:[#allocation2 + $0x28] sm:$0xf] %v455_v26  ;;  %459 = vst [vmem:[#allocation2 + $0x2c] sm:$0x1] %v458_v29  ;;  %v461_v4 = vsel %vm3537_vm6, %v389_v14, %v460_v62  ;;  %v464_v30 = vsel %vm3543_vm7, %v390_v20, %v463_v0  ;;  %v1607_v38 = vrot.slane %v3620_v33, 5  ;;  %v1611_v49 = vrot.slane %v3625_v47, 5 }
  0x47   : > { %3025 = vmatprep.subr.bf16.mxu1 %v3322_v11  ;;  %462 = vst [vmem:[#allocation2 + $0x30] sm:$0xf] %v461_v4  ;;  %465 = vst [vmem:[#allocation2 + $0x34] sm:$0x1] %v464_v30  ;;  %v397_v43 = vor.u32 %v395_v17, %v394_v12  ;;  %v398_v45 = vrot.slane %v394_v12, 4  ;;  %v3690_v40 = vrot.slane %v579_v53, 5 }
  0x48   : > { %3118 = vmatpush3.bf16.msra.mxu0 %v3319_v60  ;;  %v400_v50 = vshrl.u32 %v2867_v35, 16  ;;  %v403_v54 = vshll.u32 %v2867_v35, 16  ;;  %v3699_v61 = vrot.slane %v576_v44, 4  ;;  %v472_v62 = vld [vmem:[#allocation2 + $0x40] sm:$0xf]  ;;  %v2728_v6 = vrot.slane %v3687_v41, 9 }
  0x49   : > { %3119 = vmatprep.subr.bf16.mxu0 %v3321_v8  ;;  %v467_v57 = vsel %vm3537_vm6, %v397_v43, %v466_v21  ;;  %v470_v59 = vsel %vm3543_vm7, %v398_v45, %v469_v34  ;;  %v475_v0 = vld [vmem:[#allocation2 + $0x44] sm:$0x1]  ;;  %v3327_v35 = vld [vmem:[%s4068_s3 + $0x168] sm:$0xff]   ;;  %v910_v41 = vld [vmem:[#allocation2 + $0x10] sm:$0xe] }
  0x4a   : > { %3026 = vmatpush3.bf16.msra.mxu1 %v3322_v11  ;;  %468 = vst [vmem:[#allocation2 + $0x38] sm:$0xf] %v467_v57  ;;  %471 = vst [vmem:[#allocation2 + $0x3c] sm:$0x1] %v470_v59  ;;  %v402_v60 = vrot.slane %v400_v50, 7  ;;  %v3328_v11 = vld [vmem:[%s4068_s3 + $0x30] sm:$0xff]   ;;  %v582_v56 = vsel %vm3566_vm8, %v3699_v61, %v3690_v40 }
  0x4b   : > { %3027 = vmatprep.subr.bf16.mxu1 %v3324_v25  ;;  %v3330_v40 = vld [vmem:[%s4068_s3 + $0x38] sm:$0xff]   ;;  %v3338_v33 = vld [vmem:[%s4068_s3 + $0x90] sm:$0xff]  }
  0x4c   : > { %3120 = vmatpush3.bf16.msra.mxu0 %v3321_v8  ;;  %v405_v2 = vor.u32 %v403_v54, %v402_v60  ;;  %v406_v5 = vrot.slane %v402_v60, 4 }
  0x4d   : > { %3121 = vmatprep.subr.bf16.mxu0 %v3323_v42  ;;  %v3705_v53 = vld [vmem:[#allocation2 + $0x28] sm:$0xf]  ;;  %v3707_v7 = vld [vmem:[#allocation2 + $0x2c] sm:$0x1] }
  0x4e   : > { %v1299_v13 = vld [vmem:[#allocation2 + $0x28] sm:$0xf]  ;;  %3028 = vmatpush3.bf16.msra.mxu1 %v3324_v25  ;;  %v584_v15 = vshrl.u32 %v3705_v53, 16  ;;  %v587_v16 = vshll.u32 %v3705_v53, 16  ;;  %v593_v8 = vshll.u32 %v3707_v7, 16  ;;  %v473_v29 = vsel %vm3537_vm6, %v405_v2, %v472_v62 }
  0x4f   : > { %v3715_v17 = vld [vmem:[#allocation2 + $0x2c] sm:$0x1]  ;;  %v1364_v14 = vshrl.u32 %v1299_v13, 16  ;;  %3029 = vmatprep.subr.bf16.mxu1 %v3326_v55  ;;  %v1301_v20 = vld [vmem:[#allocation2 + $0x30] sm:$0xf]  ;;  %v1367_v22 = vshll.u32 %v1299_v13, 16  ;;  %v476_v25 = vsel %vm3543_vm7, %v406_v5, %v475_v0 }
  0x50   : > { %v3717_v21 = vld [vmem:[#allocation2 + $0x34] sm:$0x1]  ;;  %v1373_v26 = vshll.u32 %v3715_v17, 16  ;;  %3122 = vmatpush3.bf16.msra.mxu0 %v3323_v42  ;;  %v586_v12 = vrot.slane %v584_v15, 4  ;;  %v589_v44 = vrot.slane %v587_v16, 5  ;;  %v595_v4 = vrot.slane %v593_v8, 5 }
  0x51   : > { %v1366_v30 = vrot.slane %v1364_v14, 4  ;;  %v3724_v34 = vld [vmem:[#allocation2 + $0x30] sm:$0xf]  ;;  %474 = vst [vmem:[#allocation2 + $0x40] sm:$0xf] %v473_v29  ;;  %3123 = vmatprep.subr.bf16.mxu0 %v3325_v1  ;;  %v1369_v43 = vrot.slane %v1367_v22, 5 }
  0x52   : > { %477 = vst [vmem:[#allocation2 + $0x44] sm:$0x1] %v476_v25  ;;  %v1375_v52 = vrot.slane %v1373_v26, 5  ;;  %v1378_v45 = vshrl.u32 %v1301_v20, 16  ;;  %v1381_v50 = vshll.u32 %v1301_v20, 16  ;;  %3030 = vmatpush3.bf16.msra.mxu1 %v3326_v55  ;;  %v590_v42 = vor.u32 %v589_v44, %v586_v12  ;;  %v3329_v20 = vld [vmem:[%s4068_s3 + $0x170] sm:$0xff]  }
  0x53   : > { %v1387_v54 = vshll.u32 %v3717_v21, 16  ;;  %v3734_v57 = vld [vmem:[#allocation2 + $0x38] sm:$0xf]  ;;  %v3736_v59 = vld [vmem:[#allocation2 + $0x34] sm:$0x1]  ;;  %v598_v60 = vshrl.u32 %v3724_v34, 16  ;;  %3031 = vmatprep.subr.bf16.mxu1 %v3328_v11  ;;  %v1370_v62 = vor.u32 %v1369_v43, %v1366_v30 }
  0x54   : > { %v1380_v0 = vrot.slane %v1378_v45, 4  ;;  %v1383_v55 = vrot.slane %v1381_v50, 5  ;;  %v3739_v2 = vld [vmem:[#allocation2 + $0x3c] sm:$0x1]  ;;  %v601_v5 = vshll.u32 %v3724_v34, 16  ;;  %3124 = vmatpush3.bf16.msra.mxu0 %v3325_v1  ;;  %v591_v61 = vrot.slane %v590_v42, 4 }
  0x55   : > { %v1389_v13 = vrot.slane %v1387_v54, 5  ;;  %v600_v15 = vrot.slane %v598_v60, 4  ;;  %v607_v16 = vshll.u32 %v3736_v59, 16  ;;  %3125 = vmatprep.subr.bf16.mxu0 %v3327_v35  ;;  %v1371_v8 = vrot.slane %v1370_v62, 4  ;;  %v1303_v29 = vld [vmem:[#allocation2 + $0x38] sm:$0xf] }
  0x56   : > { %v1384_v14 = vor.u32 %v1383_v55, %v1380_v0  ;;  %v603_v22 = vrot.slane %v601_v5, 5  ;;  %v612_v26 = vshrl.u32 %v3734_v57, 16  ;;  %v596_v25 = vsel %vm3566_vm8, %v591_v61, %v595_v4  ;;  %3032 = vmatpush3.bf16.msra.mxu1 %v3328_v11  ;;  %v3754_v30 = vld [vmem:[#allocation2 + $0x3c] sm:$0x1]  ;;  %v3761_v4 = vld [vmem:[%s4068_s3 + $0x80] sm:$0xff]  }
  0x57   : > { %v609_v1 = vrot.slane %v607_v16, 5  ;;  %v615_v12 = vshll.u32 %v3734_v57, 16  ;;  %v621_v44 = vshll.u32 %v3739_v2, 16  ;;  %v2614_v43 = vcombine.low %v582_v56, %v596_v25  ;;  %3033 = vmatprep.subr.bf16.mxu1 %v3330_v40  ;;  %v1574_v60 = vld [vmem:[#allocation2 + $0x10] sm:$0xe] }
  0x58   : > { %v1376_v45 = vsel %vm3566_vm8, %v1371_v8, %v1375_v52  ;;  %v1385_v50 = vrot.slane %v1384_v14, 4  ;;  %v604_v42 = vor.u32 %v603_v22, %v600_v15  ;;  %v1305_v54 = vld [vmem:[#allocation2 + $0x40] sm:$0xf]  ;;  %3126 = vmatpush3.bf16.msra.mxu0 %v3327_v35  ;;  %v614_v62 = vrot.slane %v612_v26, 4  ;;  %v3763_v5 = vld [vmem:[#allocation2 + $0x18] sm:$0xe] }
  0x59   : > { %v617_v0 = vrot.slane %v615_v12, 5  ;;  %v623_v11 = vrot.slane %v621_v44, 5  ;;  %v1392_v55 = vshrl.u32 %v1303_v29, 16  ;;  %3015 = vmatprep.mubr.bf16.mxu1 %v2614_v43  ;;  %3127 = vmatprep.subr.bf16.mxu0 %v3329_v20  ;;  %v3767_v61 = vld [vmem:[#allocation2 + $0x44] sm:$0x1]  ;;  %v1395_v15 = vshll.u32 %v1303_v29, 16 }
  0x5a   : > { %v1390_v52 = vsel %vm3566_vm8, %v1385_v50, %v1389_v13  ;;  %v605_v56 = vrot.slane %v604_v42, 4  ;;  %v1401_v16 = vshll.u32 %v3754_v30, 16  ;;  %v3331_v35 = vld [vmem:[%s4068_s3 + $0x178] sm:$0xff]   ;;  %v1406_v26 = vshrl.u32 %v1305_v54, 16  ;;  %3034 = vmatpush3.bf16.msra.mxu1 %v3330_v40  ;;  %v1576_v44 = vld [vmem:[#allocation2 + $0x20] sm:$0xe] }
  0x5b   : > { %v2718_v8 = vcombine.low %v1376_v45, %v1390_v52  ;;  %v618_v14 = vor.u32 %v617_v0, %v614_v62  ;;  %v1394_v22 = vrot.slane %v1392_v55, 4  ;;  %v1397_v25 = vrot.slane %v1395_v15, 5  ;;  %3043 = vmatprep.subr.bf16.mxu1 %v3761_v4  ;;  %v3781_v40 = vld [vmem:[%s4068_s3 + $0x180] sm:$0xff]   ;;  %v3793_v52 = vld [vmem:[#allocation2 + $0x38] sm:$0xe] }
  0x5c   : > { %v1409_v12 = vshll.u32 %v1305_v54, 16  ;;  %v2729_v13 = vrot.slane %v1574_v60, 9  ;;  %v2730_v43 = vrot.slane %v3763_v5, 9  ;;  %v610_v29 = vsel %vm3566_vm8, %v605_v56, %v609_v1  ;;  %3128 = vmatpush3.bf16.msra.mxu0 %v3329_v20  ;;  %v1577_v54 = vld [vmem:[#allocation2 + $0x28] sm:$0xe] }
  0x5d   : > { %3111 = vmatprep.mubr.bf16.mxu0 %v2718_v8  ;;  %v619_v50 = vrot.slane %v618_v14, 4  ;;  %v1408_v42 = vrot.slane %v1406_v26, 4  ;;  %v1415_v45 = vshll.u32 %v3767_v61, 16  ;;  %v1398_v62 = vor.u32 %v1397_v25, %v1394_v22  ;;  %3129 = vmatprep.subr.bf16.mxu0 %v3331_v35  ;;  %v1578_v1 = vld [vmem:[#allocation2 + $0x30] sm:$0xe] }
  0x5e   : > { %v1403_v60 = vrot.slane %v1401_v16, 5  ;;  %v1411_v0 = vrot.slane %v1409_v12, 5  ;;  %v2624_v5 = vcombine.low %v3496_v18, %v3582_v36  ;;  %v908_v14 = vld [vmem:[#allocation2] sm:$0xe]  ;;  %v1600_v22 = vsel %vm3785_vm11, %v2728_v6, %v1599_v10  ;;  %v909_v26 = vld [vmem:[#allocation2 + $0x8] sm:$0xe] }
  0x5f   : > { %v624_v20 = vsel %vm3566_vm8, %v619_v50, %v623_v11  ;;  %v1399_v15 = vrot.slane %v1398_v62, 4  ;;  %v1417_v8 = vrot.slane %v1415_v45, 5  ;;  %v1604_v18 = vsel %vm3785_vm11, %v2729_v13, %v1603_v58  ;;  %v911_v58 = vld [vmem:[#allocation2 + $0x18] sm:$0xe] }
  0x60   : > { %v2615_v56 = vcombine.low %v610_v29, %v624_v20  ;;  %v1412_v16 = vor.u32 %v1411_v0, %v1408_v42  ;;  %3130 = vmatpush3.bf16.msra.mxu0 %v3331_v35  ;;  %v2731_v36 = vrot.slane %v1576_v44, 9  ;;  %v2732_v11 = vrot.slane %v1577_v54, 9  ;;  %v3344_v20 = vld [vmem:[%s4068_s3 + $0xa8] sm:$0xff]  }
  0x61   : > { %v1404_v25 = vsel %vm3566_vm8, %v1399_v15, %v1403_v60  ;;  %3139 = vmatprep.subr.bf16.mxu0 %v3781_v40  ;;  %v1615_v46 = vrot.slane %v3715_v17, 5  ;;  %v2733_v10 = vrot.slane %v1578_v1, 9  ;;  %v1619_v48 = vrot.slane %v3717_v21, 5  ;;  %v3336_v21 = vld [vmem:[%s4068_s3 + $0x88] sm:$0xff]   ;;  %v3353_v1 = vld [vmem:[#allocation2 + $0x10] ss:$8 sps:$4 sm:$0xff]  }
  0x62   : > { %3016 = vmatmul.mubr.bf16.gmra.mrb[4].mxu1 %v2615_v56  ;;  %v1413_v35 = vrot.slane %v1412_v16, 4  ;;  %v2734_v6 = vrot.slane %v3793_v52, 9  ;;  %v2638_v12 = vrot.slane %v910_v41, 9  ;;  %v2752_v44 = vcombine.low %v1600_v22, %v1604_v18  ;;  %v3345_v52 = vld [vmem:[%s4068_s3 + $0x1a8] sm:$0xff]   ;;  %v3347_v56 = vld [vmem:[%s4068_s3 + $0xb0] sm:$0xff]   ;;  %v3350_v22 = vld [vmem:[%s4068_s3 + $0xb8] sm:$0xff]  }
  0x63   : > { %3035 = vmatprep.mubr.bf16.mxu1 %v2624_v5  ;;  %v1623_v29 = vrot.slane %v3754_v30, 5  ;;  %v2639_v50 = vrot.slane %v911_v58, 9  ;;  %v2636_v45 = vrot.slane %v908_v14, 9  ;;  %v2637_v54 = vrot.slane %v909_v26, 9  ;;  %v3343_v5 = vld [vmem:[%s4068_s3 + $0x1a0] sm:$0xff]  }
  0x64   : > { %v1418_v13 = vsel %vm3566_vm8, %v1413_v35, %v1417_v8  ;;  %v2625_v17 = vcombine.low %v3601_v63, %v3607_v9  ;;  %v3823_v62 = vsel %vm3785_vm11, %v2638_v12, %v945_v28  ;;  %v2626_v63 = vcombine.low %v3642_v23, %v3705_v53  ;;  %v1580_v9 = vld [vmem:[#allocation2 + $0x40] sm:$0xe]  ;;  %v913_v16 = vld [vmem:[#allocation2 + $0x28] sm:$0xe]  ;;  %v1954_v8 = vld [vmem:[#allocation2 + $0x10] sm:$0xf] }
  0x65   : > { %v2719_v42 = vcombine.low %v1404_v25, %v1418_v13  ;;  %v3829_v30 = vsel %vm3785_vm11, %v2639_v50, %v949_v24  ;;  %v1608_v3 = vsel %vm3785_vm11, %v2730_v43, %v1607_v38  ;;  %v1612_v19 = vsel %vm3785_vm11, %v2731_v36, %v1611_v49  ;;  %v912_v15 = vld [vmem:[#allocation2 + $0x20] sm:$0xe]  ;;  %v1956_v14 = vld [vmem:[#allocation2 + $0x18] sm:$0xf]  ;;  %v3348_v25 = vld [vmem:[%s4068_s3 + $0x1b0] sm:$0xff]  }
  0x66   : > { %v2661_v60 = vcombine.low %v3823_v62, %v3829_v30  ;;  %v1616_v28 = vsel %vm3785_vm11, %v2732_v11, %v1615_v46  ;;  %v1620_v23 = vsel %vm3785_vm11, %v2733_v10, %v1619_v48  ;;  %v2753_v24 = vcombine.low %v1608_v3, %v1612_v19  ;;  %v914_v35 = vld [vmem:[#allocation2 + $0x30] sm:$0xe]  ;;  %v915_v46 = vld [vmem:[#allocation2 + $0x38] sm:$0xe]  ;;  %v3356_v3 = vld [vmem:[%s4068_s3 + $0xc8] sm:$0xff]  }
  0x67   : > { %3112 = vmatmul.mubr.bf16.gmra.mrb[4].mxu0 %v2719_v42  ;;  %v2735_v47 = vrot.slane %v1580_v9, 9  ;;  %v1627_v38 = vrot.slane %v3767_v61, 5  ;;  %v938_v49 = vsel %vm3785_vm11, %v2636_v45, %v937_v32  ;;  %v942_v53 = vsel %vm3785_vm11, %v2637_v54, %v941_v51  ;;  %v3339_v51 = vld [vmem:[%s4068_s3 + $0x190] sm:$0xff]   ;;  %v3351_v12 = vld [vmem:[%s4068_s3 + $0x1b8] sm:$0xff]  }
  0x68   : > { %3131 = vmatprep.mubr.bf16.mxu0 %v2752_v44  ;;  %v2754_v43 = vcombine.low %v1616_v28, %v1620_v23  ;;  %v2627_v0 = vcombine.low %v3724_v34, %v3734_v57  ;;  %v2660_v61 = vcombine.low %v938_v49, %v942_v53  ;;  %v1624_v32 = vsel %vm3785_vm11, %v2734_v6, %v1623_v29  ;;  %v3342_v57 = vld [vmem:[%s4068_s3 + $0xa0] sm:$0xff]   ;;  %v3916_v9 = vld [vmem:[#allocation2 + $0x1c] sm:$0x1]  ;;  %v3358_v49 = vld [vmem:[%s4068_s3 + $0xd0] sm:$0xff]  }
  0x69   : > { %v1628_v37 = vsel %vm3785_vm11, %v2735_v47, %v1627_v38  ;;  %v2640_v18 = vrot.slane %v912_v15, 9  ;;  %v953_v36 = vrot.slane %v3648_v31, 5  ;;  %v2641_v11 = vrot.slane %v913_v16, 9  ;;  %v3352_v31 = vld [vmem:[%s4068_s3 + $0xc0] sm:$0xff]   ;;  %v3357_v38 = vld [vmem:[%s4068_s3 + $0x1c8] sm:$0xff]  }
  0x6a   : > { %3036 = vmatmul.mubr.bf16.vlgmr.msra.gmra.mrb[0].mxu1 %v2625_v17  ;;  %v2755_v34 = vcombine.low %v1624_v32, %v1628_v37  ;;  %v957_v26 = vrot.slane %v3707_v7, 5  ;;  %v1971_v41 = vshrl.u32 %v1954_v8, 16  ;;  %v1974_v10 = vshll.u32 %v1954_v8, 16  ;;  %v3366_v62 = vld [vmem:[#allocation2 + $0x30] ss:$8 sps:$4 sm:$0xff]  }
  0x6b   : > { %3044 = vmatpush3.bf16.msra.mxu1 %v3761_v4  ;;  %3039 = vmatprep.mubr.bf16.mxu1 %v2626_v63  ;;  %v3337_v4 = vld [vmem:[%s4068_s3 + $0x188] sm:$0xff]   ;;  %v1985_v48 = vshrl.u32 %v1956_v14, 16  ;;  %v1988_v6 = vshll.u32 %v1956_v14, 16  ;;  %v954_v7 = vsel %vm3785_vm11, %v2640_v18, %v953_v36  ;;  %v2642_v13 = vrot.slane %v914_v35, 9  ;;  %v3914_v63 = vld [vmem:[#allocation2 + $0x14] sm:$0x1] }
  0x6c   : > { %3045 = vmatprep.subr.bf16.mxu1 %v3336_v21  ;;  %v958_v58 = vsel %vm3785_vm11, %v2641_v11, %v957_v26  ;;  %v961_v44 = vrot.slane %v3736_v59, 5  ;;  %v2643_v29 = vrot.slane %v915_v46, 9  ;;  %v965_v50 = vrot.slane %v3739_v2, 5  ;;  %v3354_v59 = vld [vmem:[%s4068_s3 + $0x1c0] sm:$0xff]   ;;  %v3364_v26 = vld [vmem:[%s4068_s3 + $0xe8] sm:$0xff]  }
  0x6d   : > { %v1973_v42 = vrot.slane %v1971_v41, 4  ;;  %v1976_v45 = vrot.slane %v1974_v10, 5  ;;  %v1987_v54 = vrot.slane %v1985_v48, 4  ;;  %v1990_v17 = vrot.slane %v1988_v6, 5  ;;  %v3355_v2 = vld [vmem:[#allocation2 + $0x20] ss:$8 sps:$4 sm:$0xff]  }
  0x6e   : > { %v962_v19 = vsel %vm3785_vm11, %v2642_v13, %v961_v44  ;;  %v966_v28 = vsel %vm3785_vm11, %v2643_v29, %v965_v50  ;;  %v1994_v47 = vshll.u32 %v3916_v9, 16  ;;  %v1958_v32 = vld [vmem:[#allocation2 + $0x20] sm:$0xf]  ;;  %v3963_v48 = vld [vmem:[#allocation2 + $0x2c] sm:$0x1]  ;;  %v3367_v44 = vld [vmem:[%s4068_s3 + $0xf0] sm:$0xff]  }
  0x6f   : > { %3132 = vmatmul.mubr.bf16.vlgmr.msra.gmra.mrb[0].mxu0 %v2753_v24  ;;  %3046 = vmatpush3.bf16.msra.mxu1 %v3336_v21  ;;  %v2662_v21 = vcombine.low %v954_v7, %v958_v58  ;;  %v1977_v23 = vor.u32 %v1976_v45, %v1973_v42  ;;  %v1980_v24 = vshll.u32 %v3914_v63, 16  ;;  %v2663_v30 = vcombine.low %v962_v19, %v966_v28  ;;  %v3363_v11 = vld [vmem:[%s4068_s3 + $0x1e0] sm:$0xff]   ;;  %v3967_v13 = vld [vmem:[#allocation2 + $0x3c] sm:$0x1]  ;;  %v1968_v50 = vld [vmem:[#allocation2 + $0x48] sm:$0xf] }
  0x70   : > { %3140 = vmatpush3.bf16.msra.mxu0 %v3781_v40  ;;  %3047 = vmatprep.subr.bf16.mxu1 %v3338_v33  ;;  %v3341_v40 = vld [vmem:[%s4068_s3 + $0x198] sm:$0xff]   ;;  %v2002_v15 = vshll.u32 %v1958_v32, 16  ;;  %v1966_v29 = vld [vmem:[#allocation2 + $0x40] sm:$0xf]  ;;  %v3365_v42 = vld [vmem:[%s4068_s3 + $0x1e8] sm:$0xff]   ;;  %v2050_v19 = vshll.u32 %v3967_v13, 16 }
  0x71   : > { %3141 = vmatprep.subr.bf16.mxu0 %v3337_v4  ;;  %3135 = vmatprep.mubr.bf16.mxu0 %v2754_v43  ;;  %v1982_v53 = vrot.slane %v1980_v24, 5  ;;  %v1996_v43 = vrot.slane %v1994_v47, 5  ;;  %v2055_v28 = vshrl.u32 %v1966_v29, 16  ;;  %v2069_v24 = vshrl.u32 %v1968_v50, 16  ;;  %v3370_v47 = vld [vmem:[%s4068_s3 + $0xf8] sm:$0xff]  }
  0x72   : > { %3040 = vmatmul.mubr.bf16.gmra.mrb[4].mxu1 %v2627_v0  ;;  %v3372_v0 = vld [vmem:[#allocation2 + $0x8] ss:$8 sps:$4 sm:$0xff]   ;;  %v2004_v46 = vrot.slane %v2002_v15, 5 }
  0x73   : > { %3048 = vmatpush3.bf16.msra.mxu1 %v3338_v33  ;;  %3059 = vmatprep.mubr.bf16.mxu1 %v2660_v61  ;;  %v1991_v33 = vor.u32 %v1990_v17, %v1987_v54  ;;  %v3360_v61 = vld [vmem:[%s4068_s3 + $0xd8] sm:$0xff]  }
  0x74   : > { %3142 = vmatpush3.bf16.msra.mxu0 %v3337_v4  ;;  %3049 = vmatprep.subr.bf16.mxu1 %v3340_v39 }
  0x75   : > { %3143 = vmatprep.subr.bf16.mxu0 %v3339_v51  ;;  %v1992_v4 = vrot.slane %v1991_v33, 4  ;;  %v2072_v33 = vshll.u32 %v1968_v50, 16 }
  0x77   : > { %3050 = vmatpush3.bf16.msra.mxu1 %v3340_v39  ;;  %3136 = vmatmul.mubr.bf16.gmra.mrb[4].mxu0 %v2755_v34  ;;  %v3359_v39 = vld [vmem:[%s4068_s3 + $0x1d0] sm:$0xff]   ;;  %v1960_v34 = vld [vmem:[#allocation2 + $0x28] sm:$0xf] }
  0x78   : > { %3144 = vmatpush3.bf16.msra.mxu0 %v3339_v51  ;;  %3051 = vmatprep.subr.bf16.mxu1 %v3342_v57  ;;  %v1997_v51 = vsel %vm3566_vm8, %v1992_v4, %v1996_v43  ;;  %v2013_v16 = vshrl.u32 %v1960_v34, 16  ;;  %v2016_v8 = vshll.u32 %v1960_v34, 16  ;;  %v2074_v34 = vrot.slane %v2072_v33, 5  ;;  %v3381_v33 = vld [vmem:[%s4068_s3 + $0x228] sm:$0xff]  }
  0x79   : > { %3145 = vmatprep.subr.bf16.mxu0 %v3341_v40  ;;  %3155 = vmatprep.mubr.bf16.mxu0 %v3353_v1  ;;  %v1964_v1 = vld [vmem:[#allocation2 + $0x38] sm:$0xf] }
  0x7a   : > { %v2041_v18 = vshrl.u32 %v1964_v1, 16  ;;  %v2044_v36 = vshll.u32 %v1964_v1, 16  ;;  %v2015_v41 = vrot.slane %v2013_v16, 4  ;;  %v2018_v10 = vrot.slane %v2016_v8, 5  ;;  %v2240_v1 = vld [vmem:[#allocation2 + $0x30] sm:$0xe] }
  0x7b   : > { %3052 = vmatpush3.bf16.msra.mxu1 %v3342_v57  ;;  %v3368_v57 = vld [vmem:[#allocation2 + $0x40] ss:$8 sps:$4 sm:$0xff]  }
  0x7c   : > { %3146 = vmatpush3.bf16.msra.mxu0 %v3341_v40  ;;  %3053 = vmatprep.subr.bf16.mxu1 %v3344_v20  ;;  %v1962_v40 = vld [vmem:[#allocation2 + $0x30] sm:$0xf]  ;;  %v2043_v7 = vrot.slane %v2041_v18, 4  ;;  %v2046_v58 = vrot.slane %v2044_v36, 5  ;;  %v2019_v17 = vor.u32 %v2018_v10, %v2015_v41  ;;  %v2282_v41 = vrot.slane %v3967_v13, 5 }
  0x7d   : > { %3147 = vmatprep.subr.bf16.mxu0 %v3343_v5  ;;  %v2027_v14 = vshrl.u32 %v1962_v40, 16  ;;  %v3376_v8 = vld [vmem:[#allocation2 + $0x28] ss:$8 sps:$4 sm:$0xff]  }
  0x7f   : > { %3054 = vmatpush3.bf16.msra.mxu1 %v3344_v20  ;;  %v3362_v20 = vld [vmem:[%s4068_s3 + $0xe0] sm:$0xff]   ;;  %v2029_v6 = vrot.slane %v2027_v14, 4 }
  0x80   : > { %3148 = vmatpush3.bf16.msra.mxu0 %v3343_v5  ;;  %3055 = vmatprep.subr.bf16.mxu1 %v3347_v56  ;;  %v1999_v5 = vshrl.u32 %v1958_v32, 16  ;;  %v2057_v32 = vrot.slane %v2055_v28, 4  ;;  %v3379_v28 = vld [vmem:[%s4068_s3 + $0x218] sm:$0xff]  }
  0x81   : > { %3149 = vmatprep.subr.bf16.mxu0 %v3345_v52 }
  0x82   : > { %v2001_v35 = vrot.slane %v1999_v5, 4  ;;  %v3373_v5 = vld [vmem:[#allocation2 + $0x18] ss:$8 sps:$4 sm:$0xff]  }
  0x83   : > { %3056 = vmatpush3.bf16.msra.mxu1 %v3347_v56 }
  0x84   : > { %3150 = vmatpush3.bf16.msra.mxu0 %v3345_v52  ;;  %3057 = vmatprep.subr.bf16.mxu1 %v3350_v22  ;;  %v3361_v52 = vld [vmem:[%s4068_s3 + $0x1d8] sm:$0xff]   ;;  %v2005_v45 = vor.u32 %v2004_v46, %v2001_v35 }
  0x85   : > { %3151 = vmatprep.subr.bf16.mxu0 %v3348_v25 }
  0x87   : > { %3058 = vmatpush3.bf16.msra.mxu1 %v3350_v22  ;;  %v2030_v22 = vshll.u32 %v1962_v40, 16  ;;  %v3371_v40 = vld [vmem:[%s4068_s3 + $0x1f8] sm:$0xff]  }
  0x88   : > { %3152 = vmatpush3.bf16.msra.mxu0 %v3348_v25  ;;  %3067 = vmatprep.subr.bf16.mxu1 %v3352_v31  ;;  %v3961_v25 = vld [vmem:[#allocation2 + $0x24] sm:$0x1] }
  0x89   : > { %3153 = vmatprep.subr.bf16.mxu0 %v3351_v12  ;;  %v2008_v54 = vshll.u32 %v3961_v25, 16 }
  0x8a   : > { %3060 = vmatmul.mubr.bf16.vlgmr.msra.gmra.mrb[0].mxu1 %v2661_v60  ;;  %v1978_v60 = vrot.slane %v1977_v23, 4  ;;  %v2058_v23 = vshll.u32 %v1966_v29, 16 }
  0x8b   : > { %3068 = vmatpush3.bf16.msra.mxu1 %v3352_v31  ;;  %3063 = vmatprep.mubr.bf16.mxu1 %v2662_v21  ;;  %v2032_v31 = vrot.slane %v2030_v22, 5  ;;  %v2022_v21 = vshll.u32 %v3963_v48, 16 }
  0x8c   : > { %3154 = vmatpush3.bf16.msra.mxu0 %v3351_v12  ;;  %3069 = vmatprep.subr.bf16.mxu1 %v3356_v3  ;;  %v1983_v37 = vsel %vm3566_vm8, %v1978_v60, %v1982_v53  ;;  %v3965_v12 = vld [vmem:[#allocation2 + $0x34] sm:$0x1] }
  0x8d   : > { %3163 = vmatprep.subr.bf16.mxu0 %v3354_v59  ;;  %v2808_v56 = vcombine.low %v1983_v37, %v1997_v51  ;;  %v2024_v60 = vrot.slane %v2022_v21, 5  ;;  %v2060_v37 = vrot.slane %v2058_v23, 5  ;;  %v2071_v51 = vrot.slane %v2069_v24, 4 }
  0x8e   : > { %v2278_v35 = vrot.slane %v3965_v12, 5 }
  0x8f   : > { %3156 = vmatmul.mubr.bf16.vlgmr.msra.gmra.mrb[0].mxu0 %v3355_v2  ;;  %3070 = vmatpush3.bf16.msra.mxu1 %v3356_v3  ;;  %v2033_v3 = vor.u32 %v2032_v31, %v2029_v6  ;;  %v2047_v2 = vor.u32 %v2046_v58, %v2043_v7  ;;  %v2061_v18 = vor.u32 %v2060_v37, %v2057_v32  ;;  %v2236_v58 = vld [vmem:[#allocation2 + $0x10] sm:$0xe]  ;;  %v2270_v37 = vrot.slane %v3961_v25, 5 }
  0x90   : > { %3164 = vmatpush3.bf16.msra.mxu0 %v3354_v59  ;;  %3071 = vmatprep.subr.bf16.mxu1 %v3358_v49  ;;  %v2036_v59 = vshll.u32 %v3965_v12, 16  ;;  %v2075_v36 = vor.u32 %v2074_v34, %v2071_v51  ;;  %v2274_v34 = vrot.slane %v3963_v48, 5 }
  0x91   : > { %3165 = vmatprep.subr.bf16.mxu0 %v3357_v38  ;;  %3159 = vmatprep.mubr.bf16.mxu0 %v3366_v62  ;;  %v2010_v62 = vrot.slane %v2008_v54, 5  ;;  %v2034_v53 = vrot.slane %v2033_v3, 4  ;;  %v2048_v43 = vrot.slane %v2047_v2, 4  ;;  %v2062_v29 = vrot.slane %v2061_v18, 4 }
  0x92   : > { %3064 = vmatmul.mubr.bf16.gmra.mrb[4].mxu1 %v2663_v30  ;;  %v2020_v30 = vrot.slane %v2019_v17, 4  ;;  %v2038_v4 = vrot.slane %v2036_v59, 5  ;;  %v2076_v50 = vrot.slane %v2075_v36, 4  ;;  %v2820_v54 = vrot.slane %v2236_v58, 9 }
  0x93   : > { %3072 = vmatpush3.bf16.msra.mxu1 %v3358_v49  ;;  %3083 = vmatprep.mubr.bf16.mxu1 %v3372_v0  ;;  %v2006_v49 = vrot.slane %v2005_v45, 4  ;;  %v2052_v0 = vrot.slane %v2050_v19, 5  ;;  %v3377_v45 = vld [vmem:[#allocation2 + $0x38] ss:$8 sps:$4 sm:$0xff]   ;;  %v2262_v17 = vrot.slane %v3914_v63, 5  ;;  %v2266_v3 = vrot.slane %v3916_v9, 5 }
  0x94   : > { %3166 = vmatpush3.bf16.msra.mxu0 %v3357_v38  ;;  %3073 = vmatprep.subr.bf16.mxu1 %v3360_v61  ;;  %v3369_v38 = vld [vmem:[%s4068_s3 + $0x1f0] sm:$0xff]   ;;  %v2039_v14 = vsel %vm3566_vm8, %v2034_v53, %v2038_v4  ;;  %v3383_v4 = vld [vmem:[%s4068_s3 + $0x238] sm:$0xff]  }
  0x95   : > { %3167 = vmatprep.subr.bf16.mxu0 %v3359_v39  ;;  %v2053_v22 = vsel %vm3566_vm8, %v2048_v43, %v2052_v0  ;;  %v2263_v63 = vsel %vm3785_vm11, %v2820_v54, %v2262_v17  ;;  %v2238_v43 = vld [vmem:[#allocation2 + $0x20] sm:$0xe]  ;;  %v2239_v0 = vld [vmem:[#allocation2 + $0x28] sm:$0xe] }
  0x96   : > { %v2810_v6 = vcombine.low %v2039_v14, %v2053_v22  ;;  %v2823_v51 = vrot.slane %v2239_v0, 9 }
  0x97   : > { %3074 = vmatpush3.bf16.msra.mxu1 %v3360_v61  ;;  %3160 = vmatmul.mubr.bf16.gmra.mrb[4].mxu0 %v3368_v57  ;;  %v3985_v61 = vld [vmem:[#allocation2 + $0x44] sm:$0x1] }
  0x98   : > { %3168 = vmatpush3.bf16.msra.mxu0 %v3359_v39  ;;  %3075 = vmatprep.subr.bf16.mxu1 %v3362_v20  ;;  %v3987_v39 = vld [vmem:[#allocation2 + $0x4c] sm:$0x1]  ;;  %v3374_v57 = vld [vmem:[%s4068_s3 + $0x200] sm:$0xff]   ;;  %v2064_v15 = vshll.u32 %v3985_v61, 16 }
  0x99   : > { %3169 = vmatprep.subr.bf16.mxu0 %v3361_v52  ;;  %3179 = vmatprep.mubr.bf16.mxu0 %v2808_v56  ;;  %v2025_v56 = vsel %vm3566_vm8, %v2020_v30, %v2024_v60  ;;  %v2078_v16 = vshll.u32 %v3987_v39, 16  ;;  %v2290_v30 = vrot.slane %v3987_v39, 5  ;;  %v2822_v39 = vrot.slane %v2238_v43, 9 }
  0x9a   : > { %v2066_v31 = vrot.slane %v2064_v15, 5 }
  0x9b   : > { %3076 = vmatpush3.bf16.msra.mxu1 %v3362_v20  ;;  %v2241_v20 = vld [vmem:[#allocation2 + $0x38] sm:$0xe]  ;;  %v2080_v7 = vrot.slane %v2078_v16, 5 }
  0x9c   : > { %3170 = vmatpush3.bf16.msra.mxu0 %v3361_v52  ;;  %3077 = vmatprep.subr.bf16.mxu1 %v3364_v26  ;;  %v2011_v52 = vsel %vm3566_vm8, %v2006_v49, %v2010_v62  ;;  %v2825_v46 = vrot.slane %v2241_v20, 9  ;;  %v2067_v2 = vsel %vm3566_vm8, %v2062_v29, %v2066_v31  ;;  %v2243_v49 = vld [vmem:[#allocation2 + $0x48] sm:$0xe]  ;;  %v2286_v62 = vrot.slane %v3985_v61, 5 }
  0x9d   : > { %3171 = vmatprep.subr.bf16.mxu0 %v3363_v11  ;;  %v2809_v10 = vcombine.low %v2011_v52, %v2025_v56  ;;  %v2081_v19 = vsel %vm3566_vm8, %v2076_v50, %v2080_v7  ;;  %v2827_v53 = vrot.slane %v2243_v49, 9 }
  0x9e   : > { %v2283_v13 = vsel %vm3785_vm11, %v2825_v46, %v2282_v41  ;;  %v2811_v23 = vcombine.low %v2067_v2, %v2081_v19 }
  0x9f   : > { %3078 = vmatpush3.bf16.msra.mxu1 %v3364_v26  ;;  %v2824_v26 = vrot.slane %v2240_v1, 9  ;;  %v2291_v61 = vsel %vm3785_vm11, %v2827_v53, %v2290_v30  ;;  %v2275_v1 = vsel %vm3785_vm11, %v2823_v51, %v2274_v34 }
  0xa0   : > { %3172 = vmatpush3.bf16.msra.mxu0 %v3363_v11  ;;  %3079 = vmatprep.subr.bf16.mxu1 %v3367_v44  ;;  %v3375_v11 = vld [vmem:[%s4068_s3 + $0x208] sm:$0xff]  }
  0xa1   : > { %3173 = vmatprep.subr.bf16.mxu0 %v3365_v42  ;;  %v2279_v12 = vsel %vm3785_vm11, %v2824_v26, %v2278_v35 }
  0xa2   : > { %v2846_v59 = vcombine.low %v2279_v12, %v2283_v13 }
  0xa3   : > { %3080 = vmatpush3.bf16.msra.mxu1 %v3367_v44  ;;  %v2237_v44 = vld [vmem:[#allocation2 + $0x18] sm:$0xe] }
  0xa4   : > { %3174 = vmatpush3.bf16.msra.mxu0 %v3365_v42  ;;  %3081 = vmatprep.subr.bf16.mxu1 %v3370_v47  ;;  %v3378_v42 = vld [vmem:[%s4068_s3 + $0x210] sm:$0xff]   ;;  %v2821_v21 = vrot.slane %v2237_v44, 9 }
  0xa5   : > { %3175 = vmatprep.subr.bf16.mxu0 %v3369_v38 }
  0xa6   : > { %v2267_v9 = vsel %vm3785_vm11, %v2821_v21, %v2266_v3 }
  0xa7   : > { %3082 = vmatpush3.bf16.msra.mxu1 %v3370_v47  ;;  %v2844_v24 = vcombine.low %v2263_v63, %v2267_v9  ;;  %v3382_v47 = vld [vmem:[%s4068_s3 + $0x230] sm:$0xff]  }
  0xa8   : > { %3176 = vmatpush3.bf16.msra.mxu0 %v3369_v38  ;;  %3211 = vmatprep.subr.bf16.mxu1 %v3374_v57  ;;  %v2242_v38 = vld [vmem:[#allocation2 + $0x40] sm:$0xe] }
  0xa9   : > { %3177 = vmatprep.subr.bf16.mxu0 %v3371_v40  ;;  %v2826_v60 = vrot.slane %v2242_v38, 9 }
  0xaa   : > { %3084 = vmatmul.mubr.bf16.vlgmr.msra.gmra.mrb[0].mxu1 %v3373_v5 }
  0xab   : > { %3219 = vmatpush3.bf16.msra.mxu1 %v3374_v57  ;;  %3087 = vmatprep.mubr.bf16.mxu1 %v3376_v8  ;;  %v2287_v32 = vsel %vm3785_vm11, %v2826_v60, %v2286_v62 }
  0xac   : > { %3178 = vmatpush3.bf16.msra.mxu0 %v3371_v40  ;;  %3212 = vmatprep.subr.bf16.mxu1 %v3375_v11  ;;  %v2271_v40 = vsel %vm3785_vm11, %v2822_v39, %v2270_v37 }
  0xad   : > { %3187 = vmatprep.subr.bf16.mxu0 %v3374_v57  ;;  %v2845_v20 = vcombine.low %v2271_v40, %v2275_v1 }
  0xaf   : > { %3180 = vmatmul.mubr.bf16.vlgmr.msra.gmra.mrb[0].mxu0 %v2809_v10  ;;  %3220 = vmatpush3.bf16.msra.mxu1 %v3375_v11 }
  0xb0   : > { %3188 = vmatpush3.bf16.msra.mxu0 %v3374_v57  ;;  %3183 = vmatprep.mubr.bf16.mxu0 %v2810_v6  ;;  %v2847_v57 = vcombine.low %v2287_v32, %v2291_v61 }
  0xb1   : > { %3189 = vmatprep.subr.bf16.mxu0 %v3375_v11  ;;  %3213 = vmatprep.subr.bf16.mxu1 %v3378_v42 }
  0xb2   : > { %3088 = vmatmul.mubr.bf16.gmra.mrb[4].mxu1 %v3377_v45 }
  0xb3   : > { %3221 = vmatpush3.bf16.msra.mxu1 %v3378_v42  ;;  %3207 = vmatprep.mubr.bf16.mxu1 %v2846_v59 }
  0xb4   : > { %3190 = vmatpush3.bf16.msra.mxu0 %v3375_v11  ;;  %3214 = vmatprep.subr.bf16.mxu1 %v3379_v28 }
  0xb5   : > { %3191 = vmatprep.subr.bf16.mxu0 %v3378_v42 }
  0xb7   : > { %3184 = vmatmul.mubr.bf16.gmra.mrb[4].mxu0 %v2811_v23  ;;  %3222 = vmatpush3.bf16.msra.mxu1 %v3379_v28 }
  0xb8   : > { %3192 = vmatpush3.bf16.msra.mxu0 %v3378_v42  ;;  %3215 = vmatprep.subr.bf16.mxu1 %v3380_v27 }
  0xb9   : > { %3193 = vmatprep.subr.bf16.mxu0 %v3379_v28  ;;  %3203 = vmatprep.mubr.bf16.mxu0 %v2844_v24 }
  0xbb   : > { %3223 = vmatpush3.bf16.msra.mxu1 %v3380_v27 }
  0xbc   : > { %3194 = vmatpush3.bf16.msra.mxu0 %v3379_v28  ;;  %3216 = vmatprep.subr.bf16.mxu1 %v3381_v33 }
  0xbd   : > { %3195 = vmatprep.subr.bf16.mxu0 %v3380_v27 }
  0xbf   : > { %3224 = vmatpush3.bf16.msra.mxu1 %v3381_v33 }
  0xc0   : > { %3196 = vmatpush3.bf16.msra.mxu0 %v3380_v27  ;;  %3217 = vmatprep.subr.bf16.mxu1 %v3382_v47 }
  0xc1   : > { %3197 = vmatprep.subr.bf16.mxu0 %v3381_v33 }
  0xc3   : > { %3225 = vmatpush3.bf16.msra.mxu1 %v3382_v47 }
  0xc4   : > { %3198 = vmatpush3.bf16.msra.mxu0 %v3381_v33  ;;  %3218 = vmatprep.subr.bf16.mxu1 %v3383_v4 }
  0xc5   : > { %3199 = vmatprep.subr.bf16.mxu0 %v3382_v47 }
  0xc7   : > { %3226 = vmatpush3.bf16.msra.mxu1 %v3383_v4 }
  0xc8   : > { %3200 = vmatpush3.bf16.msra.mxu0 %v3382_v47 }
  0xc9   : > { %3201 = vmatprep.subr.bf16.mxu0 %v3383_v4 }
  0xca   : > { %3208 = vmatmul.mubr.bf16.vlgmr.msra.gmra.mrb[8].mxu1 %v2847_v57 }
  0xcc   : > { %3202 = vmatpush3.bf16.msra.mxu0 %v3383_v4 }
  0xcf   : > { %3204 = vmatmul.mubr.bf16.vlgmr.msra.gmra.mrb[0].mxu0 %v2845_v20 }
 0x17d   : > { %v3085_v5 = vpop.f32.mrb[0].mxu1 }
 0x17e   : > { %v1252_v25 = vpop.f32.mrb[1].mxu1 }
 0x17f   : > { %v3086_v52 = vpop.f32.mrb[2].mxu1 }
 0x180   : > { %v1255_v48 = vpop.f32.mrb[3].mxu1 }
 0x185   : > { %v3089_v56 = vpop.f32.mrb[4].mxu1 }
 0x186   : > { %v1268_v15 = vpop.f32.mrb[5].mxu1 }
 0x187   : > { %v3090_v16 = vpop.f32.mrb[6].mxu1 }
 0x188   : > { %v1271_v8 = vpop.f32.mrb[7].mxu1 }
 0x18a   : > { %v3185_v14 = vpop.f32.mrb[4].mxu0 }
 0x18b   : > { %v3231_v22 = vadd.f32 %v3185_v14, %v3089_v56  ;;  %v2213_v18 = vpop.f32.mrb[5].mxu0 }
 0x18c   : > { %v3233_v36 = vadd.f32 %v2213_v18, %v1268_v15  ;;  %v3186_v55 = vpop.f32.mrb[6].mxu0 }
 0x18d   : > { %v3235_v11 = vadd.f32 %v3186_v55, %v3090_v16  ;;  %v2216_v26 = vpop.f32.mrb[7].mxu0 }
 0x18e   : > { %v3237_v35 = vadd.f32 %v2216_v26, %v1271_v8 }
 0x19d   : > { %v3209_v46 = vpop.f32.mrb[8].mxu1 }
 0x19e   : > { %v3232_v41 = vadd.f32 %v3231_v22, %v3209_v46  ;;  %v2423_v10 = vpop.f32.mrb[9].mxu1 }
 0x19f   : > { %v3234_v6 = vadd.f32 %v3233_v36, %v2423_v10  ;;  %v3210_v31 = vpop.f32.mrb[10].mxu1 }
 0x1a0   : > { %2452 = vst [vmem:[%s231_s13 + $0x30] sm:$0xff] %v3232_v41  ;;  %v3236_v7 = vadd.f32 %v3235_v11, %v3210_v31  ;;  %v2426_v58 = vpop.f32.mrb[11].mxu1  ;;  %v2474_v62 = vmul.f32 %v3232_v41, %v3232_v41 }
 0x1a1   : > { %2450 = vst [vmem:[%s231_s13 + $0x20] sm:$0xff] %v3234_v6  ;;  %v3238_v44 = vadd.f32 %v3237_v35, %v2426_v58  ;;  %v2472_v27 = vmul.f32 %v3234_v6, %v3234_v6 }
 0x1a2   : > { %v3205_v29 = vpop.f32.mrb[0].mxu0  ;;  %2453 = vst [vmem:[%s231_s13 + $0x38] sm:$0xff] %v3236_v7  ;;  %v2475_v53 = vmul.f32 %v3236_v7, %v3236_v7 }
 0x1a3   : > { %v3227_v50 = vadd.f32 %v3205_v29, %v3085_v5  ;;  %v2407_v12 = vpop.f32.mrb[1].mxu0  ;;  %2451 = vst [vmem:[%s231_s13 + $0x28] sm:$0xff] %v3238_v44  ;;  %v2473_v38 = vmul.f32 %v3238_v44, %v3238_v44 }
 0x1a4   : > { %v3228_v13 = vadd.f32 %v2407_v12, %v1252_v25  ;;  %v3206_v42 = vpop.f32.mrb[2].mxu0 }
 0x1a5   : > { %2448 = vst [vmem:[%s231_s13 + $0x10] sm:$0xff] %v3227_v50  ;;  %v3229_v45 = vadd.f32 %v3206_v42, %v3086_v52  ;;  %v2410_v54 = vpop.f32.mrb[3].mxu0  ;;  %v2470_v2 = vmul.f32 %v3227_v50, %v3227_v50 }
 0x1a6   : > { %2446 = vst [vmem:[%s231_s13] sm:$0xff] %v3228_v13  ;;  %v3230_v17 = vadd.f32 %v2410_v54, %v1255_v48  ;;  %v2468_v21 = vmul.f32 %v3228_v13, %v3228_v13 }
 0x1a7   : > { %2449 = vst [vmem:[%s231_s13 + $0x18] sm:$0xff] %v3229_v45  ;;  %v2471_v63 = vmul.f32 %v3229_v45, %v3229_v45 }
 0x1a8   : > { %2447 = vst [vmem:[%s231_s13 + $0x8] sm:$0xff] %v3230_v17  ;;  %v2454_v3 = vadd.f32 %v3230_v17, %v3228_v13  ;;  %v2469_v59 = vmul.f32 %v3230_v17, %v3230_v17 }
 0x1aa   : > { %v2455_v19 = vadd.f32 %v3227_v50, %v2454_v3  ;;  %v2476_v28 = vadd.f32 %v2469_v59, %v2468_v21 }
 0x1ac   : > { %v2477_v9 = vadd.f32 %v2476_v28, %v2470_v2  ;;  %v2456_v23 = vadd.f32 %v3229_v45, %v2455_v19 }
 0x1ae   : > { %v2457_v24 = vadd.f32 %v3234_v6, %v2456_v23  ;;  %v2478_v33 = vadd.f32 %v2477_v9, %v2471_v63 }
 0x1b0   : > { %v2458_v47 = vadd.f32 %v3238_v44, %v2457_v24  ;;  %v2479_v49 = vadd.f32 %v2478_v33, %v2472_v27 }
 0x1b2   : > { %v2459_v30 = vadd.f32 %v3232_v41, %v2458_v47  ;;  %v2480_v60 = vadd.f32 %v2479_v49, %v2473_v38 }
 0x1b4   : > { %v2460_v4 = vadd.f32 %v3236_v7, %v2459_v30  ;;  %v2481_v43 = vadd.f32 %v2480_v60, %v2474_v62 }
 0x1b6   : > { %v2461_v0 = vrot.slane %v2460_v4, 4  ;;  %v2482_v32 = vadd.f32 %v2481_v43, %v2475_v53 }
 0x1b8   : > { %v2462_v61 = vadd.f32 %v2461_v0, %v2460_v4  ;;  %v2483_v39 = vrot.slane %v2482_v32, 4 }
 0x1ba   : > { %v2463_v37 = vrot.slane %v2462_v61, 2  ;;  %v2484_v51 = vadd.f32 %v2483_v39, %v2482_v32 }
 0x1bc   : > { %v2464_v34 = vadd.f32 %v2463_v37, %v2462_v61  ;;  %v2485_v57 = vrot.slane %v2484_v51, 2 }
 0x1be   : > { %v2465_v40 = vrot.slane %v2464_v34, 1  ;;  %v2486_v1 = vadd.f32 %v2485_v57, %v2484_v51 }
 0x1c0   : > { %v2466_v20 = vadd.f32 %v2465_v40, %v2464_v34  ;;  %v2487_v5 = vrot.slane %v2486_v1, 1 }
 0x1c2   : > { %2467 = vst [vmem:[%s235_s17] sm:$0x1] %v2466_v20  ;;  %v2488_v25 = vadd.f32 %v2487_v5, %v2486_v1 }
 0x1c4   : > { %2489 = vst [vmem:[%s235_s17 + $0x1] sm:$0x1] %v2488_v25 }
 0x1c5 PF: > { %s16_s18 = sadd.s32 1, %s3390_s18  }
 0x1c6   : > { %p13_p4 = scmp.ge.s32.totalorder %s16_s18, 4  }
 0x1c8   :  { %15 = sbr.rel (!%p13_p4) target bundleno = 1 (0x1), region = 88 }

</bundles_post_ra>
